<compile_context>
chip_gen: v7x
topology: tpu7x:2x2x1
jax: 0.10.0
libtpu: 0.0.40
codegen_flags: <defaults>
</compile_context>

<pallas_src>
import math

import jax
import jax.numpy as jnp
from jax.experimental import pallas as pl
from jax.experimental.pallas import tpu as pltpu


def _gelu(x):
    # TODO(synk): PyTorch nn.GELU defaults to the exact erf formulation; the
    # tanh approximation is used here for portable Mosaic lowering
    # (max abs deviation ~1e-3, well inside the test tolerance).
    return jax.nn.gelu(x, approximate=True)


# ---------------------------------------------------------------------------
# Fused FeedForward kernel: out = GELU(x @ W1 + b1) @ W2 + b2
# (Dropout with the module's default p=0.0 is the identity in eval/forward.)
# ---------------------------------------------------------------------------
def _ff_kernel(x_ref, w1_ref, b1_ref, w2_ref, b2_ref, o_ref):
    x = x_ref[...]                                                       # (rt, D)
    h = jnp.dot(x, w1_ref[...], preferred_element_type=jnp.float32)     # (rt, H) f32
    h = _gelu(h + b1_ref[...])
    o = jnp.dot(h.astype(w2_ref.dtype), w2_ref[...],
                preferred_element_type=jnp.float32) + b2_ref[...]        # (rt, D) f32
    o_ref[...] = o.astype(o_ref.dtype)


def feed_forward(x, params, *, row_tile=256):
    """Fused FeedForward. x: (..., D) -> (..., D)."""
    orig_shape = x.shape
    D = orig_shape[-1]
    H = params['w1'].shape[1]
    rows = math.prod(orig_shape[:-1])

    x2 = x.reshape(rows, D)

    # Row tile: as large as possible (<= row_tile), multiple of 8 sublanes.
    rt = min(row_tile, rows)
    rt = max(8, (rt // 8) * 8)
    padded_rows = ((rows + rt - 1) // rt) * rt
    if padded_rows != rows:
        x2 = jnp.pad(x2, ((0, padded_rows - rows), (0, 0)))
    grid = (padded_rows // rt,)

    out = pl.pallas_call(
        _ff_kernel,
        out_shape=jax.ShapeDtypeStruct((padded_rows, D), x.dtype),
        grid=grid,
        in_specs=[
            pl.BlockSpec((rt, D), lambda i: (i, 0)),          # activations: tiled rows
            pl.BlockSpec((D, H), lambda i: (0, 0)),           # W1: VMEM-resident
            pl.BlockSpec((1, H), lambda i: (0, 0)),           # b1
            pl.BlockSpec((H, D), lambda i: (0, 0)),           # W2: VMEM-resident
            pl.BlockSpec((1, D), lambda i: (0, 0)),           # b2
        ],
        out_specs=pl.BlockSpec((rt, D), lambda i: (i, 0)),
        compiler_params=pltpu.CompilerParams(
            dimension_semantics=("parallel",)),                # megacore-friendly (v7x)
    )(x2, params['w1'], params['b1'].reshape(1, H),
      params['w2'], params['b2'].reshape(1, D))

    if padded_rows != rows:
        out = out[:rows]
    return out.reshape(orig_shape)


# ---------------------------------------------------------------------------
# Parameters (equivalent to nn.Linear(dim, dim*mult) / nn.Linear(dim*mult, dim))
# ---------------------------------------------------------------------------
def init_params(key, dim, mult=4):
    k1, k2, k3, k4 = jax.random.split(key, 4)
    H = dim * mult
    s1 = 1.0 / math.sqrt(dim)
    s2 = 1.0 / math.sqrt(H)
    return {
        'w1': jax.random.uniform(k1, (dim, H), jnp.float32, -s1, s1),
        'b1': jax.random.uniform(k2, (H,), jnp.float32, -s1, s1),
        'w2': jax.random.uniform(k3, (H, dim), jnp.float32, -s2, s2),
        'b2': jax.random.uniform(k4, (dim,), jnp.float32, -s2, s2),
    }


def feed_forward_reference(x, params):
    """Plain-JAX reference (same GELU approximation) for correctness checking."""
    h = _gelu(jnp.einsum('...d,dh->...h', x, params['w1']) + params['b1'])
    return jnp.einsum('...h,hd->...d', h, params['w2']) + params['b2']


if __name__ == "__main__":
    key = jax.random.PRNGKey(0)
    kp, kx = jax.random.split(key)

    # Small shapes: batch=2, seq=256, dim=128 (lane-dense feature axis), mult=4.
    B, N, DIM, MULT = 2, 256, 128, 4

    params = init_params(kp, DIM, MULT)
    x = jax.random.normal(kx, (B, N, DIM), jnp.float32)

    fwd = jax.jit(feed_forward)
    out = jax.block_until_ready(fwd(x, params))

    ref = feed_forward_reference(x, params)

    assert out.shape == (B, N, DIM), out.shape
    assert out.dtype == x.dtype, out.dtype
    assert bool(jnp.all(jnp.isfinite(out)))
    assert bool(jnp.allclose(out, ref, atol=1e-4, rtol=1e-4)), \
        float(jnp.max(jnp.abs(out - ref)))
    print("KERNEL_OK")
</pallas_src>

<mosaic_0001>
module attributes {stable_mosaic.version = 11 : i64} {
  func.func @_ff_kernel(%arg0: i32, %arg1: memref<256x128xf32, #tpu.memory_space<vmem>>, %arg2: memref<128x512xf32, #tpu.memory_space<vmem>>, %arg3: memref<1x512xf32, #tpu.memory_space<vmem>>, %arg4: memref<512x128xf32, #tpu.memory_space<vmem>>, %arg5: memref<1x128xf32, #tpu.memory_space<vmem>>, %arg6: memref<256x128xf32, #tpu.memory_space<vmem>>) attributes {dimension_semantics = [#tpu.dimension_semantics<parallel>], iteration_bounds = array<i64: 2>, scalar_prefetch = 0 : i64, scratch_operands = 0 : i64, tpu.core_type = #tpu.core_type<tc>, window_params = [{transform_indices = @transform_0, window_bounds = array<i64: 256, 128>}, {pipeline_mode = #tpu.pipeline_mode<synchronous>, transform_indices = @transform_1, window_bounds = array<i64: 128, 512>}, {pipeline_mode = #tpu.pipeline_mode<synchronous>, transform_indices = @transform_2, window_bounds = array<i64: 1, 512>}, {pipeline_mode = #tpu.pipeline_mode<synchronous>, transform_indices = @transform_3, window_bounds = array<i64: 512, 128>}, {pipeline_mode = #tpu.pipeline_mode<synchronous>, transform_indices = @transform_4, window_bounds = array<i64: 1, 128>}, {transform_indices = @transform_5, window_bounds = array<i64: 256, 128>}]} {
    %c0 = arith.constant 0 : index
    %c0_0 = arith.constant 0 : index
    %0 = vector.load %arg1[%c0, %c0_0] : memref<256x128xf32, #tpu.memory_space<vmem>>, vector<256x128xf32>
    %c0_1 = arith.constant 0 : index
    %c0_2 = arith.constant 0 : index
    %1 = vector.load %arg2[%c0_1, %c0_2] : memref<128x512xf32, #tpu.memory_space<vmem>>, vector<128x512xf32>
    %cst = arith.constant dense<0.000000e+00> : vector<256x512xf32>
    %2 = tpu.matmul %0, %1, %cst {dimension_numbers = #tpu.dot_dimension_numbers<[1], [0], [0], [1], [0, 0, 1, 1], [], []>} : vector<256x128xf32>, vector<128x512xf32>, vector<256x512xf32> -> vector<256x512xf32>
    %c0_3 = arith.constant 0 : index
    %c0_4 = arith.constant 0 : index
    %3 = vector.load %arg3[%c0_3, %c0_4] : memref<1x512xf32, #tpu.memory_space<vmem>>, vector<1x512xf32>
    %4 = vector.broadcast %3 : vector<1x512xf32> to vector<256x512xf32>
    %5 = arith.addf %2, %4 : vector<256x512xf32>
    %6 = arith.mulf %5, %5 : vector<256x512xf32>
    %7 = arith.mulf %5, %6 : vector<256x512xf32>
    %cst_5 = arith.constant 4.471500e-02 : f32
    %8 = vector.broadcast %cst_5 : f32 to vector<256x512xf32>
    %9 = arith.mulf %8, %7 : vector<256x512xf32>
    %10 = arith.addf %5, %9 : vector<256x512xf32>
    %cst_6 = arith.constant 0.797884583 : f32
    %11 = vector.broadcast %cst_6 : f32 to vector<256x512xf32>
    %12 = arith.mulf %11, %10 : vector<256x512xf32>
    %13 = math.tanh %12 : vector<256x512xf32>
    %cst_7 = arith.constant 1.000000e+00 : f32
    %14 = vector.broadcast %cst_7 : f32 to vector<256x512xf32>
    %15 = arith.addf %14, %13 : vector<256x512xf32>
    %cst_8 = arith.constant 5.000000e-01 : f32
    %16 = vector.broadcast %cst_8 : f32 to vector<256x512xf32>
    %17 = arith.mulf %16, %15 : vector<256x512xf32>
    %18 = arith.mulf %5, %17 : vector<256x512xf32>
    %c0_9 = arith.constant 0 : index
    %c0_10 = arith.constant 0 : index
    %19 = vector.load %arg4[%c0_9, %c0_10] : memref<512x128xf32, #tpu.memory_space<vmem>>, vector<512x128xf32>
    %cst_11 = arith.constant dense<0.000000e+00> : vector<256x128xf32>
    %20 = tpu.matmul %18, %19, %cst_11 {dimension_numbers = #tpu.dot_dimension_numbers<[1], [0], [0], [1], [0, 0, 1, 1], [], []>} : vector<256x512xf32>, vector<512x128xf32>, vector<256x128xf32> -> vector<256x128xf32>
    %c0_12 = arith.constant 0 : index
    %c0_13 = arith.constant 0 : index
    %21 = vector.load %arg5[%c0_12, %c0_13] : memref<1x128xf32, #tpu.memory_space<vmem>>, vector<1x128xf32>
    %22 = vector.broadcast %21 : vector<1x128xf32> to vector<256x128xf32>
    %23 = arith.addf %20, %22 : vector<256x128xf32>
    %c0_14 = arith.constant 0 : index
    %c0_15 = arith.constant 0 : index
    %24 = vector.load %arg6[%c0_14, %c0_15] : memref<256x128xf32, #tpu.memory_space<vmem>>, vector<256x128xf32>
    tpu.vector_store %arg6[%c0_14, %c0_15], %23 {strides = array<i32>} : memref<256x128xf32, #tpu.memory_space<vmem>>, vector<256x128xf32>,
    return
  }
  func.func @transform_0(%arg0: i32) -> (i32, i32) {
    %c0_i32 = arith.constant 0 : i32
    %c0_i32_0 = arith.constant 0 : i32
    return %arg0, %c0_i32 : i32, i32
  }
  func.func @transform_1(%arg0: i32) -> (i32, i32) {
    %c0_i32 = arith.constant 0 : i32
    %c0_i32_0 = arith.constant 0 : i32
    %c0_i32_1 = arith.constant 0 : i32
    return %c0_i32, %c0_i32_0 : i32, i32
  }
  func.func @transform_2(%arg0: i32) -> (i32, i32) {
    %c0_i32 = arith.constant 0 : i32
    %c0_i32_0 = arith.constant 0 : i32
    %c0_i32_1 = arith.constant 0 : i32
    return %c0_i32, %c0_i32_0 : i32, i32
  }
  func.func @transform_3(%arg0: i32) -> (i32, i32) {
    %c0_i32 = arith.constant 0 : i32
    %c0_i32_0 = arith.constant 0 : i32
    %c0_i32_1 = arith.constant 0 : i32
    return %c0_i32, %c0_i32_0 : i32, i32
  }
  func.func @transform_4(%arg0: i32) -> (i32, i32) {
    %c0_i32 = arith.constant 0 : i32
    %c0_i32_0 = arith.constant 0 : i32
    %c0_i32_1 = arith.constant 0 : i32
    return %c0_i32, %c0_i32_0 : i32, i32
  }
  func.func @transform_5(%arg0: i32) -> (i32, i32) {
    %c0_i32 = arith.constant 0 : i32
    %c0_i32_0 = arith.constant 0 : i32
    return %arg0, %c0_i32 : i32, i32
  }
}

</mosaic_0001>

<bundles_post_ra>
// kernel: feed_forward.1
= control target key start
LH: loop header
LB: loop body
LE: loop exit
PB: predicated region body
PF: predicated region fallthrough
CT: control target
= control target key end

     0   :  { %10 = vsyncpa [#allocation3], 0  ;;  %s5679_s0 = inlined_call_operand.hbm [shape: f32[512,128], index: 0, kind: input, shape index: {}]   ;;  %s5680_s1 = inlined_call_operand.hbm [shape: f32[128,512], index: 1, kind: input, shape index: {}]   ;;  %s5681_s2 = inlined_call_operand.vmem [shape: f32[1,512], index: 2, kind: input, shape index: {}]   ;;  %s5682_s3 = inlined_call_operand.hbm [shape: f32[512,128], index: 3, kind: input, shape index: {}]   ;;  %s5683_s4 = inlined_call_operand.vmem [shape: f32[1,128], index: 4, kind: input, shape index: {}]   ;;  %s5684_s5 = inlined_call_operand.hbm [shape: f32[512,128], index: 5, kind: output, shape index: {}]  }
   0x1   :  { %12 = vsyncpa [#allocation3 + $0x1], 0 }
   0x2   :  { %13 = vsyncpa [#allocation6], 0 }
   0x3   :  { %14 = vsyncpa [#allocation4], 0 }
   0x4   :  { %16 = vsyncpa [#allocation4 + $0x1], 0  ;;  %s3493_s18 = smov 0   ;;  %s3495_s19 = smov 0  }
   0x5   :  { %s3497_s20 = smov 0   ;;  %s3499_s21 = smov 0  }
   0x6 LB: > { %s3514_s22 = sadd.s32 4294967295, %s3449_s21   ;;  %s2717_s23 = sadd.s32 4294967294, %s3449_s21   ;;  %s3449_s21 = sphi %s3499_s21, %s6143_s21   ;;  %s3445_s20 = sphi %s3497_s20, %s6142_s20   ;;  %s3441_s19 = sphi %s3495_s19, %s6141_s19   ;;  %s3437_s18 = sphi %s3493_s18, %s6140_s18  }
   0x7   : > { %p42_p0 = scmp.ne.s32.totalorder %s3441_s19, %s3437_s18  ;;  %p5685_p1 = scmp.eq.s32.totalorder %s3514_s22, 0 }
   0x8   : > { %p156_p3 = scmp.eq.s32.totalorder %s2717_s23, 1  ;;  %p2718_p5 = scmp.ge.s32.totalorder %s3449_s21, 1 }
   0x9   : > { %p3523_p4 = por %p5685_p1, %p42_p0  ;;  %p163_p7 = scmp.lt.s32.totalorder %s3449_s21, 3 }
   0xa   : > { %p3528_p6 = por %p156_p3, %p42_p0  ;;  %s3451_s27 = smov [#allocation5]  }
   0xb   : > { %s5775_s24 = scalar_select %p3523_p4, 1, 0 }
   0xc   : > { %s5776_s25 = scalar_select %p3528_p6, 1, 0 }
   0xd   : > { %p3533_p8 = pnand %p2718_p5, %p163_p7  ;;  %s175_s28 = sshll.u32 %s3451_s27, 4  ;;  %s3537_s28 = int_to_ptr.vmem [resolvable:$true] %s175_s28 }
   0xe   : > { %s3452_s30 = smov [#allocation7]   ;;  %s3293_s9 = scalar_lea.hbm %s5680_s1, 8192 }
   0xf   : > { %p2974_p9 = pneg %p3533_p8  ;;  %s191_s6 = sshll.u32 %s3452_s30, 4  ;;  %s3548_s6 = int_to_ptr.vmem [resolvable:$true] %s191_s6 }
  0x10   : > { %p3294_p12 = scmp.ne.s32.totalorder %s5680_s1, %s3293_s9  ;;  %p3300_p5 = scmp.lt.u32.totalorder %s3293_s9, %s5680_s1 }
  0x11   : > { %p3544_p11 = pnand %p2974_p9, %p5685_p1 }
  0x13   : > { %p3295_p13 = pneg %p3544_p11 }
  0x15   : > { %p3296_p0 = pnand %p3295_p13, %p3294_p12 }
  0x17   : > { %p3297_p3 = pneg %p3296_p0 }
  0x19   : > { %p3302_p7 = pnand %p3300_p5, %p3297_p3 }
  0x1b   : > { %3305 = shalt.err (!%p3302_p7)
}
  0x1c   : > { %s3306_s14 = scalar_lea.vmem %s3537_s28, 8192  ;;  %p3314_p2 = scmp.lt.s32.totalorder %s3537_s28, %s3537_s28 }
  0x1d   : > { %p3307_p9 = scmp.ne.s32.totalorder %s3537_s28, %s3306_s14  ;;  %p3315_p12 = scmp.lt.s32.totalorder %s3306_s14, %s3306_s14 }
  0x1f   : > { %p3309_p10 = pnand %p3307_p9, %p3295_p13  ;;  %p3316_p0 = por %p3315_p12, %p3314_p2 }
  0x21   : > { %p3310_p1 = pneg %p3309_p10 }
  0x23   : > { %p3317_p6 = pnand %p3316_p0, %p3310_p1 }
  0x25   : > { %3320 = shalt.err (!%p3317_p6)
}
  0x26   : > { %s3453_s15 = smov 512   ;;  %s3454_s16 = smov 32  }
  0x27   : > { %2977 = dma.hbm_to_vmem [thread:$0]  (!%p3544_p11), %s5680_s1, 8192, %s3537_s28, [#allocation6], %s3453_s15, %s3453_s15, %s3454_s16  }
  0x28   : > { %s3321_s7 = scalar_lea.hbm %s5682_s3, 8192 }
  0x29   : > { %p3322_p2 = scmp.ne.s32.totalorder %s5682_s3, %s3321_s7  ;;  %p3328_p10 = scmp.lt.u32.totalorder %s3321_s7, %s5682_s3 }
  0x2b   : > { %p3324_p1 = pnand %p3322_p2, %p3295_p13 }
  0x2d   : > { %p3325_p6 = pneg %p3324_p1 }
  0x2f   : > { %p3330_p3 = pnand %p3328_p10, %p3325_p6 }
  0x31   : > { %3333 = shalt.err (!%p3330_p3)
}
  0x32   : > { %s3334_s28 = scalar_lea.vmem %s3548_s6, 8192  ;;  %p3342_p12 = scmp.lt.s32.totalorder %s3548_s6, %s3548_s6 }
  0x33   : > { %p3335_p5 = scmp.ne.s32.totalorder %s3548_s6, %s3334_s28  ;;  %p3343_p0 = scmp.lt.s32.totalorder %s3334_s28, %s3334_s28 }
  0x35   : > { %p3337_p7 = pnand %p3335_p5, %p3295_p13  ;;  %p3344_p2 = por %p3343_p0, %p3342_p12 }
  0x37   : > { %p3338_p9 = pneg %p3337_p7 }
  0x39   : > { %p3345_p1 = pnand %p3344_p2, %p3338_p9 }
  0x3b   : > { %3348 = shalt.err (!%p3345_p1)
}
  0x3c   : > { %s3455_s12 = smov 128   ;;  %s3456_s13 = smov 8  }
  0x3d   : > { %2980 = dma.hbm_to_vmem [thread:$0]  (!%p3544_p11), %s5682_s3, 8192, %s3548_s6, [#allocation6], %s3455_s12, %s3455_s12, %s3456_s13  }
  0x3e   : > { %s3606_s16 = sadd.s32 1, %s3449_s21   ;;  %s29_s23 = sadd.s32 1, %s3445_s20 }
  0x3f   : > { %s26_s17 = ssub.s32 %s3449_s21, %s3606_s16  ;;  %p36_p6 = scmp.ne.s32.totalorder %s3445_s20, %s3441_s19 }
  0x40   : > { %p27_p13 = scmp.eq.s32.totalorder %s26_s17, 0  ;;  %p37_p10 = scmp.eq.s32.totalorder %s3449_s21, 0 }
  0x41   : > { %p5779_p5 = scmp.eq.s32.totalorder %s3514_s22, 1  ;;  %p2991_p9 = scmp.lt.s32.totalorder %s3449_s21, 2 }
  0x42   : > { %s3615_s27 = scalar_select %p27_p13, %s3445_s20, %s29_s23  }
  0x43   : > { %p38_p3 = por %p37_p10, %p36_p6  ;;  %p3619_p7 = por %p5779_p5, %p36_p6 }
  0x44   : > { %s208_s30 = sand.u32 1, %s3445_s20   ;;  %s2736_s6 = sshll.u32 %s3449_s21, 12 }
  0x45   : > { %s5780_s29 = scalar_select %p3619_p7, 1, 0 }
  0x46   : > { %s2722_s7 = sshll.u32 %s208_s30, 8  ;;  %s3629_s10 = scalar_lea.hbm %s5679_s0, %s2736_s6 }
  0x47   : > { %s212_s11 = scalar_lea.vmem [#allocation2], %s2722_s7  ;;  %p3633_p11 = pnand %p2991_p9, %p38_p3 }
  0x48   : > { %s219_s28 = sshll.u32 %s212_s11, 4  ;;  %s3637_s15 = scalar_lea.sflag [#allocation3], %s208_s30  ;;  %s3631_s28 = int_to_ptr.vmem [resolvable:$true] %s219_s28 }
  0x49   : > { %s3349_s17 = scalar_lea.hbm %s3629_s10, 4096  ;;  %p3351_p0 = pneg %p3633_p11 }
  0x4a   : > { %p3350_p12 = scmp.ne.s32.totalorder %s3629_s10, %s3349_s17  ;;  %s3354_s6 = scalar_lea.hbm %s5679_s0, 8192 }
  0x4b   : > { %p3355_p13 = scmp.lt.u32.totalorder %s3629_s10, %s5679_s0  ;;  %p3356_p6 = scmp.lt.u32.totalorder %s3354_s6, %s3349_s17 }
  0x4c   : > { %p3352_p2 = pnand %p3351_p0, %p3350_p12  ;;  %p3358_p3 = scmp.lt.u32.totalorder %s3349_s17, %s3629_s10 }
  0x4d   : > { %p3357_p10 = por %p3356_p6, %p3355_p13 }
  0x4e   : > { %p3353_p1 = pneg %p3352_p2 }
  0x4f   : > { %p3359_p5 = por %p3358_p3, %p3357_p10 }
  0x51   : > { %p3360_p9 = pnand %p3359_p5, %p3353_p1 }
  0x53   : > { %3363 = shalt.err (!%p3360_p9)
}
  0x54   : > { %s3364_s30 = scalar_lea.vmem %s3631_s28, 4096  ;;  %s3457_s11 = smov [#allocation2]  }
  0x55   : > { %p3365_p12 = scmp.ne.s32.totalorder %s3631_s28, %s3364_s30  ;;  %s3369_s23 = sshll.u32 %s3457_s11, 4  ;;  %s3370_s23 = int_to_ptr.vmem [resolvable:$false] %s3369_s23 }
  0x56   : > { %s3371_s7 = scalar_lea.vmem %s3370_s23, 8192  ;;  %p3372_p4 = scmp.lt.s32.totalorder %s3631_s28, %s3370_s23 }
  0x57   : > { %p3367_p2 = pnand %p3365_p12, %p3351_p0  ;;  %p3373_p13 = scmp.lt.s32.totalorder %s3371_s7, %s3364_s30 }
  0x59   : > { %p3368_p7 = pneg %p3367_p2  ;;  %p3374_p6 = por %p3373_p13, %p3372_p4 }
  0x5b   : > { %p3375_p10 = pnand %p3374_p6, %p3368_p7 }
  0x5d   : > { %3378 = shalt.err (!%p3375_p10)
}
  0x5e   : > { %2984 = dma.hbm_to_vmem [thread:$0]  (!%p3633_p11), %s3629_s10, 4096, %s3631_s28, %s3637_s15, %s3455_s12, %s3455_s12, %s3456_s13  }
  0x5f   : > { %231 = sbr.rel (%p3533_p8) target bundleno = 921 (0x399), region = 40 }
  0x66   : > { %s3671_s17 = sand.u32 1, %s3441_s19   ;;  %p5782_p4 = scmp.ne.s32.totalorder %s5775_s24, 0 }
  0x67   : > { %s2726_s6 = sshll.u32 %s3671_s17, 8  ;;  %s234_s8 = scalar_lea.sflag [#allocation3], %s3671_s17 }
  0x68   : > { %s3677_s14 = scalar_lea.vmem [#allocation2], %s2726_s6 }
  0x69   : > { %3424 = dma.done.wait (%p5782_p4), %s234_s8, 4096  }
  0x6a   : > { %3426 = vsyncadd (%p5782_p4), %s234_s8, 4294963200  ;;  %p5783_p7 = scmp.eq.s32.totalorder %s3514_s22, 0 }
  0x6c   : > { %3428 = dma.done.wait (%p5783_p7), [#allocation6], 16384   ;;  %p5784_p8 = pmov %p5783_p7 }
  0x6d   : > { %v3458_v0 = vmov 0.0   ;;  %v307_v1 = vld [vmem:[#allocation5 + $0x8] sm:$0xff]  ;;  %v309_v3 = vld [vmem:[#allocation5 + $0x18] sm:$0xff]  ;;  %v306_v6 = vld [vmem:[#allocation5] sm:$0xff]  ;;  %s5475_s10 = scalar_lea.vmem [#allocation8], %s2726_s6  ;;  %s2737_s28 = sshll.u32 %s3514_s22, 12 }
  0x6e   : > { %3430 = vsyncadd (%p5784_p8), [#allocation6], 4294950912  ;;  %456 = vmatprep.mubr.f32.mxu0 %v3458_v0  ;;  %713 = vmatprep.mubr.f32.mxu1 %v3458_v0  ;;  %v311_v2 = vld [vmem:[#allocation5 + $0x28] sm:$0xff]  ;;  %v313_v5 = vld [vmem:[#allocation5 + $0x38] sm:$0xff]  ;;  %s2625_s15 = sshll.u32 %s5475_s10, 4  ;;  %s5632_s11 = scalar_lea.hbm %s5684_s5, %s2737_s28  ;;  %s5634_s15 = int_to_ptr.vmem [resolvable:$true] %s2625_s15 }
  0x6f   : > { %v2738_v4 = vpack.c.bf16 %v311_v2, %v307_v1  ;;  %v310_v7 = vld [vmem:[#allocation5 + $0x20] sm:$0xff]  ;;  %v2770_v8 = vpack.c.bf16 %v313_v5, %v309_v3  ;;  %v308_v10 = vld [vmem:[#allocation5 + $0x10] sm:$0xff]  ;;  %v315_v12 = vld [vmem:[#allocation5 + $0x48] sm:$0xff]  ;;  %s2612_s22 = scalar_lea.sflag [#allocation4], %s3671_s17  ;;  %s3379_s23 = scalar_lea.vmem %s5634_s15, 4096 }
  0x70   : > { %v2740_v9 = vpack.c.bf16 %v310_v7, %v306_v6  ;;  %v312_v11 = vld [vmem:[#allocation5 + $0x30] sm:$0xff]  ;;  %v319_v14 = vld [vmem:[#allocation5 + $0x68] sm:$0xff]  ;;  %v317_v15 = vld [vmem:[#allocation5 + $0x58] sm:$0xff]  ;;  %p3380_p11 = scmp.ne.s32.totalorder %s5634_s15, %s3379_s23  ;;  %p6137_p0 = scmp.ne.s32.totalorder %s5780_s29, 0 }
  0x71   : > { %2739 = vmatprep.subr.bf16.mxu0 %v2738_v4  ;;  %v2772_v13 = vpack.c.bf16 %v312_v11, %v308_v10  ;;  %v321_v16 = vld [vmem:[#allocation5 + $0x78] sm:$0xff]  ;;  %2771 = vmatprep.subr.bf16.mxu1 %v2770_v8  ;;  %v2742_v17 = vpack.c.bf16 %v319_v14, %v315_v12  ;;  %v314_v19 = vld [vmem:[#allocation5 + $0x40] sm:$0xff]  ;;  %v316_v21 = vld [vmem:[#allocation5 + $0x50] sm:$0xff]  ;;  %s3460_s7 = smov [#allocation8]  }
  0x72   : > { %2741 = vmatpush1.bf16.msra.mxu0 %v2740_v9  ;;  %v2774_v18 = vpack.c.bf16 %v321_v16, %v317_v15  ;;  %v318_v20 = vld [vmem:[#allocation5 + $0x60] sm:$0xff]  ;;  %v320_v23 = vld [vmem:[#allocation5 + $0x70] sm:$0xff]  ;;  %v323_v24 = vld [vmem:[#allocation5 + $0x88] sm:$0xff]  ;;  %p3381_p1 = pnand %p3380_p11, %p6137_p0  ;;  %s3383_s6 = sshll.u32 %s3460_s7, 4  ;;  %s3384_s6 = int_to_ptr.vmem [resolvable:$false] %s3383_s6 }
  0x73   : > { %2773 = vmatpush1.bf16.msra.mxu1 %v2772_v13  ;;  %v2744_v22 = vpack.c.bf16 %v318_v20, %v314_v19  ;;  %v327_v25 = vld [vmem:[#allocation5 + $0xa8] sm:$0xff]  ;;  %2743 = vmatprep.subr.bf16.mxu0 %v2742_v17  ;;  %v2776_v26 = vpack.c.bf16 %v320_v23, %v316_v21  ;;  %v325_v28 = vld [vmem:[#allocation5 + $0x98] sm:$0xff]  ;;  %v322_v30 = vld [vmem:[#allocation5 + $0x80] sm:$0xff]  ;;  %s3385_s8 = scalar_lea.vmem %s3384_s6, 8192  ;;  %p3386_p5 = scmp.lt.s32.totalorder %s5634_s15, %s3384_s6 }
  0x74   : > { %2775 = vmatprep.subr.bf16.mxu1 %v2774_v18  ;;  %v2746_v27 = vpack.c.bf16 %v327_v25, %v323_v24  ;;  %v329_v29 = vld [vmem:[#allocation5 + $0xb8] sm:$0xff]  ;;  %v326_v32 = vld [vmem:[#allocation5 + $0xa0] sm:$0xff]  ;;  %v324_v33 = vld [vmem:[#allocation5 + $0x90] sm:$0xff]  ;;  %p3382_p3 = pneg %p3381_p1  ;;  %p3387_p9 = scmp.lt.s32.totalorder %s3385_s8, %s3379_s23 }
  0x75   : > { %v2778_v31 = vpack.c.bf16 %v329_v29, %v325_v28  ;;  %v328_v34 = vld [vmem:[#allocation5 + $0xb0] sm:$0xff]  ;;  %v2748_v35 = vpack.c.bf16 %v326_v32, %v322_v30  ;;  %v331_v36 = vld [vmem:[#allocation5 + $0xc8] sm:$0xff]  ;;  %v333_v38 = vld [vmem:[#allocation5 + $0xd8] sm:$0xff] }
  0x76   : > { %2745 = vmatpush1.bf16.msra.mxu0 %v2744_v22  ;;  %v335_v37 = vld [vmem:[#allocation5 + $0xe8] sm:$0xff]  ;;  %v2780_v39 = vpack.c.bf16 %v328_v34, %v324_v33  ;;  %v337_v41 = vld [vmem:[#allocation5 + $0xf8] sm:$0xff]  ;;  %v330_v42 = vld [vmem:[#allocation5 + $0xc0] sm:$0xff]  ;;  %p3388_p12 = por %p3387_p9, %p3386_p5 }
  0x77   : > { %2777 = vmatpush1.bf16.msra.mxu1 %v2776_v26  ;;  %2747 = vmatprep.subr.bf16.mxu0 %v2746_v27  ;;  %v2750_v40 = vpack.c.bf16 %v335_v37, %v331_v36  ;;  %v334_v43 = vld [vmem:[#allocation5 + $0xe0] sm:$0xff]  ;;  %v2782_v44 = vpack.c.bf16 %v337_v41, %v333_v38  ;;  %v332_v45 = vld [vmem:[#allocation5 + $0xd0] sm:$0xff]  ;;  %v339_v47 = vld [vmem:[#allocation5 + $0x108] sm:$0xff] }
  0x78   : > { %2779 = vmatprep.subr.bf16.mxu1 %v2778_v31  ;;  %v336_v46 = vld [vmem:[#allocation5 + $0xf0] sm:$0xff]  ;;  %v343_v48 = vld [vmem:[#allocation5 + $0x128] sm:$0xff]  ;;  %v341_v49 = vld [vmem:[#allocation5 + $0x118] sm:$0xff]  ;;  %v2752_v51 = vpack.c.bf16 %v334_v43, %v330_v42  ;;  %p3389_p2 = pnand %p3388_p12, %p3382_p3 }
  0x79   : > { %v345_v50 = vld [vmem:[#allocation5 + $0x138] sm:$0xff]  ;;  %v2784_v52 = vpack.c.bf16 %v336_v46, %v332_v45  ;;  %v2754_v53 = vpack.c.bf16 %v343_v48, %v339_v47  ;;  %v338_v54 = vld [vmem:[#allocation5 + $0x100] sm:$0xff]  ;;  %v340_v56 = vld [vmem:[#allocation5 + $0x110] sm:$0xff] }
  0x7a   : > { %2749 = vmatpush1.bf16.msra.mxu0 %v2748_v35  ;;  %v342_v55 = vld [vmem:[#allocation5 + $0x120] sm:$0xff]  ;;  %v2786_v57 = vpack.c.bf16 %v345_v50, %v341_v49  ;;  %v344_v58 = vld [vmem:[#allocation5 + $0x130] sm:$0xff]  ;;  %v347_v59 = vld [vmem:[#allocation5 + $0x148] sm:$0xff] }
  0x7b   : > { %2781 = vmatpush1.bf16.msra.mxu1 %v2780_v39  ;;  %2751 = vmatprep.subr.bf16.mxu0 %v2750_v40  ;;  %v351_v60 = vld [vmem:[#allocation5 + $0x168] sm:$0xff]  ;;  %v349_v61 = vld [vmem:[#allocation5 + $0x158] sm:$0xff]  ;;  %v2756_v63 = vpack.c.bf16 %v342_v55, %v338_v54  ;;  %v2788_v1 = vpack.c.bf16 %v344_v58, %v340_v56  ;;  %v346_v3 = vld [vmem:[#allocation5 + $0x140] sm:$0xff]  ;;  %v3459_v40 = vmov 0.0|0.0  }
  0x7c   : > { %2783 = vmatprep.subr.bf16.mxu1 %v2782_v44  ;;  %v353_v62 = vld [vmem:[#allocation5 + $0x178] sm:$0xff]  ;;  %v2758_v2 = vpack.c.bf16 %v351_v60, %v347_v59  ;;  %v350_v4 = vld [vmem:[#allocation5 + $0x160] sm:$0xff]  ;;  %v348_v5 = vld [vmem:[#allocation5 + $0x150] sm:$0xff] }
  0x7d   : > { %v2790_v6 = vpack.c.bf16 %v353_v62, %v349_v61  ;;  %v352_v7 = vld [vmem:[#allocation5 + $0x170] sm:$0xff]  ;;  %v355_v8 = vld [vmem:[#allocation5 + $0x188] sm:$0xff]  ;;  %v357_v10 = vld [vmem:[#allocation5 + $0x198] sm:$0xff]  ;;  %v2760_v12 = vpack.c.bf16 %v350_v4, %v346_v3 }
  0x7e   : > { %2753 = vmatpush1.bf16.msra.mxu0 %v2752_v51  ;;  %v359_v9 = vld [vmem:[#allocation5 + $0x1a8] sm:$0xff]  ;;  %v361_v11 = vld [vmem:[#allocation5 + $0x1b8] sm:$0xff]  ;;  %v2792_v13 = vpack.c.bf16 %v352_v7, %v348_v5  ;;  %v354_v15 = vld [vmem:[#allocation5 + $0x180] sm:$0xff] }
  0x7f   : > { %2785 = vmatpush1.bf16.msra.mxu1 %v2784_v52  ;;  %2755 = vmatprep.subr.bf16.mxu0 %v2754_v53  ;;  %v2762_v14 = vpack.c.bf16 %v359_v9, %v355_v8  ;;  %v358_v16 = vld [vmem:[#allocation5 + $0x1a0] sm:$0xff]  ;;  %v356_v17 = vld [vmem:[#allocation5 + $0x190] sm:$0xff]  ;;  %v2794_v18 = vpack.c.bf16 %v361_v11, %v357_v10  ;;  %v363_v20 = vld [vmem:[#allocation5 + $0x1c8] sm:$0xff] }
  0x80   : > { %2787 = vmatprep.subr.bf16.mxu1 %v2786_v57  ;;  %v360_v19 = vld [vmem:[#allocation5 + $0x1b0] sm:$0xff]  ;;  %v367_v21 = vld [vmem:[#allocation5 + $0x1e8] sm:$0xff]  ;;  %v365_v22 = vld [vmem:[#allocation5 + $0x1d8] sm:$0xff]  ;;  %v2764_v24 = vpack.c.bf16 %v358_v16, %v354_v15 }
  0x81   : > { %v369_v23 = vld [vmem:[#allocation5 + $0x1f8] sm:$0xff]  ;;  %v2796_v25 = vpack.c.bf16 %v360_v19, %v356_v17  ;;  %v2766_v26 = vpack.c.bf16 %v367_v21, %v363_v20  ;;  %v362_v27 = vld [vmem:[#allocation5 + $0x1c0] sm:$0xff]  ;;  %v364_v30 = vld [vmem:[#allocation5 + $0x1d0] sm:$0xff] }
  0x82   : > { %2757 = vmatpush1.bf16.msra.mxu0 %v2756_v63  ;;  %v366_v28 = vld [vmem:[#allocation5 + $0x1e0] sm:$0xff]  ;;  %v2798_v29 = vpack.c.bf16 %v369_v23, %v365_v22  ;;  %v368_v31 = vld [vmem:[#allocation5 + $0x1f0] sm:$0xff]  ;;  %v2059_v35 = vld [vmem:[#allocation7 + $0x8] sm:$0xff] }
  0x83   : > { %2789 = vmatpush1.bf16.msra.mxu1 %v2788_v1  ;;  %2759 = vmatprep.subr.bf16.mxu0 %v2758_v2  ;;  %v2768_v32 = vpack.c.bf16 %v366_v28, %v362_v27  ;;  %v2800_v33 = vpack.c.bf16 %v368_v31, %v364_v30  ;;  %v2058_v34 = vld [vmem:[#allocation7] sm:$0xff]  ;;  %v2091_v38 = vld [vmem:[#allocation7 + $0x108] sm:$0xff]  ;;  %v2060_v42 = vld [vmem:[#allocation7 + $0x10] sm:$0xff] }
  0x84   : > { %2791 = vmatprep.subr.bf16.mxu1 %v2790_v6  ;;  %v274_v36 = vld [vmem:[%s3677_s14] sm:$0xff]  ;;  %v2803_v39 = vpack.c.bf16 %v2059_v35, %v2058_v34  ;;  %v2061_v43 = vld [vmem:[#allocation7 + $0x18] sm:$0xff]  ;;  %v2092_v44 = vld [vmem:[#allocation7 + $0x110] sm:$0xff] }
  0x85   : > { %v2090_v37 = vld [vmem:[#allocation7 + $0x100] sm:$0xff]  ;;  %v2093_v45 = vld [vmem:[#allocation7 + $0x118] sm:$0xff]  ;;  %v275_v46 = vld [vmem:[%s3677_s14 + $0x8] sm:$0xff]  ;;  %v2806_v47 = vpack.c.bf16 %v2061_v43, %v2060_v42 }
  0x86   : > { %2761 = vmatpush1.bf16.msra.mxu0 %v2760_v12  ;;  %v2851_v41 = vpack.c.bf16 %v2091_v38, %v2090_v37  ;;  %v2854_v48 = vpack.c.bf16 %v2093_v45, %v2092_v44  ;;  %v2062_v49 = vld [vmem:[#allocation7 + $0x20] sm:$0xff]  ;;  %v2063_v50 = vld [vmem:[#allocation7 + $0x28] sm:$0xff]  ;;  %v276_v53 = vld [vmem:[%s3677_s14 + $0x10] sm:$0xff] }
  0x87   : > { %2793 = vmatpush1.bf16.msra.mxu1 %v2792_v13  ;;  %2763 = vmatprep.subr.bf16.mxu0 %v2762_v14  ;;  %v2094_v51 = vld [vmem:[#allocation7 + $0x120] sm:$0xff]  ;;  %v2095_v52 = vld [vmem:[#allocation7 + $0x128] sm:$0xff]  ;;  %v2809_v54 = vpack.c.bf16 %v2063_v50, %v2062_v49  ;;  %v2064_v56 = vld [vmem:[#allocation7 + $0x30] sm:$0xff] }
  0x88   : > { %2795 = vmatprep.subr.bf16.mxu1 %v2794_v18  ;;  %v2857_v55 = vpack.c.bf16 %v2095_v52, %v2094_v51  ;;  %v2065_v57 = vld [vmem:[#allocation7 + $0x38] sm:$0xff]  ;;  %v2096_v58 = vld [vmem:[#allocation7 + $0x130] sm:$0xff]  ;;  %v2066_v63 = vld [vmem:[#allocation7 + $0x40] sm:$0xff] }
  0x89   : > { %v2097_v59 = vld [vmem:[#allocation7 + $0x138] sm:$0xff]  ;;  %v2812_v61 = vpack.c.bf16 %v2065_v57, %v2064_v56  ;;  %v2067_v1 = vld [vmem:[#allocation7 + $0x48] sm:$0xff]  ;;  %v2098_v2 = vld [vmem:[#allocation7 + $0x140] sm:$0xff] }
  0x8a   : > { %2765 = vmatpush1.bf16.msra.mxu0 %v2764_v24  ;;  %v277_v60 = vld [vmem:[%s3677_s14 + $0x18] sm:$0xff]  ;;  %v2860_v62 = vpack.c.bf16 %v2097_v59, %v2096_v58  ;;  %v2099_v3 = vld [vmem:[#allocation7 + $0x148] sm:$0xff]  ;;  %v278_v4 = vld [vmem:[%s3677_s14 + $0x20] sm:$0xff]  ;;  %v2815_v5 = vpack.c.bf16 %v2067_v1, %v2066_v63 }
  0x8b   : > { %2797 = vmatpush1.bf16.msra.mxu1 %v2796_v25  ;;  %2767 = vmatprep.subr.bf16.mxu0 %v2766_v26  ;;  %v2863_v6 = vpack.c.bf16 %v2099_v3, %v2098_v2  ;;  %v2068_v7 = vld [vmem:[#allocation7 + $0x50] sm:$0xff]  ;;  %v2069_v8 = vld [vmem:[#allocation7 + $0x58] sm:$0xff]  ;;  %v279_v11 = vld [vmem:[%s3677_s14 + $0x28] sm:$0xff] }
  0x8c   : > { %2799 = vmatprep.subr.bf16.mxu1 %v2798_v29  ;;  %v2100_v9 = vld [vmem:[#allocation7 + $0x150] sm:$0xff]  ;;  %v2101_v10 = vld [vmem:[#allocation7 + $0x158] sm:$0xff]  ;;  %v2818_v12 = vpack.c.bf16 %v2069_v8, %v2068_v7  ;;  %v2070_v14 = vld [vmem:[#allocation7 + $0x60] sm:$0xff] }
  0x8d   : > { %v2866_v13 = vpack.c.bf16 %v2101_v10, %v2100_v9  ;;  %v2071_v15 = vld [vmem:[#allocation7 + $0x68] sm:$0xff]  ;;  %v2102_v16 = vld [vmem:[#allocation7 + $0x160] sm:$0xff]  ;;  %v280_v18 = vld [vmem:[%s3677_s14 + $0x30] sm:$0xff] }
  0x8e   : > { %2769 = vmatpush1.bf16.msra.mxu0 %v2768_v32  ;;  %v2103_v17 = vld [vmem:[#allocation7 + $0x168] sm:$0xff]  ;;  %v2821_v19 = vpack.c.bf16 %v2071_v15, %v2070_v14  ;;  %v2072_v21 = vld [vmem:[#allocation7 + $0x70] sm:$0xff]  ;;  %v2073_v22 = vld [vmem:[#allocation7 + $0x78] sm:$0xff] }
  0x8f   : > { %2801 = vmatpush1.bf16.msra.mxu1 %v2800_v33  ;;  %2850 = vmatprep.subr.bf16.mxu0 %v3459_v40  ;;  %v2869_v20 = vpack.c.bf16 %v2103_v17, %v2102_v16  ;;  %v2104_v23 = vld [vmem:[#allocation7 + $0x170] sm:$0xff]  ;;  %v2105_v24 = vld [vmem:[#allocation7 + $0x178] sm:$0xff]  ;;  %v2824_v26 = vpack.c.bf16 %v2073_v22, %v2072_v21  ;;  %v2074_v28 = vld [vmem:[#allocation7 + $0x80] sm:$0xff] }
  0x90   : > { %2802 = vmatprep.subr.bf16.mxu1 %v3459_v40  ;;  %v281_v25 = vld [vmem:[%s3677_s14 + $0x38] sm:$0xff]  ;;  %v2872_v27 = vpack.c.bf16 %v2105_v24, %v2104_v23  ;;  %v2075_v29 = vld [vmem:[#allocation7 + $0x88] sm:$0xff]  ;;  %v2106_v30 = vld [vmem:[#allocation7 + $0x180] sm:$0xff] }
  0x91   : > { %457 = vmatmul.mubr.f32.vlgmr.msra.gmra.mrb[0].mxu0 %v274_v36  ;;  %v2107_v31 = vld [vmem:[#allocation7 + $0x188] sm:$0xff]  ;;  %v282_v32 = vld [vmem:[%s3677_s14 + $0x40] sm:$0xff]  ;;  %v2827_v33 = vpack.c.bf16 %v2075_v29, %v2074_v28  ;;  %v2076_v35 = vld [vmem:[#allocation7 + $0x90] sm:$0xff] }
  0x92   : > { %714 = vmatmul.mubr.f32.vlgmr.msra.gmra.mrb[0].mxu1 %v274_v36  ;;  %462 = vmatprep.mubr.f32.mxu0 %v3458_v0  ;;  %v2875_v34 = vpack.c.bf16 %v2107_v31, %v2106_v30  ;;  %v2077_v36 = vld [vmem:[#allocation7 + $0x98] sm:$0xff]  ;;  %v2108_v37 = vld [vmem:[#allocation7 + $0x190] sm:$0xff]  ;;  %v2078_v43 = vld [vmem:[#allocation7 + $0xa0] sm:$0xff] }
  0x93   : > { %719 = vmatprep.mubr.f32.mxu1 %v3458_v0  ;;  %2804 = vmatpush1.bf16.msra.mxu1 %v2803_v39  ;;  %v2109_v38 = vld [vmem:[#allocation7 + $0x198] sm:$0xff]  ;;  %v283_v39 = vld [vmem:[%s3677_s14 + $0x48] sm:$0xff]  ;;  %v2110_v45 = vld [vmem:[#allocation7 + $0x1a0] sm:$0xff] }
  0x94   : > { %2852 = vmatpush1.bf16.msra.mxu0 %v2851_v41  ;;  %2805 = vmatprep.subr.bf16.mxu1 %v3459_v40  ;;  %v2830_v41 = vpack.c.bf16 %v2077_v36, %v2076_v35  ;;  %v2878_v42 = vpack.c.bf16 %v2109_v38, %v2108_v37  ;;  %v2079_v44 = vld [vmem:[#allocation7 + $0xa8] sm:$0xff]  ;;  %v2080_v50 = vld [vmem:[#allocation7 + $0xb0] sm:$0xff]  ;;  %v2081_v51 = vld [vmem:[#allocation7 + $0xb8] sm:$0xff]  ;;  %v372_v38 = vlaneseq }
  0x95   : > { %463 = vmatmul.mubr.f32.gmra.mrb[2].mxu0 %v275_v46  ;;  %2853 = vmatprep.subr.bf16.mxu0 %v3459_v40  ;;  %v2112_v52 = vld [vmem:[#allocation7 + $0x1b0] sm:$0xff]  ;;  %v286_v57 = vld [vmem:[%s3677_s14 + $0x60] sm:$0xff]  ;;  %v287_v58 = vld [vmem:[%s3677_s14 + $0x68] sm:$0xff] }
  0x96   : > { %720 = vmatmul.mubr.f32.gmra.mrb[2].mxu1 %v275_v46  ;;  %468 = vmatprep.mubr.f32.mxu0 %v3458_v0  ;;  %v2111_v46 = vld [vmem:[#allocation7 + $0x1a8] sm:$0xff]  ;;  %v288_v59 = vld [vmem:[%s3677_s14 + $0x70] sm:$0xff]  ;;  %v293_v1 = vld [vmem:[%s3677_s14 + $0x98] sm:$0xff] }
  0x97   : > { %725 = vmatprep.mubr.f32.mxu1 %v3458_v0  ;;  %2807 = vmatpush1.bf16.msra.mxu1 %v2806_v47  ;;  %v284_v47 = vld [vmem:[%s3677_s14 + $0x50] sm:$0xff]  ;;  %v2881_v49 = vpack.c.bf16 %v2111_v46, %v2110_v45  ;;  %v294_v2 = vld [vmem:[%s3677_s14 + $0xa0] sm:$0xff]  ;;  %v295_v3 = vld [vmem:[%s3677_s14 + $0xa8] sm:$0xff] }
  0x98   : > { %2855 = vmatpush1.bf16.msra.mxu0 %v2854_v48  ;;  %2808 = vmatprep.subr.bf16.mxu1 %v3459_v40  ;;  %v2833_v48 = vpack.c.bf16 %v2079_v44, %v2078_v43  ;;  %v292_v63 = vld [vmem:[%s3677_s14 + $0x90] sm:$0xff]  ;;  %v299_v7 = vld [vmem:[%s3677_s14 + $0xc8] sm:$0xff]  ;;  %v2082_v8 = vld [vmem:[#allocation7 + $0xc0] sm:$0xff] }
  0x99   : > { %469 = vmatmul.mubr.f32.gmra.mrb[4].mxu0 %v276_v53  ;;  %2856 = vmatprep.subr.bf16.mxu0 %v3459_v40  ;;  %v2083_v9 = vld [vmem:[#allocation7 + $0xc8] sm:$0xff]  ;;  %v2114_v10 = vld [vmem:[#allocation7 + $0x1c0] sm:$0xff]  ;;  %v300_v14 = vld [vmem:[%s3677_s14 + $0xd0] sm:$0xff] }
  0x9a   : > { %726 = vmatmul.mubr.f32.gmra.mrb[4].mxu1 %v276_v53  ;;  %474 = vmatprep.mubr.f32.mxu0 %v3458_v0  ;;  %v2113_v53 = vld [vmem:[#allocation7 + $0x1b8] sm:$0xff]  ;;  %v2084_v16 = vld [vmem:[#allocation7 + $0xd0] sm:$0xff]  ;;  %v302_v21 = vld [vmem:[%s3677_s14 + $0xe0] sm:$0xff] }
  0x9b   : > { %731 = vmatprep.mubr.f32.mxu1 %v3458_v0  ;;  %2810 = vmatpush1.bf16.msra.mxu1 %v2809_v54  ;;  %v285_v54 = vld [vmem:[%s3677_s14 + $0x58] sm:$0xff]  ;;  %v2884_v56 = vpack.c.bf16 %v2113_v53, %v2112_v52  ;;  %v303_v23 = vld [vmem:[%s3677_s14 + $0xe8] sm:$0xff]  ;;  %v2086_v24 = vld [vmem:[#allocation7 + $0xe0] sm:$0xff] }
  0x9c   : > { %2858 = vmatpush1.bf16.msra.mxu0 %v2857_v55  ;;  %2811 = vmatprep.subr.bf16.mxu1 %v3459_v40  ;;  %v2836_v55 = vpack.c.bf16 %v2081_v51, %v2080_v50  ;;  %v301_v15 = vld [vmem:[%s3677_s14 + $0xd8] sm:$0xff]  ;;  %v2118_v28 = vld [vmem:[#allocation7 + $0x1e0] sm:$0xff]  ;;  %v2119_v29 = vld [vmem:[#allocation7 + $0x1e8] sm:$0xff] }
  0x9d   : > { %475 = vmatmul.mubr.f32.gmra.mrb[6].mxu0 %v277_v60  ;;  %2859 = vmatprep.subr.bf16.mxu0 %v3459_v40  ;;  %v2085_v17 = vld [vmem:[#allocation7 + $0xd8] sm:$0xff]  ;;  %v2893_v30 = vpack.c.bf16 %v2119_v29, %v2118_v28  ;;  %v2120_v35 = vld [vmem:[#allocation7 + $0x1f0] sm:$0xff] }
  0x9e   : > { %732 = vmatmul.mubr.f32.gmra.mrb[6].mxu1 %v277_v60  ;;  %480 = vmatprep.mubr.f32.mxu0 %v3458_v0  ;;  %v289_v60 = vld [vmem:[%s3677_s14 + $0x78] sm:$0xff] }
  0x9f   : > { %737 = vmatprep.mubr.f32.mxu1 %v3458_v0  ;;  %2813 = vmatpush1.bf16.msra.mxu1 %v2812_v61  ;;  %v290_v61 = vld [vmem:[%s3677_s14 + $0x80] sm:$0xff]  ;;  %v305_v31 = vld [vmem:[%s3677_s14 + $0xf8] sm:$0xff] }
  0xa0   : > { %2861 = vmatpush1.bf16.msra.mxu0 %v2860_v62  ;;  %2814 = vmatprep.subr.bf16.mxu1 %v3459_v40  ;;  %v291_v62 = vld [vmem:[%s3677_s14 + $0x88] sm:$0xff]  ;;  %v2121_v36 = vld [vmem:[#allocation7 + $0x1f8] sm:$0xff] }
  0xa1   : > { %481 = vmatmul.mubr.f32.gmra.mrb[8].mxu0 %v278_v4  ;;  %2862 = vmatprep.subr.bf16.mxu0 %v3459_v40  ;;  %v2896_v37 = vpack.c.bf16 %v2121_v36, %v2120_v35 }
  0xa2   : > { %738 = vmatmul.mubr.f32.gmra.mrb[8].mxu1 %v278_v4  ;;  %486 = vmatprep.mubr.f32.mxu0 %v3458_v0  ;;  %v296_v4 = vld [vmem:[%s3677_s14 + $0xb0] sm:$0xff] }
  0xa3   : > { %743 = vmatprep.mubr.f32.mxu1 %v3458_v0  ;;  %2816 = vmatpush1.bf16.msra.mxu1 %v2815_v5  ;;  %v297_v5 = vld [vmem:[%s3677_s14 + $0xb8] sm:$0xff] }
  0xa4   : > { %2864 = vmatpush1.bf16.msra.mxu0 %v2863_v6  ;;  %2817 = vmatprep.subr.bf16.mxu1 %v3459_v40  ;;  %v298_v6 = vld [vmem:[%s3677_s14 + $0xc0] sm:$0xff] }
  0xa5   : > { %487 = vmatmul.mubr.f32.gmra.mrb[10].mxu0 %v279_v11  ;;  %2865 = vmatprep.subr.bf16.mxu0 %v3459_v40 }
  0xa6   : > { %744 = vmatmul.mubr.f32.gmra.mrb[10].mxu1 %v279_v11  ;;  %492 = vmatprep.mubr.f32.mxu0 %v3458_v0  ;;  %v2839_v11 = vpack.c.bf16 %v2083_v9, %v2082_v8 }
  0xa7   : > { %749 = vmatprep.mubr.f32.mxu1 %v3458_v0  ;;  %2819 = vmatpush1.bf16.msra.mxu1 %v2818_v12  ;;  %v2115_v12 = vld [vmem:[#allocation7 + $0x1c8] sm:$0xff] }
  0xa8   : > { %2867 = vmatpush1.bf16.msra.mxu0 %v2866_v13  ;;  %2820 = vmatprep.subr.bf16.mxu1 %v3459_v40  ;;  %v2887_v13 = vpack.c.bf16 %v2115_v12, %v2114_v10 }
  0xa9   : > { %493 = vmatmul.mubr.f32.gmra.mrb[12].mxu0 %v280_v18  ;;  %2868 = vmatprep.subr.bf16.mxu0 %v3459_v40 }
  0xaa   : > { %750 = vmatmul.mubr.f32.gmra.mrb[12].mxu1 %v280_v18  ;;  %498 = vmatprep.mubr.f32.mxu0 %v3458_v0  ;;  %v2116_v18 = vld [vmem:[#allocation7 + $0x1d0] sm:$0xff] }
  0xab   : > { %755 = vmatprep.mubr.f32.mxu1 %v3458_v0  ;;  %2822 = vmatpush1.bf16.msra.mxu1 %v2821_v19  ;;  %v2842_v19 = vpack.c.bf16 %v2085_v17, %v2084_v16 }
  0xac   : > { %2870 = vmatpush1.bf16.msra.mxu0 %v2869_v20  ;;  %2823 = vmatprep.subr.bf16.mxu1 %v3459_v40  ;;  %v2117_v20 = vld [vmem:[#allocation7 + $0x1d8] sm:$0xff] }
  0xad   : > { %499 = vmatmul.mubr.f32.gmra.mrb[14].mxu0 %v281_v25  ;;  %2871 = vmatprep.subr.bf16.mxu0 %v3459_v40  ;;  %v2890_v22 = vpack.c.bf16 %v2117_v20, %v2116_v18 }
  0xae   : > { %756 = vmatmul.mubr.f32.gmra.mrb[14].mxu1 %v281_v25  ;;  %504 = vmatprep.mubr.f32.mxu0 %v3458_v0  ;;  %v2087_v25 = vld [vmem:[#allocation7 + $0xe8] sm:$0xff] }
  0xaf   : > { %761 = vmatprep.mubr.f32.mxu1 %v3458_v0  ;;  %2825 = vmatpush1.bf16.msra.mxu1 %v2824_v26  ;;  %v304_v26 = vld [vmem:[%s3677_s14 + $0xf0] sm:$0xff] }
  0xb0   : > { %2873 = vmatpush1.bf16.msra.mxu0 %v2872_v27  ;;  %2826 = vmatprep.subr.bf16.mxu1 %v3459_v40  ;;  %v2845_v27 = vpack.c.bf16 %v2087_v25, %v2086_v24 }
  0xb1   : > { %505 = vmatmul.mubr.f32.gmra.mrb[16].mxu0 %v282_v32  ;;  %2874 = vmatprep.subr.bf16.mxu0 %v3459_v40 }
  0xb2   : > { %762 = vmatmul.mubr.f32.gmra.mrb[16].mxu1 %v282_v32  ;;  %510 = vmatprep.mubr.f32.mxu0 %v3458_v0  ;;  %v2088_v32 = vld [vmem:[#allocation7 + $0xf0] sm:$0xff] }
  0xb3   : > { %767 = vmatprep.mubr.f32.mxu1 %v3458_v0  ;;  %2828 = vmatpush1.bf16.msra.mxu1 %v2827_v33  ;;  %v2089_v33 = vld [vmem:[#allocation7 + $0xf8] sm:$0xff] }
  0xb4   : > { %2876 = vmatpush1.bf16.msra.mxu0 %v2875_v34  ;;  %2829 = vmatprep.subr.bf16.mxu1 %v3459_v40  ;;  %v2848_v34 = vpack.c.bf16 %v2089_v33, %v2088_v32 }
  0xb5   : > { %511 = vmatmul.mubr.f32.gmra.mrb[18].mxu0 %v283_v39  ;;  %2877 = vmatprep.subr.bf16.mxu0 %v3459_v40 }
  0xb6   : > { %768 = vmatmul.mubr.f32.gmra.mrb[18].mxu1 %v283_v39  ;;  %516 = vmatprep.mubr.f32.mxu0 %v3458_v0  ;;  %v373_v39 = vshrl.u32 %v372_v38, 7 }
  0xb7   : > { %773 = vmatprep.mubr.f32.mxu1 %v3458_v0  ;;  %2831 = vmatpush1.bf16.msra.mxu1 %v2830_v41 }
  0xb8   : > { %2879 = vmatpush1.bf16.msra.mxu0 %v2878_v42  ;;  %2832 = vmatprep.subr.bf16.mxu1 %v3459_v40  ;;  %v374_v41 = vsub.s32 0, %v373_v39  ;;  %v382_v42 = vsub.s32 2, %v373_v39  ;;  %v378_v43 = vsub.s32 1, %v373_v39 }
  0xb9   : > { %517 = vmatmul.mubr.f32.gmra.mrb[20].mxu0 %v284_v47  ;;  %2880 = vmatprep.subr.bf16.mxu0 %v3459_v40 }
  0xba   : > { %774 = vmatmul.mubr.f32.gmra.mrb[20].mxu1 %v284_v47  ;;  %522 = vmatprep.mubr.f32.mxu0 %v3458_v0 }
  0xbb   : > { %779 = vmatprep.mubr.f32.mxu1 %v3458_v0  ;;  %2834 = vmatpush1.bf16.msra.mxu1 %v2833_v48 }
  0xbc   : > { %2882 = vmatpush1.bf16.msra.mxu0 %v2881_v49  ;;  %2835 = vmatprep.subr.bf16.mxu1 %v3459_v40 }
  0xbd   : > { %523 = vmatmul.mubr.f32.gmra.mrb[22].mxu0 %v285_v54  ;;  %2883 = vmatprep.subr.bf16.mxu0 %v3459_v40 }
  0xbe   : > { %780 = vmatmul.mubr.f32.gmra.mrb[22].mxu1 %v285_v54  ;;  %528 = vmatprep.mubr.f32.mxu0 %v3458_v0 }
  0xbf   : > { %785 = vmatprep.mubr.f32.mxu1 %v3458_v0  ;;  %2837 = vmatpush1.bf16.msra.mxu1 %v2836_v55 }
  0xc0   : > { %2885 = vmatpush1.bf16.msra.mxu0 %v2884_v56  ;;  %2838 = vmatprep.subr.bf16.mxu1 %v3459_v40 }
  0xc1   : > { %529 = vmatmul.mubr.f32.gmra.mrb[24].mxu0 %v286_v57  ;;  %2886 = vmatprep.subr.bf16.mxu0 %v3459_v40 }
  0xc2   : > { %786 = vmatmul.mubr.f32.gmra.mrb[24].mxu1 %v286_v57  ;;  %534 = vmatprep.mubr.f32.mxu0 %v3458_v0 }
  0xc3   : > { %791 = vmatprep.mubr.f32.mxu1 %v3458_v0  ;;  %2840 = vmatpush1.bf16.msra.mxu1 %v2839_v11 }
  0xc4   : > { %2888 = vmatpush1.bf16.msra.mxu0 %v2887_v13  ;;  %2841 = vmatprep.subr.bf16.mxu1 %v3459_v40 }
  0xc5   : > { %535 = vmatmul.mubr.f32.gmra.mrb[26].mxu0 %v287_v58  ;;  %2889 = vmatprep.subr.bf16.mxu0 %v3459_v40 }
  0xc6   : > { %792 = vmatmul.mubr.f32.gmra.mrb[26].mxu1 %v287_v58  ;;  %540 = vmatprep.mubr.f32.mxu0 %v3458_v0 }
  0xc7   : > { %797 = vmatprep.mubr.f32.mxu1 %v3458_v0  ;;  %2843 = vmatpush1.bf16.msra.mxu1 %v2842_v19 }
  0xc8   : > { %2891 = vmatpush1.bf16.msra.mxu0 %v2890_v22  ;;  %2844 = vmatprep.subr.bf16.mxu1 %v3459_v40 }
  0xc9   : > { %541 = vmatmul.mubr.f32.gmra.mrb[28].mxu0 %v288_v59  ;;  %2892 = vmatprep.subr.bf16.mxu0 %v3459_v40 }
  0xca   : > { %798 = vmatmul.mubr.f32.gmra.mrb[28].mxu1 %v288_v59  ;;  %546 = vmatprep.mubr.f32.mxu0 %v3458_v0 }
  0xcb   : > { %803 = vmatprep.mubr.f32.mxu1 %v3458_v0  ;;  %2846 = vmatpush1.bf16.msra.mxu1 %v2845_v27 }
  0xcc   : > { %2847 = vmatprep.subr.bf16.mxu1 %v3459_v40  ;;  %2894 = vmatpush1.bf16.msra.mxu0 %v2893_v30 }
  0xcd   : > { %547 = vmatmul.mubr.f32.gmra.mrb[30].mxu0 %v289_v60  ;;  %2895 = vmatprep.subr.bf16.mxu0 %v3459_v40  ;;  %v386_v40 = vsub.s32 3, %v373_v39 }
  0xce   : > { %804 = vmatmul.mubr.f32.gmra.mrb[30].mxu1 %v289_v60  ;;  %552 = vmatprep.mubr.f32.mxu0 %v3458_v0 }
  0xcf   : > { %809 = vmatprep.mubr.f32.mxu1 %v3458_v0  ;;  %2849 = vmatpush1.bf16.msra.mxu1 %v2848_v34 }
  0xd0   : > { %2897 = vmatpush1.bf16.msra.mxu0 %v2896_v37 }
  0xd1   : > { %553 = vmatmul.mubr.f32.gmra.mrb[32].mxu0 %v290_v61 }
  0xd2   : > { %810 = vmatmul.mubr.f32.gmra.mrb[32].mxu1 %v290_v61  ;;  %558 = vmatprep.mubr.f32.mxu0 %v3458_v0 }
  0xd3   : > { %815 = vmatprep.mubr.f32.mxu1 %v3458_v0 }
  0xd5   : > { %559 = vmatmul.mubr.f32.gmra.mrb[34].mxu0 %v291_v62 }
  0xd6   : > { %816 = vmatmul.mubr.f32.gmra.mrb[34].mxu1 %v291_v62  ;;  %564 = vmatprep.mubr.f32.mxu0 %v3458_v0 }
  0xd7   : > { %821 = vmatprep.mubr.f32.mxu1 %v3458_v0 }
  0xd9   : > { %565 = vmatmul.mubr.f32.gmra.mrb[36].mxu0 %v292_v63 }
  0xda   : > { %822 = vmatmul.mubr.f32.gmra.mrb[36].mxu1 %v292_v63  ;;  %570 = vmatprep.mubr.f32.mxu0 %v3458_v0 }
  0xdb   : > { %827 = vmatprep.mubr.f32.mxu1 %v3458_v0 }
  0xdd   : > { %571 = vmatmul.mubr.f32.gmra.mrb[38].mxu0 %v293_v1 }
  0xde   : > { %828 = vmatmul.mubr.f32.gmra.mrb[38].mxu1 %v293_v1  ;;  %576 = vmatprep.mubr.f32.mxu0 %v3458_v0 }
  0xdf   : > { %833 = vmatprep.mubr.f32.mxu1 %v3458_v0 }
  0xe1   : > { %577 = vmatmul.mubr.f32.gmra.mrb[40].mxu0 %v294_v2 }
  0xe2   : > { %834 = vmatmul.mubr.f32.gmra.mrb[40].mxu1 %v294_v2  ;;  %582 = vmatprep.mubr.f32.mxu0 %v3458_v0 }
  0xe3   : > { %839 = vmatprep.mubr.f32.mxu1 %v3458_v0 }
  0xe5   : > { %583 = vmatmul.mubr.f32.gmra.mrb[42].mxu0 %v295_v3 }
  0xe6   : > { %840 = vmatmul.mubr.f32.gmra.mrb[42].mxu1 %v295_v3  ;;  %588 = vmatprep.mubr.f32.mxu0 %v3458_v0 }
  0xe7   : > { %845 = vmatprep.mubr.f32.mxu1 %v3458_v0 }
  0xe9   : > { %589 = vmatmul.mubr.f32.gmra.mrb[44].mxu0 %v296_v4 }
  0xea   : > { %846 = vmatmul.mubr.f32.gmra.mrb[44].mxu1 %v296_v4  ;;  %594 = vmatprep.mubr.f32.mxu0 %v3458_v0 }
  0xeb   : > { %851 = vmatprep.mubr.f32.mxu1 %v3458_v0 }
  0xed   : > { %595 = vmatmul.mubr.f32.gmra.mrb[46].mxu0 %v297_v5 }
  0xee   : > { %852 = vmatmul.mubr.f32.gmra.mrb[46].mxu1 %v297_v5  ;;  %600 = vmatprep.mubr.f32.mxu0 %v3458_v0 }
  0xef   : > { %857 = vmatprep.mubr.f32.mxu1 %v3458_v0 }
  0xf1   : > { %601 = vmatmul.mubr.f32.gmra.mrb[48].mxu0 %v298_v6 }
  0xf2   : > { %858 = vmatmul.mubr.f32.gmra.mrb[48].mxu1 %v298_v6  ;;  %606 = vmatprep.mubr.f32.mxu0 %v3458_v0 }
  0xf3   : > { %863 = vmatprep.mubr.f32.mxu1 %v3458_v0 }
  0xf5   : > { %607 = vmatmul.mubr.f32.gmra.mrb[50].mxu0 %v299_v7 }
  0xf6   : > { %864 = vmatmul.mubr.f32.gmra.mrb[50].mxu1 %v299_v7  ;;  %612 = vmatprep.mubr.f32.mxu0 %v3458_v0 }
  0xf7   : > { %869 = vmatprep.mubr.f32.mxu1 %v3458_v0 }
  0xf9   : > { %613 = vmatmul.mubr.f32.gmra.mrb[52].mxu0 %v300_v14 }
  0xfa   : > { %870 = vmatmul.mubr.f32.gmra.mrb[52].mxu1 %v300_v14  ;;  %618 = vmatprep.mubr.f32.mxu0 %v3458_v0 }
  0xfb   : > { %875 = vmatprep.mubr.f32.mxu1 %v3458_v0 }
  0xfd   : > { %619 = vmatmul.mubr.f32.gmra.mrb[54].mxu0 %v301_v15 }
  0xfe   : > { %876 = vmatmul.mubr.f32.gmra.mrb[54].mxu1 %v301_v15  ;;  %624 = vmatprep.mubr.f32.mxu0 %v3458_v0 }
  0xff   : > { %881 = vmatprep.mubr.f32.mxu1 %v3458_v0 }
 0x101   : > { %625 = vmatmul.mubr.f32.gmra.mrb[56].mxu0 %v302_v21 }
 0x102   : > { %882 = vmatmul.mubr.f32.gmra.mrb[56].mxu1 %v302_v21  ;;  %630 = vmatprep.mubr.f32.mxu0 %v3458_v0 }
 0x103   : > { %887 = vmatprep.mubr.f32.mxu1 %v3458_v0 }
 0x105   : > { %631 = vmatmul.mubr.f32.gmra.mrb[58].mxu0 %v303_v23 }
 0x106   : > { %888 = vmatmul.mubr.f32.gmra.mrb[58].mxu1 %v303_v23  ;;  %636 = vmatprep.mubr.f32.mxu0 %v3458_v0 }
 0x107   : > { %893 = vmatprep.mubr.f32.mxu1 %v3458_v0 }
 0x109   : > { %637 = vmatmul.mubr.f32.gmra.mrb[60].mxu0 %v304_v26 }
 0x10a   : > { %894 = vmatmul.mubr.f32.gmra.mrb[60].mxu1 %v304_v26  ;;  %642 = vmatprep.mubr.f32.mxu0 %v3458_v0 }
 0x10b   : > { %899 = vmatprep.mubr.f32.mxu1 %v3458_v0  ;;  %v370_v0 = vld [vmem:[%s5681_s2] sm:$0xf] }
 0x10c   : > { %v3818_v44 = vrot.slane %v370_v0, %v374_v41  ;;  %v3820_v45 = vrot.slane %v370_v0, %v382_v42  ;;  %v3822_v46 = vrot.slane %v370_v0, %v378_v43  ;;  %v3824_v47 = vrot.slane %v370_v0, %v386_v40 }
 0x10d   : > { %643 = vmatmul.mubr.f32.gmra.mrb[62].mxu0 %v305_v31 }
 0x10e   : > { %900 = vmatmul.mubr.f32.gmra.mrb[62].mxu1 %v305_v31 }
 0x164   : > { %v458_v48 = vpop.f32.mrb[0].mxu0 }
 0x165   : > { %v3827_v49 = vadd.f32 %v458_v48, %v3818_v44  ;;  %v715_v50 = vpop.f32.mrb[0].mxu1  ;;  %v460_v51 = vpop.f32.mrb[1].mxu0 }
 0x166   : > { %v3830_v52 = vadd.f32 %v715_v50, %v3820_v45  ;;  %v3833_v53 = vadd.f32 %v460_v51, %v3822_v46  ;;  %v717_v54 = vpop.f32.mrb[1].mxu1 }
 0x167   : > { %v906_v55 = vmul.f32 %v3827_v49, %v3827_v49  ;;  %v3838_v56 = vadd.f32 %v717_v54, %v3824_v47 }
 0x168   : > { %v908_v57 = vmul.f32 %v3830_v52, %v3830_v52  ;;  %v907_v58 = vmul.f32 %v3833_v53, %v3833_v53  ;;  %v464_v59 = vpop.f32.mrb[2].mxu0 }
 0x169   : > { %v1034_v60 = vmul.f32 %v906_v55, %v3827_v49  ;;  %v909_v61 = vmul.f32 %v3838_v56, %v3838_v56  ;;  %v3848_v62 = vadd.f32 %v464_v59, %v3818_v44  ;;  %v721_v63 = vpop.f32.mrb[2].mxu1  ;;  %v466_v1 = vpop.f32.mrb[3].mxu0 }
 0x16a   : > { %v1036_v2 = vmul.f32 %v908_v57, %v3830_v52  ;;  %v1035_v3 = vmul.f32 %v907_v58, %v3833_v53  ;;  %v3853_v4 = vadd.f32 %v721_v63, %v3820_v45  ;;  %v3856_v5 = vadd.f32 %v466_v1, %v3822_v46  ;;  %v723_v6 = vpop.f32.mrb[3].mxu1 }
 0x16b   : > { %5785 = vst [vmem:[#allocation12_spill] sm:$0xff] %v3848_v62  ;;  %v1162_v7 = vmul.f32 0.044715, %v1034_v60  ;;  %v1037_v8 = vmul.f32 %v909_v61, %v3838_v56  ;;  %v910_v9 = vmul.f32 %v3848_v62, %v3848_v62  ;;  %v3862_v10 = vadd.f32 %v723_v6, %v3824_v47 }
 0x16c   : > { %5786 = vst [vmem:[#allocation13_spill] sm:$0xff] %v3853_v4  ;;  %v1164_v11 = vmul.f32 0.044715, %v1036_v2  ;;  %v1163_v12 = vmul.f32 0.044715, %v1035_v3  ;;  %v912_v13 = vmul.f32 %v3853_v4, %v3853_v4  ;;  %v911_v14 = vmul.f32 %v3856_v5, %v3856_v5  ;;  %v470_v15 = vpop.f32.mrb[4].mxu0 }
 0x16d   : > { %v1290_v16 = vadd.f32 %v1162_v7, %v3827_v49  ;;  %v1165_v17 = vmul.f32 0.044715, %v1037_v8  ;;  %v1038_v18 = vmul.f32 %v910_v9, %v3848_v62  ;;  %v913_v19 = vmul.f32 %v3862_v10, %v3862_v10  ;;  %v727_v20 = vpop.f32.mrb[4].mxu1  ;;  %v472_v21 = vpop.f32.mrb[5].mxu0 }
 0x16e   : > { %v1292_v22 = vadd.f32 %v1164_v11, %v3830_v52  ;;  %v1040_v23 = vmul.f32 %v912_v13, %v3853_v4  ;;  %v1039_v24 = vmul.f32 %v911_v14, %v3856_v5  ;;  %v729_v25 = vpop.f32.mrb[5].mxu1  ;;  %v1291_v27 = vadd.f32 %v1163_v12, %v3833_v53 }
 0x16f   : > { %v1418_v26 = vmul.f32 0.7978846, %v1290_v16  ;;  %v1293_v28 = vadd.f32 %v1165_v17, %v3838_v56  ;;  %v1166_v30 = vmul.f32 0.044715, %v1038_v18  ;;  %v1041_v31 = vmul.f32 %v913_v19, %v3862_v10 }
 0x170   : > { %v1420_v29 = vmul.f32 0.7978846, %v1292_v22  ;;  %v3879_v32 = vadd.f32 %v470_v15, %v3818_v44  ;;  %v1168_v33 = vmul.f32 0.044715, %v1040_v23  ;;  %v476_v34 = vpop.f32.mrb[6].mxu0  ;;  %v3888_v42 = vadd.f32 %v727_v20, %v3820_v45 }
 0x171   : > { %3037 = vtanh.f32 %v1418_v26  ;;  %v733_v35 = vpop.f32.mrb[6].mxu1  ;;  %v1167_v36 = vmul.f32 0.044715, %v1039_v24  ;;  %v478_v38 = vpop.f32.mrb[7].mxu0  ;;  %v3883_v41 = vmul.f32 0.7978846, %v1291_v27  ;;  %v3891_v43 = vadd.f32 %v472_v21, %v3822_v46 }
 0x172   : > { %5787 = vst [vmem:[#allocation14_spill] sm:$0xff] %v3879_v32  ;;  %3039 = vtanh.f32 %v1420_v29  ;;  %v914_v37 = vmul.f32 %v3879_v32, %v3879_v32  ;;  %v735_v39 = vpop.f32.mrb[7].mxu1  ;;  %v3885_v0 = vmul.f32 0.7978846, %v1293_v28  ;;  %5788 = vst [vmem:[#allocation15_spill] sm:$0xff] %v3888_v42  ;;  %v1294_v40 = vadd.f32 %v1166_v30, %v3848_v62 }
 0x173   : > { %5789 = vst [vmem:[#allocation16_spill] sm:$0xff] %v3891_v43  ;;  %v1169_v48 = vmul.f32 0.044715, %v1041_v31  ;;  %v3896_v51 = vadd.f32 %v729_v25, %v3824_v47  ;;  %v1296_v55 = vadd.f32 %v1168_v33, %v3853_v4  ;;  %v916_v57 = vmul.f32 %v3888_v42, %v3888_v42 }
 0x174   : > { %v1042_v50 = vmul.f32 %v914_v37, %v3879_v32  ;;  %v482_v54 = vpop.f32.mrb[8].mxu0  ;;  %v915_v58 = vmul.f32 %v3891_v43, %v3891_v43  ;;  %v3904_v59 = vadd.f32 %v476_v34, %v3818_v44  ;;  %v1295_v63 = vadd.f32 %v1167_v36, %v3856_v5 }
 0x175   : > { %5790 = vst [vmem:[#allocation17_spill] sm:$0xff] %v3896_v51  ;;  %v739_v60 = vpop.f32.mrb[8].mxu1  ;;  %v484_v61 = vpop.f32.mrb[9].mxu0  ;;  %v917_v2 = vmul.f32 %v3896_v51, %v3896_v51  ;;  %v3910_v3 = vadd.f32 %v733_v35, %v3820_v45  ;;  %v1044_v7 = vmul.f32 %v916_v57, %v3888_v42  ;;  %v3917_v11 = vadd.f32 %v478_v38, %v3822_v46 }
 0x176   : > { %5791 = vst [vmem:[#allocation18_spill] sm:$0xff] %v3904_v59  ;;  %v1170_v1 = vmul.f32 0.044715, %v1042_v50  ;;  %v741_v6 = vpop.f32.mrb[9].mxu1  ;;  %v1043_v8 = vmul.f32 %v915_v58, %v3891_v43  ;;  %v918_v9 = vmul.f32 %v3904_v59, %v3904_v59  ;;  %v1297_v12 = vadd.f32 %v1169_v48, %v3862_v10 }
 0x177   : > { %5792 = vst [vmem:[#allocation19_spill] sm:$0xff] %v3910_v3  ;;  %5793 = vst [vmem:[#allocation20_spill] sm:$0xff] %v3917_v11  ;;  %v1045_v13 = vmul.f32 %v917_v2, %v3896_v51  ;;  %v920_v14 = vmul.f32 %v3910_v3, %v3910_v3  ;;  %v3924_v15 = vadd.f32 %v735_v39, %v3824_v47  ;;  %v1172_v17 = vmul.f32 0.044715, %v1044_v7 }
 0x178   : > { %v488_v16 = vpop.f32.mrb[10].mxu0  ;;  %v1171_v18 = vmul.f32 0.044715, %v1043_v8  ;;  %v1046_v19 = vmul.f32 %v918_v9, %v3904_v59  ;;  %v919_v20 = vmul.f32 %v3917_v11, %v3917_v11  ;;  %v1298_v23 = vadd.f32 %v1170_v1, %v3879_v32 }
 0x179   : > { %5794 = vst [vmem:[#allocation21_spill] sm:$0xff] %v3924_v15  ;;  %v745_v21 = vpop.f32.mrb[10].mxu1  ;;  %v490_v22 = vpop.f32.mrb[11].mxu0  ;;  %v1173_v24 = vmul.f32 0.044715, %v1045_v13  ;;  %v1048_v25 = vmul.f32 %v920_v14, %v3910_v3  ;;  %v921_v26 = vmul.f32 %v3924_v15, %v3924_v15  ;;  %v1300_v35 = vadd.f32 %v1172_v17, %v3888_v42 }
 0x17a   : > { %v747_v27 = vpop.f32.mrb[11].mxu1  ;;  %v3933_v29 = vmul.f32 0.7978846, %v1294_v40  ;;  %v3935_v30 = vmul.f32 0.7978846, %v1296_v55  ;;  %v1047_v33 = vmul.f32 %v919_v20, %v3917_v11  ;;  %v1299_v36 = vadd.f32 %v1171_v18, %v3891_v43 }
 0x17b   : > { %v3038_v28 = vpop.eup %3037  ;;  %v3937_v31 = vmul.f32 0.7978846, %v1295_v63  ;;  %v1174_v37 = vmul.f32 0.044715, %v1046_v19  ;;  %v1049_v38 = vmul.f32 %v921_v26, %v3924_v15  ;;  %v3945_v48 = vmul.f32 0.7978846, %v1297_v12 }
 0x17c   : > { %v3040_v34 = vpop.eup %3039  ;;  %v3943_v39 = vpop.f32.mrb[12].mxu0  ;;  %v1301_v40 = vadd.f32 %v1173_v24, %v3896_v51  ;;  %v1176_v50 = vmul.f32 0.044715, %v1048_v25  ;;  %v3950_v57 = vmul.f32 0.7978846, %v1298_v23  ;;  %v1674_v1 = vadd.f32 1.0, %v3038_v28 }
 0x17d   : > { %v3948_v55 = vpop.f32.mrb[12].mxu1  ;;  %v1175_v58 = vmul.f32 0.044715, %v1047_v33  ;;  %v3952_v63 = vpop.f32.mrb[13].mxu0  ;;  %v1676_v2 = vadd.f32 1.0, %v3040_v34  ;;  %v3955_v8 = vadd.f32 %v482_v54, %v3818_v44  ;;  %v1302_v14 = vadd.f32 %v1174_v37, %v3904_v59 }
 0x17e   : > { %v1177_v7 = vmul.f32 0.044715, %v1049_v38  ;;  %v3957_v9 = vpop.f32.mrb[13].mxu1  ;;  %v3959_v12 = vmul.f32 0.7978846, %v1300_v35  ;;  %v3965_v17 = vadd.f32 %v739_v60, %v3820_v45  ;;  %v1304_v20 = vadd.f32 %v1176_v50, %v3910_v3 }
 0x17f   : > { %5795 = vst [vmem:[#allocation22_spill] sm:$0xff] %v3955_v8  ;;  %v3961_v13 = vmul.f32 0.7978846, %v1299_v36  ;;  %v3969_v19 = vmul.f32 0.7978846, %v1301_v40  ;;  %v922_v54 = vmul.f32 %v3955_v8, %v3955_v8  ;;  %v3975_v23 = vadd.f32 %v484_v61, %v3822_v46 }
 0x180   : > { %5796 = vst [vmem:[#allocation23_spill] sm:$0xff] %v3959_v12  ;;  %5797 = vst [vmem:[#allocation24_spill] sm:$0xff] %v3965_v17  ;;  %v3967_v18 = vpop.f32.mrb[14].mxu0  ;;  %v1303_v26 = vadd.f32 %v1175_v58, %v3917_v11  ;;  %v924_v60 = vmul.f32 %v3965_v17, %v3965_v17  ;;  %v3985_v28 = vadd.f32 %v741_v6, %v3824_v47  ;;  %v4029_v51 = vmul.f32 0.5, %v1674_v1 }
 0x181   : > { %5798 = vst [vmem:[#allocation25_spill] sm:$0xff] %v3975_v23  ;;  %v3977_v24 = vpop.f32.mrb[14].mxu1  ;;  %v3979_v25 = vpop.f32.mrb[15].mxu0  ;;  %v3988_v33 = vadd.f32 %v488_v16, %v3818_v44  ;;  %v1305_v61 = vadd.f32 %v1177_v7, %v3924_v15  ;;  %v1050_v35 = vmul.f32 %v922_v54, %v3955_v8  ;;  %v923_v36 = vmul.f32 %v3975_v23, %v3975_v23 }
 0x182   : > { %5799 = vst [vmem:[#allocation26_spill] sm:$0xff] %v3985_v28  ;;  %v3990_v34 = vpop.f32.mrb[15].mxu1  ;;  %v3997_v37 = vadd.f32 %v745_v21, %v3820_v45  ;;  %v1052_v38 = vmul.f32 %v924_v60, %v3965_v17  ;;  %v925_v6 = vmul.f32 %v3985_v28, %v3985_v28  ;;  %v4005_v40 = vadd.f32 %v490_v22, %v3822_v46 }
 0x183   : > { %5800 = vst [vmem:[#allocation27_spill] sm:$0xff] %v3988_v33  ;;  %v926_v16 = vmul.f32 %v3988_v33, %v3988_v33  ;;  %v1178_v58 = vmul.f32 0.044715, %v1050_v35  ;;  %v1051_v7 = vmul.f32 %v923_v36, %v3975_v23  ;;  %v4013_v54 = vadd.f32 %v747_v27, %v3824_v47 }
 0x184   : > { %5801 = vst [vmem:[#allocation28_spill] sm:$0xff] %v3997_v37  ;;  %5802 = vst [vmem:[#allocation29_spill] sm:$0xff] %v4005_v40  ;;  %v4007_v50 = vpop.f32.mrb[16].mxu0  ;;  %v928_v21 = vmul.f32 %v3997_v37, %v3997_v37  ;;  %v1180_v59 = vmul.f32 0.044715, %v1052_v38  ;;  %v1053_v15 = vmul.f32 %v925_v6, %v3985_v28  ;;  %v927_v35 = vmul.f32 %v4005_v40, %v4005_v40 }
 0x185   : > { %5803 = vst [vmem:[#allocation30_spill] sm:$0xff] %v4013_v54  ;;  %v4015_v60 = vpop.f32.mrb[16].mxu1  ;;  %v4017_v3 = vpop.f32.mrb[17].mxu0  ;;  %v1054_v22 = vmul.f32 %v926_v16, %v3988_v33  ;;  %v1306_v36 = vadd.f32 %v1178_v58, %v3955_v8  ;;  %v1179_v42 = vmul.f32 0.044715, %v1051_v7  ;;  %v929_v32 = vmul.f32 %v4013_v54, %v4013_v54 }
 0x186   : > { %v4023_v11 = vpop.f32.mrb[17].mxu1  ;;  %v1056_v27 = vmul.f32 %v928_v21, %v3997_v37  ;;  %v1308_v38 = vadd.f32 %v1180_v59, %v3965_v17  ;;  %v1181_v6 = vmul.f32 0.044715, %v1053_v15  ;;  %v4034_v4 = vmul.f32 0.7978846, %v1302_v14 }
 0x187   : > { %v1182_v43 = vmul.f32 0.044715, %v1054_v22  ;;  %v4036_v12 = vmul.f32 0.7978846, %v1304_v20  ;;  %v1307_v58 = vadd.f32 %v1179_v42, %v3975_v23  ;;  %v1055_v7 = vmul.f32 %v927_v35, %v4005_v40 }
 0x188   : > { %v4032_v16 = vpop.f32.mrb[18].mxu0  ;;  %5804 = vst [vmem:[#allocation31_spill] sm:$0xff] %v4034_v4  ;;  %v1804_v1 = vmul.f32 0.5, %v1676_v2  ;;  %v4044_v62 = vmul.f32 0.7978846, %v1303_v26  ;;  %v1057_v20 = vmul.f32 %v929_v32, %v4013_v54  ;;  %v4055_v42 = vadd.f32 %v3943_v39, %v3818_v44 }
 0x189   : > { %5805 = vst [vmem:[#allocation32_spill] sm:$0xff] %v4036_v12  ;;  %v4040_v21 = vpop.f32.mrb[18].mxu1  ;;  %v4042_v8 = vpop.f32.mrb[19].mxu0  ;;  %v1184_v59 = vmul.f32 0.044715, %v1056_v27  ;;  %v1309_v17 = vadd.f32 %v1181_v6, %v3985_v28  ;;  %v1310_v2 = vadd.f32 %v1182_v43, %v3988_v33  ;;  %v4063_v26 = vadd.f32 %v3948_v55, %v3820_v45 }
 0x18a   : > { %5806 = vst [vmem:[#allocation33_spill] sm:$0xff] %v4044_v62  ;;  %v4046_v15 = vpop.f32.mrb[19].mxu1  ;;  %v4048_v22 = vmul.f32 0.7978846, %v1305_v61  ;;  %v4050_v14 = vmul.f32 0.7978846, %v1306_v36  ;;  %v930_v32 = vmul.f32 %v4055_v42, %v4055_v42  ;;  %v4073_v39 = vadd.f32 %v3952_v63, %v3822_v46 }
 0x18b   : > { %5809 = vst [vmem:[#allocation36_spill] sm:$0xff] %v4055_v42  ;;  %v4057_v35 = vmul.f32 0.7978846, %v1308_v38  ;;  %5811 = vst [vmem:[#allocation38_spill] sm:$0xff] %v4063_v26  ;;  %v4067_v36 = vmul.f32 0.7978846, %v1307_v58  ;;  %v1312_v43 = vadd.f32 %v1184_v59, %v3997_v37  ;;  %v932_v55 = vmul.f32 %v4063_v26, %v4063_v26 }
 0x18c   : > { %5807 = vst [vmem:[#allocation34_spill] sm:$0xff] %v4048_v22  ;;  %5808 = vst [vmem:[#allocation35_spill] sm:$0xff] %v4050_v14  ;;  %v4065_v61 = vpop.f32.mrb[20].mxu0  ;;  %v1183_v27 = vmul.f32 0.044715, %v1055_v7  ;;  %v4084_v58 = vadd.f32 %v3957_v9, %v3824_v47  ;;  %v4088_v7 = vadd.f32 %v3967_v18, %v3818_v44  ;;  %v1058_v28 = vmul.f32 %v930_v32, %v4055_v42 }
 0x18d   : > { %5810 = vst [vmem:[#allocation37_spill] sm:$0xff] %v4057_v35  ;;  %5812 = vst [vmem:[#allocation39_spill] sm:$0xff] %v4067_v36  ;;  %v4075_v38 = vpop.f32.mrb[20].mxu1  ;;  %v4077_v6 = vpop.f32.mrb[21].mxu0  ;;  %v1185_v63 = vmul.f32 0.044715, %v1057_v20  ;;  %v931_v23 = vmul.f32 %v4073_v39, %v4073_v39  ;;  %v4097_v59 = vadd.f32 %v3977_v24, %v3820_v45  ;;  %v1060_v37 = vmul.f32 %v932_v55, %v4063_v26 }
 0x18e   : > { %5813 = vst [vmem:[#allocation40_spill] sm:$0xff] %v4073_v39  ;;  %5814 = vst [vmem:[#allocation41_spill] sm:$0xff] %v4084_v58  ;;  %v4090_v33 = vpop.f32.mrb[21].mxu1  ;;  %v933_v9 = vmul.f32 %v4084_v58, %v4084_v58  ;;  %v934_v18 = vmul.f32 %v4088_v7, %v4088_v7  ;;  %v4106_v20 = vadd.f32 %v3979_v25, %v3822_v46  ;;  %v1186_v35 = vmul.f32 0.044715, %v1058_v28 }
 0x18f   : > { %5815 = vst [vmem:[#allocation42_spill] sm:$0xff] %v4088_v7  ;;  %5816 = vst [vmem:[#allocation43_spill] sm:$0xff] %v4097_v59  ;;  %v1059_v14 = vmul.f32 %v931_v23, %v4073_v39  ;;  %v936_v24 = vmul.f32 %v4097_v59, %v4097_v59  ;;  %v4115_v55 = vadd.f32 %v3990_v34, %v3824_v47  ;;  %v1188_v62 = vmul.f32 0.044715, %v1060_v37 }
 0x190   : > { %5817 = vst [vmem:[#allocation44_spill] sm:$0xff] %v4106_v20  ;;  %v4108_v32 = vpop.f32.mrb[22].mxu0  ;;  %v1311_v4 = vadd.f32 %v1183_v27, %v4005_v40  ;;  %v1061_v25 = vmul.f32 %v933_v9, %v4084_v58  ;;  %v1062_v22 = vmul.f32 %v934_v18, %v4088_v7  ;;  %v935_v23 = vmul.f32 %v4106_v20, %v4106_v20 }
 0x191   : > { %5818 = vst [vmem:[#allocation45_spill] sm:$0xff] %v4108_v32  ;;  %5819 = vst [vmem:[#allocation46_spill] sm:$0xff] %v4115_v55  ;;  %v4117_v36 = vpop.f32.mrb[22].mxu1  ;;  %v4119_v12 = vpop.f32.mrb[23].mxu0  ;;  %v4128_v32 = vmul.f32 0.7978846, %v1309_v17  ;;  %v1313_v34 = vadd.f32 %v1185_v63, %v4013_v54  ;;  %v1314_v27 = vadd.f32 %v1186_v35, %v4055_v42  ;;  %v1064_v18 = vmul.f32 %v936_v24, %v4097_v59 }
 0x192   : > { %5820 = vst [vmem:[#allocation47_spill] sm:$0xff] %v4117_v36  ;;  %5821 = vst [vmem:[#allocation48_spill] sm:$0xff] %v4119_v12  ;;  %v4126_v28 = vpop.f32.mrb[23].mxu1  ;;  %v937_v36 = vmul.f32 %v4115_v55, %v4115_v55  ;;  %v4133_v12 = vmul.f32 0.7978846, %v1310_v2  ;;  %v4148_v2 = vmul.f32 %v1804_v1, %v3830_v52  ;;  %v1063_v35 = vmul.f32 %v935_v23, %v4106_v20 }
 0x193   : > { %5822 = vst [vmem:[#allocation49_spill] sm:$0xff] %v4126_v28  ;;  %5823 = vst [vmem:[#allocation50_spill] sm:$0xff] %v4128_v32  ;;  %v1187_v9 = vmul.f32 0.044715, %v1059_v14  ;;  %v4141_v28 = vmul.f32 %v4029_v51, %v3827_v49  ;;  %v1189_v17 = vmul.f32 0.044715, %v1061_v25  ;;  %v1316_v49 = vadd.f32 %v1188_v62, %v4063_v26 }
 0x194   : > { %v4137_v40 = vpop.f32.mrb[24].mxu0  ;;  %v1190_v32 = vmul.f32 0.044715, %v1062_v22  ;;  %v4150_v54 = vmul.f32 0.7978846, %v1312_v43  ;;  %v1065_v51 = vmul.f32 %v937_v36, %v4115_v55  ;;  %3041 = vtanh.f32 %v3883_v41 }
 0x195   : > { %v4143_v63 = vpop.f32.mrb[24].mxu1  ;;  %v4145_v37 = vpop.f32.mrb[25].mxu0  ;;  %v4152_v14 = vmul.f32 0.7978846, %v1311_v4  ;;  %v4157_v42 = vmul.f32 0.7978846, %v1313_v34  ;;  %v1315_v52 = vadd.f32 %v1187_v9, %v4073_v39  ;;  %3043 = vtanh.f32 %v3885_v0 }
 0x196   : > { %v4155_v24 = vpop.f32.mrb[25].mxu1  ;;  %v4162_v22 = vmul.f32 0.7978846, %v1314_v27  ;;  %v1192_v1 = vmul.f32 0.044715, %v1064_v18  ;;  %v1317_v43 = vadd.f32 %v1189_v17, %v4084_v58  ;;  %v1318_v25 = vadd.f32 %v1190_v32, %v4088_v7 }
 0x197   : > { %v4172_v62 = vadd.f32 %v4007_v50, %v3818_v44  ;;  %v4176_v41 = vadd.f32 %v4015_v60, %v3820_v45  ;;  %v1191_v34 = vmul.f32 0.044715, %v1063_v35  ;;  %v4184_v0 = vadd.f32 %v4017_v3, %v3822_v46 }
 0x198   : > { %5824 = vst [vmem:[#allocation51_spill] sm:$0xff] %v4162_v22  ;;  %v4166_v4 = vpop.f32.mrb[26].mxu0  ;;  %v4188_v32 = vadd.f32 %v4023_v11, %v3824_v47  ;;  %3045 = vtanh.f32 %v3937_v31  ;;  %v1193_v27 = vmul.f32 0.044715, %v1065_v51  ;;  %v4204_v31 = vadd.f32 %v4032_v16, %v3818_v44 }
 0x199   : > { %5825 = vst [vmem:[#allocation52_spill] sm:$0xff] %v4172_v62  ;;  %5826 = vst [vmem:[#allocation53_spill] sm:$0xff] %v4176_v41  ;;  %v4178_v36 = vpop.f32.mrb[26].mxu1  ;;  %v4180_v23 = vpop.f32.mrb[27].mxu0  ;;  %v938_v60 = vmul.f32 %v4172_v62, %v4172_v62  ;;  %v940_v9 = vmul.f32 %v4176_v41, %v4176_v41  ;;  %3047 = vtanh.f32 %v3945_v48  ;;  %v939_v3 = vmul.f32 %v4184_v0, %v4184_v0 }
 0x19a   : > { %5827 = vst [vmem:[#allocation54_spill] sm:$0xff] %v4184_v0  ;;  %5828 = vst [vmem:[#allocation55_spill] sm:$0xff] %v4188_v32  ;;  %v4191_v50 = vpop.f32.mrb[27].mxu1  ;;  %v941_v11 = vmul.f32 %v4188_v32, %v4188_v32  ;;  %v4208_v18 = vadd.f32 %v4040_v21, %v3820_v45  ;;  %3049 = vtanh.f32 %v3933_v29  ;;  %v4217_v51 = vadd.f32 %v4042_v8, %v3822_v46 }
 0x19b   : > { %5829 = vst [vmem:[#allocation56_spill] sm:$0xff] %v4204_v31  ;;  %v1066_v35 = vmul.f32 %v938_v60, %v4172_v62  ;;  %v1068_v48 = vmul.f32 %v940_v9, %v4176_v41  ;;  %v4223_v26 = vmul.f32 0.7978846, %v1316_v49  ;;  %v1320_v21 = vadd.f32 %v1192_v1, %v4097_v59 }
 0x19c   : > { %5830 = vst [vmem:[#allocation57_spill] sm:$0xff] %v4208_v18  ;;  %v4210_v17 = vpop.f32.mrb[28].mxu0  ;;  %5832 = vst [vmem:[#allocation59_spill] sm:$0xff] %v4217_v51  ;;  %v1067_v58 = vmul.f32 %v939_v3, %v4184_v0  ;;  %v942_v60 = vmul.f32 %v4204_v31, %v4204_v31  ;;  %v1319_v29 = vadd.f32 %v1191_v34, %v4106_v20  ;;  %3051 = vtanh.f32 %v3935_v30 }
 0x19d   : > { %5831 = vst [vmem:[#allocation58_spill] sm:$0xff] %v4210_v17  ;;  %v4219_v7 = vpop.f32.mrb[28].mxu1  ;;  %v4221_v16 = vpop.f32.mrb[29].mxu0  ;;  %5835 = vst [vmem:[#allocation62_spill] sm:$0xff] %v4223_v26  ;;  %v1194_v39 = vmul.f32 0.044715, %v1066_v35  ;;  %v1069_v8 = vmul.f32 %v941_v11, %v4188_v32  ;;  %v1321_v49 = vadd.f32 %v1193_v27, %v4115_v55  ;;  %v944_v1 = vmul.f32 %v4208_v18, %v4208_v18 }
 0x19e   : > { %5833 = vst [vmem:[#allocation60_spill] sm:$0xff] %v4219_v7  ;;  %5834 = vst [vmem:[#allocation61_spill] sm:$0xff] %v4221_v16  ;;  %v4229_v9 = vpop.f32.mrb[29].mxu1  ;;  %v4234_v22 = vmul.f32 0.7978846, %v1315_v52  ;;  %v3042_v59 = vpop.eup %3041  ;;  %v1070_v34 = vmul.f32 %v942_v60, %v4204_v31  ;;  %v943_v30 = vmul.f32 %v4217_v51, %v4217_v51  ;;  %3053 = vtanh.f32 %v3961_v13 }
 0x19f   : > { %5836 = vst [vmem:[#allocation63_spill] sm:$0xff] %v4229_v9  ;;  %v1196_v16 = vmul.f32 0.044715, %v1068_v48  ;;  %v4241_v26 = vmul.f32 0.7978846, %v1317_v43  ;;  %v3044_v27 = vpop.eup %3043  ;;  %v1675_v48 = vadd.f32 1.0, %v3042_v59  ;;  %v4256_v43 = vadd.f32 %v4046_v15, %v3824_v47 }
 0x1a0   : > { %v4239_v3 = vpop.f32.mrb[30].mxu0  ;;  %v4243_v9 = vmul.f32 0.7978846, %v1318_v25  ;;  %v4252_v35 = vmul.f32 0.7978846, %v1320_v21  ;;  %v1677_v60 = vadd.f32 1.0, %v3044_v27  ;;  %3055 = vtanh.f32 %v3969_v19 }
 0x1a1   : > { %5837 = vst [vmem:[#allocation64_spill] sm:$0xff] %v4239_v3  ;;  %v4248_v52 = vpop.f32.mrb[30].mxu1  ;;  %v4250_v11 = vpop.f32.mrb[31].mxu0  ;;  %v1195_v55 = vmul.f32 0.044715, %v1067_v58  ;;  %5842 = vst [vmem:[#allocation69_spill] sm:$0xff] %v4256_v43  ;;  %v1324_v21 = vadd.f32 %v1196_v16, %v4176_v41  ;;  %v1072_v58 = vmul.f32 %v944_v1, %v4208_v18  ;;  %v4308_v19 = vadd.f32 %v4075_v38, %v3820_v45 }
 0x1a2   : > { %5838 = vst [vmem:[#allocation65_spill] sm:$0xff] %v4243_v9  ;;  %5839 = vst [vmem:[#allocation66_spill] sm:$0xff] %v4248_v52  ;;  %v4258_v25 = vpop.f32.mrb[31].mxu1  ;;  %v4260_v20 = vmul.f32 0.7978846, %v1319_v29  ;;  %v1322_v9 = vadd.f32 %v1194_v39, %v4172_v62  ;;  %v3046_v52 = vpop.eup %3045  ;;  %v1071_v29 = vmul.f32 %v943_v30, %v4217_v51  ;;  %3057 = vtanh.f32 %v3950_v57 }
 0x1a3   : > { %5840 = vst [vmem:[#allocation67_spill] sm:$0xff] %v4250_v11  ;;  %5841 = vst [vmem:[#allocation68_spill] sm:$0xff] %v4252_v35  ;;  %v1197_v3 = vmul.f32 0.044715, %v1069_v8  ;;  %v4263_v7 = vmul.f32 0.7978846, %v1321_v49  ;;  %v3048_v15 = vpop.eup %3047  ;;  %v1323_v39 = vadd.f32 %v1195_v55, %v4184_v0  ;;  %v945_v49 = vmul.f32 %v4256_v43, %v4256_v43 }
 0x1a4   : > { %5843 = vst [vmem:[#allocation70_spill] sm:$0xff] %v4258_v25  ;;  %v1803_v11 = vmul.f32 0.5, %v1675_v48  ;;  %v4267_v59 = vpop.f32.mrb[32].mxu0  ;;  %v1805_v35 = vmul.f32 0.5, %v1677_v60  ;;  %v1679_v17 = vadd.f32 1.0, %v3046_v52  ;;  %v1681_v8 = vadd.f32 1.0, %v3048_v15  ;;  %v3050_v1 = vpop.eup %3049 }
 0x1a5   : > { %v1198_v25 = vmul.f32 0.044715, %v1070_v34  ;;  %v4274_v48 = vpop.f32.mrb[32].mxu1  ;;  %v4276_v16 = vpop.f32.mrb[33].mxu0  ;;  %v4279_v60 = vmul.f32 0.7978846, %v1322_v9  ;;  %v1325_v34 = vadd.f32 %v1197_v3, %v4188_v32  ;;  %v948_v38 = vmul.f32 %v4308_v19, %v4308_v19 }
 0x1a6   : > { %v1931_v27 = vmul.f32 %v1803_v11, %v3833_v53  ;;  %v1933_v41 = vmul.f32 %v1805_v35, %v3838_v56  ;;  %v1807_v30 = vmul.f32 0.5, %v1679_v17  ;;  %v4282_v52 = vpop.f32.mrb[33].mxu1  ;;  %v4284_v53 = vmul.f32 0.7978846, %v1324_v21  ;;  %v3052_v62 = vpop.eup %3051  ;;  %5846 = vst [vmem:[#allocation73_spill] sm:$0xff] %v4308_v19 }
 0x1a7   : > { %v1809_v55 = vmul.f32 0.5, %v1681_v8  ;;  %v1678_v11 = vadd.f32 1.0, %v3050_v1  ;;  %v1326_v9 = vadd.f32 %v1198_v25, %v4204_v31  ;;  %v1200_v17 = vmul.f32 0.044715, %v1072_v58  ;;  %v5848_v8 = vld [vmem:[#allocation23_spill] sm:$0xff] }
 0x1a8   : > { %2193 = vmatprep.mubr.f32.mxu1 %v1931_v27  ;;  %v4287_v15 = vpop.f32.mrb[34].mxu0  ;;  %2418 = vmatprep.mubr.f32.mxu0 %v1933_v41  ;;  %v1935_v56 = vmul.f32 %v1807_v30, %v3856_v5  ;;  %v1680_v27 = vadd.f32 1.0, %v3052_v62  ;;  %v1073_v41 = vmul.f32 %v945_v49, %v4256_v43  ;;  %v4304_v5 = vadd.f32 %v4065_v61, %v3818_v44  ;;  %v5852_v30 = vld [vmem:[#allocation13_spill] sm:$0xff]  ;;  %v5856_v31 = vld [vmem:[#allocation47_spill] sm:$0xff] }
 0x1a9   : > { %2194 = vmatmul.mubr.f32.vlgmr.msra.gmra.mrb[64].mxu1 %v4141_v28  ;;  %v4293_v3 = vpop.f32.mrb[34].mxu1  ;;  %v4295_v35 = vpop.f32.mrb[35].mxu0  ;;  %2419 = vmatmul.mubr.f32.vlgmr.msra.gmra.mrb[64].mxu0 %v4148_v2  ;;  %v1937_v13 = vmul.f32 %v1809_v55, %v3862_v10  ;;  %v1806_v21 = vmul.f32 0.5, %v1678_v11  ;;  %v4313_v10 = vadd.f32 %v4077_v6, %v3822_v46  ;;  %v5847_v2 = vld [vmem:[#allocation12_spill] sm:$0xff]  ;;  %v1199_v58 = vmul.f32 0.044715, %v1071_v29 }
 0x1aa   : > { %5844 = vst [vmem:[#allocation71_spill] sm:$0xff] %v4295_v35  ;;  %v4300_v28 = vpop.f32.mrb[35].mxu1  ;;  %2198 = vmatprep.mubr.f32.mxu1 %v1935_v56  ;;  %v1808_v25 = vmul.f32 0.5, %v1680_v27  ;;  %3059 = vtanh.f32 %v5848_v8  ;;  %v946_v61 = vmul.f32 %v4304_v5, %v4304_v5  ;;  %v4327_v6 = vadd.f32 %v4090_v33, %v3824_v47  ;;  %v5853_v56 = vld [vmem:[#allocation33_spill] sm:$0xff] }
 0x1ab   : > { %5845 = vst [vmem:[#allocation72_spill] sm:$0xff] %v4300_v28  ;;  %2423 = vmatprep.mubr.f32.mxu0 %v1937_v13  ;;  %v1934_v62 = vmul.f32 %v1806_v21, %v5847_v2  ;;  %v947_v57 = vmul.f32 %v4313_v10, %v4313_v10  ;;  %v1201_v11 = vmul.f32 0.044715, %v1073_v41  ;;  %3061 = vtanh.f32 %v5853_v56  ;;  %v5854_v13 = vld [vmem:[#allocation45_spill] sm:$0xff]  ;;  %v5859_v56 = vld [vmem:[#allocation48_spill] sm:$0xff] }
 0x1ac   : > { %v4317_v49 = vpop.f32.mrb[36].mxu0  ;;  %v1936_v55 = vmul.f32 %v1808_v25, %v5852_v30  ;;  %v4337_v21 = vadd.f32 %v5854_v13, %v3818_v44  ;;  %v1328_v2 = vadd.f32 %v1200_v17, %v4208_v18  ;;  %v1074_v33 = vmul.f32 %v946_v61, %v4304_v5  ;;  %v5858_v30 = vld [vmem:[#allocation34_spill] sm:$0xff] }
 0x1ad   : > { %5849 = vst [vmem:[#allocation12_spill] sm:$0xff] %v4317_v49  ;;  %v4329_v1 = vpop.f32.mrb[36].mxu1  ;;  %v4331_v29 = vpop.f32.mrb[37].mxu0  ;;  %2199 = vmatmul.mubr.f32.gmra.mrb[66].mxu1 %v1934_v62  ;;  %v1076_v8 = vmul.f32 %v948_v38, %v4308_v19  ;;  %v4346_v62 = vadd.f32 %v5856_v31, %v3820_v45  ;;  %v4348_v25 = vmul.f32 0.7978846, %v1323_v39  ;;  %v949_v41 = vmul.f32 %v4327_v6, %v4327_v6 }
 0x1ae   : > { %5850 = vst [vmem:[#allocation23_spill] sm:$0xff] %v4329_v1  ;;  %5851 = vst [vmem:[#allocation74_spill] sm:$0xff] %v4331_v29  ;;  %v4339_v27 = vpop.f32.mrb[37].mxu1  ;;  %2424 = vmatmul.mubr.f32.gmra.mrb[66].mxu0 %v1936_v55  ;;  %3063 = vtanh.f32 %v5858_v30  ;;  %v4355_v13 = vadd.f32 %v5859_v56, %v3822_v46  ;;  %v4359_v61 = vmul.f32 0.7978846, %v1325_v34  ;;  %v1327_v38 = vadd.f32 %v1199_v58, %v4217_v51  ;;  %v3054_v55 = vpop.eup %3053  ;;  %v5862_v29 = vld [vmem:[#allocation31_spill] sm:$0xff] }
 0x1af   : > { %5855 = vst [vmem:[#allocation13_spill] sm:$0xff] %v4339_v27  ;;  %5857 = vst [vmem:[#allocation33_spill] sm:$0xff] %v4346_v62  ;;  %v1075_v31 = vmul.f32 %v947_v57, %v4313_v10  ;;  %v950_v39 = vmul.f32 %v4337_v21, %v4337_v21  ;;  %v4365_v18 = vmul.f32 0.7978846, %v1326_v9  ;;  %v1329_v30 = vadd.f32 %v1201_v11, %v4256_v43  ;;  %v3056_v34 = vpop.eup %3055 }
 0x1b0   : > { %v4357_v17 = vpop.f32.mrb[38].mxu0  ;;  %v1202_v27 = vmul.f32 0.044715, %v1074_v33  ;;  %3065 = vtanh.f32 %v5862_v29  ;;  %v4373_v1 = vmul.f32 0.7978846, %v1328_v2  ;;  %v1683_v58 = vadd.f32 1.0, %v3054_v55 }
 0x1b1   : > { %5860 = vst [vmem:[#allocation45_spill] sm:$0xff] %v4357_v17  ;;  %5861 = vst [vmem:[#allocation47_spill] sm:$0xff] %v4365_v18  ;;  %v4369_v56 = vpop.f32.mrb[38].mxu1  ;;  %v4371_v17 = vpop.f32.mrb[39].mxu0  ;;  %v1204_v57 = vmul.f32 0.044715, %v1076_v8  ;;  %v952_v51 = vmul.f32 %v4346_v62, %v4346_v62  ;;  %v1077_v11 = vmul.f32 %v949_v41, %v4327_v6  ;;  %v951_v29 = vmul.f32 %v4355_v13, %v4355_v13 }
 0x1b2   : > { %5863 = vst [vmem:[#allocation34_spill] sm:$0xff] %v4369_v56  ;;  %5864 = vst [vmem:[#allocation48_spill] sm:$0xff] %v4371_v17  ;;  %v4377_v49 = vpop.f32.mrb[39].mxu1  ;;  %v1685_v9 = vadd.f32 1.0, %v3056_v34  ;;  %v5867_v33 = vld [vmem:[#allocation32_spill] sm:$0xff]  ;;  %v3058_v17 = vpop.eup %3057  ;;  %v1811_v55 = vmul.f32 0.5, %v1683_v58  ;;  %v1078_v43 = vmul.f32 %v950_v39, %v4337_v21 }
 0x1b3   : > { %5865 = vst [vmem:[#allocation31_spill] sm:$0xff] %v4373_v1  ;;  %5866 = vst [vmem:[#allocation75_spill] sm:$0xff] %v4377_v49  ;;  %3067 = vtanh.f32 %v5867_v33  ;;  %v4385_v2 = vmul.f32 0.7978846, %v1327_v38  ;;  %v1203_v8 = vmul.f32 0.044715, %v1075_v31  ;;  %v1330_v33 = vadd.f32 %v1202_v27, %v4304_v5 }
 0x1b4   : > { %v4383_v56 = vpop.f32.mrb[40].mxu0  ;;  %v3060_v49 = vpop.eup %3059  ;;  %v4390_v34 = vmul.f32 0.7978846, %v1329_v30  ;;  %v1813_v41 = vmul.f32 0.5, %v1685_v9  ;;  %v1682_v1 = vadd.f32 1.0, %v3058_v17  ;;  %v4399_v58 = vadd.f32 %v1204_v57, %v4308_v19  ;;  %v5873_v18 = vld [vmem:[#allocation17_spill] sm:$0xff] }
 0x1b5   : > { %5868 = vst [vmem:[#allocation32_spill] sm:$0xff] %v4383_v56  ;;  %v4388_v28 = vpop.f32.mrb[40].mxu1  ;;  %v4393_v32 = vpop.f32.mrb[41].mxu0  ;;  %v5872_v56 = vld [vmem:[#allocation16_spill] sm:$0xff]  ;;  %v1684_v31 = vadd.f32 1.0, %v3060_v49  ;;  %v1080_v39 = vmul.f32 %v952_v51, %v4346_v62  ;;  %v1079_v27 = vmul.f32 %v951_v29, %v4355_v13  ;;  %v5878_v29 = vld [vmem:[#allocation49_spill] sm:$0xff] }
 0x1b6   : > { %5869 = vst [vmem:[#allocation76_spill] sm:$0xff] %v4388_v28  ;;  %5870 = vst [vmem:[#allocation77_spill] sm:$0xff] %v4393_v32  ;;  %v4395_v35 = vpop.f32.mrb[41].mxu1  ;;  %v1939_v38 = vmul.f32 %v1811_v55, %v5872_v56  ;;  %v3062_v28 = vpop.eup %3061  ;;  %v1941_v30 = vmul.f32 %v1813_v41, %v5873_v18  ;;  %v1810_v0 = vmul.f32 0.5, %v1682_v1  ;;  %v1205_v9 = vmul.f32 0.044715, %v1077_v11 }
 0x1b7   : > { %5871 = vst [vmem:[#allocation78_spill] sm:$0xff] %v4395_v35  ;;  %v1812_v32 = vmul.f32 0.5, %v1684_v31  ;;  %v4407_v35 = vadd.f32 %v1203_v8, %v4313_v10  ;;  %v1687_v56 = vadd.f32 1.0, %v3062_v28  ;;  %v1206_v57 = vmul.f32 0.044715, %v1078_v43  ;;  %v5877_v1 = vld [vmem:[#allocation14_spill] sm:$0xff] }
 0x1b8   : > { %v4404_v17 = vpop.f32.mrb[42].mxu0  ;;  %2203 = vmatprep.mubr.f32.mxu1 %v1939_v38  ;;  %v3064_v51 = vpop.eup %3063  ;;  %2428 = vmatprep.mubr.f32.mxu0 %v1941_v30  ;;  %v4413_v18 = vmul.f32 0.7978846, %v1330_v33  ;;  %v1938_v11 = vmul.f32 %v1810_v0, %v5877_v1  ;;  %v4418_v41 = vadd.f32 %v5878_v29, %v3824_v47  ;;  %v5879_v38 = vld [vmem:[#allocation39_spill] sm:$0xff]  ;;  %v1207_v30 = vmul.f32 0.044715, %v1079_v27 }
 0x1b9   : > { %5874 = vst [vmem:[#allocation16_spill] sm:$0xff] %v4404_v17  ;;  %v4409_v55 = vpop.f32.mrb[42].mxu1  ;;  %v4411_v49 = vpop.f32.mrb[43].mxu0  ;;  %3069 = vtanh.f32 %v5879_v38  ;;  %v5881_v28 = vld [vmem:[#allocation15_spill] sm:$0xff]  ;;  %v1815_v31 = vmul.f32 0.5, %v1687_v56  ;;  %v5882_v0 = vld [vmem:[#allocation50_spill] sm:$0xff]  ;;  %v4429_v1 = vadd.f32 %v4137_v40, %v3818_v44 }
 0x1ba   : > { %5875 = vst [vmem:[#allocation17_spill] sm:$0xff] %v4409_v55  ;;  %5876 = vst [vmem:[#allocation79_spill] sm:$0xff] %v4411_v49  ;;  %v4421_v8 = vpop.f32.mrb[43].mxu1  ;;  %v1940_v43 = vmul.f32 %v1812_v32, %v5881_v28  ;;  %v1689_v55 = vadd.f32 1.0, %v3064_v51  ;;  %v1208_v17 = vmul.f32 0.044715, %v1080_v39  ;;  %v3066_v49 = vpop.eup %3065  ;;  %2204 = vmatmul.mubr.f32.gmra.mrb[68].mxu1 %v1938_v11  ;;  %v953_v33 = vmul.f32 %v4418_v41, %v4418_v41 }
 0x1bb   : > { %5880 = vst [vmem:[#allocation14_spill] sm:$0xff] %v4421_v8  ;;  %3071 = vtanh.f32 %v5882_v0  ;;  %5883 = vst [vmem:[#allocation49_spill] sm:$0xff] %v4429_v1  ;;  %v5885_v38 = vld [vmem:[#allocation20_spill] sm:$0xff]  ;;  %v1686_v51 = vadd.f32 1.0, %v3066_v49  ;;  %v4436_v39 = vadd.f32 %v4143_v63, %v3820_v45  ;;  %v954_v40 = vmul.f32 %v4429_v1, %v4429_v1  ;;  %v5892_v63 = vld [vmem:[#allocation21_spill] sm:$0xff] }
 0x1bc   : > { %v4431_v29 = vpop.f32.mrb[44].mxu0  ;;  %2429 = vmatmul.mubr.f32.gmra.mrb[68].mxu0 %v1940_v43  ;;  %v1943_v32 = vmul.f32 %v1815_v31, %v5885_v38  ;;  %v1817_v56 = vmul.f32 0.5, %v1689_v55  ;;  %v1081_v0 = vmul.f32 %v953_v33, %v4418_v41  ;;  %v4448_v55 = vadd.f32 %v4145_v37, %v3822_v46  ;;  %v5893_v8 = vld [vmem:[#allocation37_spill] sm:$0xff] }
 0x1bd   : > { %5884 = vst [vmem:[#allocation39_spill] sm:$0xff] %v4431_v29  ;;  %5886 = vst [vmem:[#allocation15_spill] sm:$0xff] %v4436_v39  ;;  %v4438_v27 = vpop.f32.mrb[44].mxu1  ;;  %v4440_v11 = vpop.f32.mrb[45].mxu0  ;;  %v5889_v29 = vld [vmem:[#allocation35_spill] sm:$0xff]  ;;  %v1814_v31 = vmul.f32 0.5, %v1686_v51  ;;  %v1333_v33 = vadd.f32 %v1205_v9, %v4327_v6  ;;  %v4464_v51 = vadd.f32 %v4155_v24, %v3824_v47 }
 0x1be   : > { %5887 = vst [vmem:[#allocation50_spill] sm:$0xff] %v4438_v27  ;;  %5888 = vst [vmem:[#allocation20_spill] sm:$0xff] %v4440_v11  ;;  %v3068_v28 = vpop.eup %3067  ;;  %3073 = vtanh.f32 %v5889_v29  ;;  %v4450_v49 = vpop.f32.mrb[45].mxu1  ;;  %2208 = vmatprep.mubr.f32.mxu1 %v1943_v32  ;;  %v1945_v43 = vmul.f32 %v1817_v56, %v5892_v63  ;;  %v956_v11 = vmul.f32 %v4436_v39, %v4436_v39  ;;  %v1209_v56 = vmul.f32 0.044715, %v1081_v0  ;;  %v5900_v24 = vld [vmem:[#allocation19_spill] sm:$0xff] }
 0x1bf   : > { %5890 = vst [vmem:[#allocation35_spill] sm:$0xff] %v4448_v55  ;;  %5891 = vst [vmem:[#allocation80_spill] sm:$0xff] %v4450_v49  ;;  %v1688_v38 = vadd.f32 1.0, %v3068_v28  ;;  %v1334_v27 = vadd.f32 %v1206_v57, %v4337_v21  ;;  %v1082_v29 = vmul.f32 %v954_v40, %v4429_v1  ;;  %3075 = vtanh.f32 %v5893_v8  ;;  %v5895_v49 = vld [vmem:[#allocation18_spill] sm:$0xff] }
 0x1c0   : > { %v4459_v37 = vpop.f32.mrb[46].mxu0  ;;  %2433 = vmatprep.mubr.f32.mxu0 %v1945_v43  ;;  %v1942_v32 = vmul.f32 %v1814_v31, %v5895_v49  ;;  %5896 = vst [vmem:[#allocation37_spill] sm:$0xff] %v4464_v51  ;;  %v4471_v57 = vmul.f32 0.7978846, %v4399_v58  ;;  %v1084_v8 = vmul.f32 %v956_v11, %v4436_v39  ;;  %v955_v40 = vmul.f32 %v4448_v55, %v4448_v55 }
 0x1c1   : > { %5894 = vst [vmem:[#allocation21_spill] sm:$0xff] %v4459_v37  ;;  %v1816_v19 = vmul.f32 0.5, %v1688_v38  ;;  %v4466_v28 = vpop.f32.mrb[46].mxu1  ;;  %v4468_v9 = vpop.f32.mrb[47].mxu0  ;;  %3077 = vtanh.f32 %v4152_v14  ;;  %v1336_v0 = vadd.f32 %v1208_v17, %v4346_v62  ;;  %v1335_v43 = vadd.f32 %v1207_v30, %v4355_v13 }
 0x1c2   : > { %5897 = vst [vmem:[#allocation18_spill] sm:$0xff] %v4466_v28  ;;  %5898 = vst [vmem:[#allocation81_spill] sm:$0xff] %v4468_v9  ;;  %v4477_v49 = vpop.f32.mrb[47].mxu1  ;;  %2209 = vmatmul.mubr.f32.gmra.mrb[70].mxu1 %v1942_v32  ;;  %3079 = vtanh.f32 %v4157_v42  ;;  %v4484_v31 = vmul.f32 0.7978846, %v4407_v35  ;;  %v957_v38 = vmul.f32 %v4464_v51, %v4464_v51  ;;  %v1083_v35 = vmul.f32 %v955_v40, %v4448_v55 }
 0x1c3   : > { %5899 = vst [vmem:[#allocation82_spill] sm:$0xff] %v4477_v49  ;;  %v1944_v63 = vmul.f32 %v1816_v19, %v5900_v24  ;;  %v3070_v58 = vpop.eup %3069  ;;  %v1210_v11 = vmul.f32 0.044715, %v1082_v29  ;;  %v4490_v49 = vmul.f32 0.7978846, %v1333_v33  ;;  %v1337_v19 = vadd.f32 %v1209_v56, %v4418_v41 }
 0x1c4   : > { %v4488_v14 = vpop.f32.mrb[48].mxu0  ;;  %v4492_v17 = vmul.f32 0.7978846, %v1334_v27  ;;  %v1691_v30 = vadd.f32 1.0, %v3070_v58  ;;  %v1212_v24 = vmul.f32 0.044715, %v1084_v8  ;;  %v4500_v29 = vadd.f32 %v4166_v4, %v3818_v44 }
 0x1c5   : > { %5901 = vst [vmem:[#allocation19_spill] sm:$0xff] %v4488_v14  ;;  %2434 = vmatmul.mubr.f32.gmra.mrb[70].mxu0 %v1944_v63  ;;  %v4495_v32 = vpop.f32.mrb[48].mxu1  ;;  %v3072_v42 = vpop.eup %3071  ;;  %3081 = vtanh.f32 %v4133_v12  ;;  %v4503_v33 = vmul.f32 0.7978846, %v1336_v0  ;;  %v4505_v27 = vmul.f32 0.7978846, %v1335_v43  ;;  %v1338_v58 = vadd.f32 %v1210_v11, %v4429_v1 }
 0x1c6   : > { %5902 = vst [vmem:[#allocation83_spill] sm:$0xff] %v4495_v32  ;;  %5903 = vst [vmem:[#allocation84_spill] sm:$0xff] %v4500_v29  ;;  %v1819_v63 = vmul.f32 0.5, %v1691_v30  ;;  %v1693_v14 = vadd.f32 1.0, %v3072_v42  ;;  %v1085_v32 = vmul.f32 %v957_v38, %v4464_v51  ;;  %v4511_v8 = vadd.f32 %v4178_v36, %v3820_v45  ;;  %v4514_v4 = vpop.f32.mrb[49].mxu0  ;;  %v4516_v12 = vpop.f32.mrb[49].mxu1 }
 0x1c7   : > { %3083 = vtanh.f32 %v4150_v54  ;;  %5905 = vst [vmem:[#allocation86_spill] sm:$0xff] %v4514_v4  ;;  %5906 = vst [vmem:[#allocation87_spill] sm:$0xff] %v4516_v12  ;;  %v4518_v40 = vmul.f32 0.7978846, %v1337_v19  ;;  %v5907_v0 = vld [vmem:[#allocation25_spill] sm:$0xff]  ;;  %v1340_v11 = vadd.f32 %v1212_v24, %v4436_v39  ;;  %v958_v36 = vmul.f32 %v4500_v29, %v4500_v29  ;;  %v5909_v4 = vld [vmem:[#allocation26_spill] sm:$0xff] }
 0x1c8   : > { %v3074_v56 = vpop.eup %3073  ;;  %5904 = vst [vmem:[#allocation85_spill] sm:$0xff] %v4511_v8  ;;  %v1947_v43 = vmul.f32 %v1819_v63, %v5907_v0  ;;  %v1821_v30 = vmul.f32 0.5, %v1693_v14  ;;  %v1211_v38 = vmul.f32 0.044715, %v1083_v35  ;;  %v4526_v54 = vadd.f32 %v4180_v23, %v3822_v46  ;;  %v4539_v0 = vpop.f32.mrb[50].mxu0  ;;  %v5914_v1 = vld [vmem:[#allocation24_spill] sm:$0xff] }
 0x1c9   : > { %v1690_v42 = vadd.f32 1.0, %v3074_v56  ;;  %v3076_v9 = vpop.eup %3075  ;;  %v4531_v14 = vadd.f32 %v4191_v50, %v3824_v47  ;;  %v4533_v56 = vmul.f32 0.7978846, %v1338_v58  ;;  %v1213_v24 = vmul.f32 0.044715, %v1085_v32  ;;  %5911 = vst [vmem:[#allocation88_spill] sm:$0xff] %v4539_v0 }
 0x1ca   : > { %5908 = vst [vmem:[#allocation25_spill] sm:$0xff] %v4526_v54  ;;  %2213 = vmatprep.mubr.f32.mxu1 %v1947_v43  ;;  %v1949_v12 = vmul.f32 %v1821_v30, %v5909_v4  ;;  %v1692_v28 = vadd.f32 1.0, %v3076_v9  ;;  %v960_v35 = vmul.f32 %v4511_v8, %v4511_v8  ;;  %v959_v23 = vmul.f32 %v4526_v54, %v4526_v54  ;;  %v4541_v43 = vpop.f32.mrb[50].mxu1  ;;  %v5913_v9 = vld [vmem:[#allocation22_spill] sm:$0xff] }
 0x1cb   : > { %v1818_v19 = vmul.f32 0.5, %v1690_v42  ;;  %5910 = vst [vmem:[#allocation26_spill] sm:$0xff] %v4531_v14  ;;  %v3078_v63 = vpop.eup %3077  ;;  %5912 = vst [vmem:[#allocation89_spill] sm:$0xff] %v4541_v43  ;;  %3085 = vtanh.f32 %v4234_v22  ;;  %v4545_v58 = vmul.f32 0.7978846, %v1340_v11  ;;  %v1339_v32 = vadd.f32 %v1211_v38, %v4448_v55  ;;  %v5915_v38 = vld [vmem:[#allocation58_spill] sm:$0xff] }
 0x1cc   : > { %v3080_v4 = vpop.eup %3079  ;;  %2438 = vmatprep.mubr.f32.mxu0 %v1949_v12  ;;  %v1820_v50 = vmul.f32 0.5, %v1692_v28  ;;  %v1695_v42 = vadd.f32 1.0, %v3078_v63  ;;  %v1086_v39 = vmul.f32 %v958_v36, %v4500_v29  ;;  %v961_v12 = vmul.f32 %v4531_v14, %v4531_v14  ;;  %v5917_v36 = vld [vmem:[#allocation29_spill] sm:$0xff]  ;;  %v5921_v43 = vld [vmem:[#allocation51_spill] sm:$0xff] }
 0x1cd   : > { %v1946_v30 = vmul.f32 %v1818_v19, %v5913_v9  ;;  %v1697_v37 = vadd.f32 1.0, %v3080_v4  ;;  %3087 = vtanh.f32 %v4241_v26  ;;  %v1341_v19 = vadd.f32 %v1213_v24, %v4464_v51 }
 0x1ce   : > { %v1948_v0 = vmul.f32 %v1820_v50, %v5914_v1  ;;  %v1823_v62 = vmul.f32 0.5, %v1695_v42  ;;  %v1088_v11 = vmul.f32 %v960_v35, %v4511_v8  ;;  %v4557_v63 = vadd.f32 %v5915_v38, %v3818_v44  ;;  %v5920_v42 = vld [vmem:[#allocation30_spill] sm:$0xff] }
 0x1cf   : > { %2214 = vmatmul.mubr.f32.gmra.mrb[72].mxu1 %v1946_v30  ;;  %v3082_v28 = vpop.eup %3081  ;;  %v1825_v22 = vmul.f32 0.5, %v1697_v37  ;;  %v1087_v9 = vmul.f32 %v959_v23, %v4526_v54  ;;  %v5918_v30 = vld [vmem:[#allocation60_spill] sm:$0xff]  ;;  %v1214_v37 = vmul.f32 0.044715, %v1086_v39  ;;  %3089 = vtanh.f32 %v5921_v43  ;;  %v5925_v43 = vld [vmem:[#allocation61_spill] sm:$0xff] }
 0x1d0   : > { %5916 = vst [vmem:[#allocation22_spill] sm:$0xff] %v4557_v63  ;;  %2439 = vmatmul.mubr.f32.gmra.mrb[72].mxu0 %v1948_v0  ;;  %v1951_v4 = vmul.f32 %v1823_v62, %v5917_v36  ;;  %v1694_v1 = vadd.f32 1.0, %v3082_v28  ;;  %v4563_v50 = vadd.f32 %v5918_v30, %v3820_v45  ;;  %v962_v35 = vmul.f32 %v4557_v63, %v4557_v63  ;;  %v4572_v28 = vpop.f32.mrb[51].mxu0  ;;  %v4574_v36 = vpop.f32.mrb[51].mxu1  ;;  %v5924_v30 = vld [vmem:[#allocation62_spill] sm:$0xff] }
 0x1d1   : > { %v3084_v26 = vpop.eup %3083  ;;  %v1953_v24 = vmul.f32 %v1825_v22, %v5920_v42  ;;  %v1089_v62 = vmul.f32 %v961_v12, %v4531_v14  ;;  %5922 = vst [vmem:[#allocation58_spill] sm:$0xff] %v4572_v28  ;;  %5923 = vst [vmem:[#allocation29_spill] sm:$0xff] %v4574_v36  ;;  %v1216_v22 = vmul.f32 0.044715, %v1088_v11  ;;  %3091 = vtanh.f32 %v5924_v30  ;;  %v5927_v11 = vld [vmem:[#allocation63_spill] sm:$0xff] }
 0x1d2   : > { %5919 = vst [vmem:[#allocation24_spill] sm:$0xff] %v4563_v50  ;;  %2218 = vmatprep.mubr.f32.mxu1 %v1951_v4  ;;  %v1822_v0 = vmul.f32 0.5, %v1694_v1  ;;  %v1696_v38 = vadd.f32 1.0, %v3084_v26  ;;  %v964_v23 = vmul.f32 %v4563_v50, %v4563_v50  ;;  %v1090_v39 = vmul.f32 %v962_v35, %v4557_v63  ;;  %v5926_v1 = vld [vmem:[#allocation27_spill] sm:$0xff] }
 0x1d3   : > { %2443 = vmatprep.mubr.f32.mxu0 %v1953_v24  ;;  %v4580_v4 = vadd.f32 %v5925_v43, %v3822_v46  ;;  %v1215_v42 = vmul.f32 0.044715, %v1087_v9  ;;  %v1342_v28 = vadd.f32 %v1214_v37, %v4500_v29  ;;  %v4589_v35 = vadd.f32 %v5927_v11, %v3824_v47  ;;  %v5928_v43 = vld [vmem:[#allocation28_spill] sm:$0xff]  ;;  %v4594_v9 = vpop.f32.mrb[52].mxu0  ;;  %v4596_v37 = vpop.f32.mrb[52].mxu1 }
 0x1d4   : > { %v1950_v26 = vmul.f32 %v1822_v0, %v5926_v1  ;;  %v1824_v12 = vmul.f32 0.5, %v1696_v38  ;;  %v1092_v51 = vmul.f32 %v964_v23, %v4563_v50  ;;  %3093 = vtanh.f32 %v4260_v20  ;;  %5929 = vst [vmem:[#allocation60_spill] sm:$0xff] %v4594_v9  ;;  %5930 = vst [vmem:[#allocation30_spill] sm:$0xff] %v4596_v37  ;;  %v5931_v29 = vld [vmem:[#allocation64_spill] sm:$0xff] }
 0x1d5   : > { %v963_v24 = vmul.f32 %v4580_v4, %v4580_v4  ;;  %v3086_v30 = vpop.eup %3085  ;;  %v1217_v0 = vmul.f32 0.044715, %v1089_v62  ;;  %v1218_v38 = vmul.f32 0.044715, %v1090_v39  ;;  %3095 = vtanh.f32 %v4263_v7  ;;  %v5933_v39 = vld [vmem:[#allocation65_spill] sm:$0xff] }
 0x1d6   : > { %2219 = vmatmul.mubr.f32.gmra.mrb[74].mxu1 %v1950_v26  ;;  %v1952_v36 = vmul.f32 %v1824_v12, %v5928_v43  ;;  %v4598_v23 = vmul.f32 0.7978846, %v1339_v32  ;;  %v4600_v1 = vmul.f32 0.7978846, %v1341_v19  ;;  %v1699_v11 = vadd.f32 1.0, %v3086_v30 }
 0x1d7   : > { %v4604_v20 = vadd.f32 %v5931_v29, %v3818_v44  ;;  %v3088_v26 = vpop.eup %3087  ;;  %v1344_v12 = vadd.f32 %v1216_v22, %v4511_v8  ;;  %v1343_v62 = vadd.f32 %v1215_v42, %v4526_v54  ;;  %v1220_v7 = vmul.f32 0.044715, %v1092_v51  ;;  %v5937_v42 = vld [vmem:[#allocation40_spill] sm:$0xff]  ;;  %v4624_v8 = vpop.f32.mrb[53].mxu0 }
 0x1d8   : > { %2444 = vmatmul.mubr.f32.gmra.mrb[74].mxu0 %v1952_v36  ;;  %3097 = vtanh.f32 %v5933_v39  ;;  %v1827_v43 = vmul.f32 0.5, %v1699_v11  ;;  %v1701_v37 = vadd.f32 1.0, %v3088_v26  ;;  %v1091_v32 = vmul.f32 %v963_v24, %v4580_v4  ;;  %v5935_v36 = vld [vmem:[#allocation66_spill] sm:$0xff]  ;;  %v5938_v26 = vld [vmem:[#allocation68_spill] sm:$0xff]  ;;  %5939 = vst [vmem:[#allocation27_spill] sm:$0xff] %v4624_v8 }
 0x1d9   : > { %5932 = vst [vmem:[#allocation51_spill] sm:$0xff] %v4604_v20  ;;  %v965_v19 = vmul.f32 %v4589_v35, %v4589_v35  ;;  %v4612_v30 = vmul.f32 0.7978846, %v1342_v28  ;;  %v1345_v29 = vadd.f32 %v1217_v0, %v4531_v14  ;;  %v1346_v9 = vadd.f32 %v1218_v38, %v4557_v63  ;;  %v3090_v51 = vpop.eup %3089  ;;  %v4626_v28 = vpop.f32.mrb[53].mxu1 }
 0x1da   : > { %v4618_v22 = vadd.f32 %v5935_v36, %v3820_v45  ;;  %v1955_v39 = vmul.f32 %v1827_v43, %v5937_v42  ;;  %v1829_v11 = vmul.f32 0.5, %v1701_v37  ;;  %v966_v24 = vmul.f32 %v4604_v20, %v4604_v20  ;;  %5940 = vst [vmem:[#allocation63_spill] sm:$0xff] %v4626_v28  ;;  %v5942_v43 = vld [vmem:[#allocation41_spill] sm:$0xff] }
 0x1db   : > { %5934 = vst [vmem:[#allocation62_spill] sm:$0xff] %v4612_v30  ;;  %3099 = vtanh.f32 %v5938_v26  ;;  %v4628_v0 = vmul.f32 0.7978846, %v1344_v12  ;;  %v4630_v38 = vmul.f32 0.7978846, %v1343_v62  ;;  %v1348_v36 = vadd.f32 %v1220_v7, %v4563_v50  ;;  %v3092_v14 = vpop.eup %3091  ;;  %v5943_v26 = vld [vmem:[#allocation67_spill] sm:$0xff] }
 0x1dc   : > { %5936 = vst [vmem:[#allocation61_spill] sm:$0xff] %v4618_v22  ;;  %v1698_v63 = vadd.f32 1.0, %v3090_v51  ;;  %2223 = vmatprep.mubr.f32.mxu1 %v1955_v39  ;;  %v1957_v37 = vmul.f32 %v1829_v11, %v5942_v43  ;;  %v1219_v42 = vmul.f32 0.044715, %v1091_v32  ;;  %v1093_v54 = vmul.f32 %v965_v19, %v4589_v35  ;;  %v5945_v32 = vld [vmem:[#allocation70_spill] sm:$0xff] }
 0x1dd   : > { %5941 = vst [vmem:[#allocation28_spill] sm:$0xff] %v4628_v0  ;;  %v4637_v30 = vadd.f32 %v5943_v26, %v3822_v46  ;;  %v4639_v8 = vmul.f32 0.7978846, %v1345_v29  ;;  %v1700_v28 = vadd.f32 1.0, %v3092_v14  ;;  %v968_v62 = vmul.f32 %v4618_v22, %v4618_v22  ;;  %v5947_v29 = vld [vmem:[#allocation36_spill] sm:$0xff] }
 0x1de   : > { %v1826_v12 = vmul.f32 0.5, %v1698_v63  ;;  %v3094_v7 = vpop.eup %3093  ;;  %2448 = vmatprep.mubr.f32.mxu0 %v1957_v37  ;;  %v4643_v51 = vmul.f32 0.7978846, %v1346_v9  ;;  %v1094_v39 = vmul.f32 %v966_v24, %v4604_v20  ;;  %v4648_v19 = vadd.f32 %v5945_v32, %v3824_v47  ;;  %v5948_v32 = vld [vmem:[#allocation38_spill] sm:$0xff] }
 0x1df   : > { %3101 = vtanh.f32 %v4348_v25  ;;  %v3096_v11 = vpop.eup %3095  ;;  %v1828_v63 = vmul.f32 0.5, %v1700_v28  ;;  %v1703_v14 = vadd.f32 1.0, %v3094_v7  ;;  %v967_v26 = vmul.f32 %v4637_v30, %v4637_v30  ;;  %v4660_v28 = vpop.f32.mrb[54].mxu0 }
 0x1e0   : > { %5944 = vst [vmem:[#allocation64_spill] sm:$0xff] %v4643_v51  ;;  %5946 = vst [vmem:[#allocation65_spill] sm:$0xff] %v4648_v19  ;;  %v1954_v43 = vmul.f32 %v1826_v12, %v5947_v29  ;;  %v4654_v50 = vmul.f32 0.7978846, %v1348_v36  ;;  %v1347_v9 = vadd.f32 %v1219_v42, %v4580_v4  ;;  %v1221_v37 = vmul.f32 0.044715, %v1093_v54 }
 0x1e1   : > { %v1705_v24 = vadd.f32 1.0, %v3096_v11  ;;  %v1956_v0 = vmul.f32 %v1828_v63, %v5948_v32  ;;  %v1831_v55 = vmul.f32 0.5, %v1703_v14  ;;  %v1096_v25 = vmul.f32 %v968_v62, %v4618_v22  ;;  %5949 = vst [vmem:[#allocation66_spill] sm:$0xff] %v4660_v28  ;;  %v4662_v12 = vpop.f32.mrb[54].mxu1  ;;  %v5951_v42 = vld [vmem:[#allocation44_spill] sm:$0xff] }
 0x1e2   : > { %v3098_v51 = vpop.eup %3097  ;;  %2224 = vmatmul.mubr.f32.gmra.mrb[76].mxu1 %v1954_v43  ;;  %3103 = vtanh.f32 %v4359_v61  ;;  %5950 = vst [vmem:[#allocation40_spill] sm:$0xff] %v4662_v12  ;;  %v1222_v36 = vmul.f32 0.044715, %v1094_v39  ;;  %v969_v54 = vmul.f32 %v4648_v19, %v4648_v19  ;;  %v1095_v43 = vmul.f32 %v967_v26, %v4637_v30  ;;  %v5966_v12 = vld [vmem:[#allocation47_spill] sm:$0xff] }
 0x1e3   : > { %v1833_v7 = vmul.f32 0.5, %v1705_v24  ;;  %v1702_v29 = vadd.f32 1.0, %v3098_v51  ;;  %2449 = vmatmul.mubr.f32.gmra.mrb[76].mxu0 %v1956_v0  ;;  %v1959_v11 = vmul.f32 %v1831_v55, %v5951_v42  ;;  %v4670_v62 = vadd.f32 %v4267_v59, %v3818_v44  ;;  %v5954_v51 = vld [vmem:[#allocation46_spill] sm:$0xff]  ;;  %v4679_v0 = vpop.f32.mrb[55].mxu0  ;;  %v4681_v55 = vpop.f32.mrb[55].mxu1 }
 0x1e4   : > { %v4674_v61 = vadd.f32 %v4274_v48, %v3820_v45  ;;  %v1349_v39 = vadd.f32 %v1221_v37, %v4589_v35  ;;  %3105 = vtanh.f32 %v4279_v60  ;;  %5955 = vst [vmem:[#allocation67_spill] sm:$0xff] %v4679_v0  ;;  %5956 = vst [vmem:[#allocation70_spill] sm:$0xff] %v4681_v55  ;;  %v1224_v26 = vmul.f32 0.044715, %v1096_v25  ;;  %v5957_v37 = vld [vmem:[#allocation42_spill] sm:$0xff] }
 0x1e5   : > { %5952 = vst [vmem:[#allocation68_spill] sm:$0xff] %v4670_v62  ;;  %v3100_v63 = vpop.eup %3099  ;;  %v1961_v14 = vmul.f32 %v1833_v7, %v5954_v51  ;;  %v1830_v24 = vmul.f32 0.5, %v1702_v29  ;;  %2228 = vmatprep.mubr.f32.mxu1 %v1959_v11  ;;  %v970_v32 = vmul.f32 %v4670_v62, %v4670_v62  ;;  %v1097_v7 = vmul.f32 %v969_v54, %v4648_v19 }
 0x1e6   : > { %5953 = vst [vmem:[#allocation41_spill] sm:$0xff] %v4674_v61  ;;  %v1704_v59 = vadd.f32 1.0, %v3100_v63  ;;  %v972_v48 = vmul.f32 %v4674_v61, %v4674_v61  ;;  %3107 = vtanh.f32 %v4284_v53  ;;  %v4692_v60 = vadd.f32 %v4276_v16, %v3822_v46 }
 0x1e7   : > { %2453 = vmatprep.mubr.f32.mxu0 %v1961_v14  ;;  %v1958_v42 = vmul.f32 %v1830_v24, %v5957_v37  ;;  %v4694_v29 = vmul.f32 0.7978846, %v1347_v9  ;;  %v1350_v25 = vadd.f32 %v1222_v36, %v4604_v20  ;;  %v1223_v63 = vmul.f32 0.044715, %v1095_v43  ;;  %v5959_v9 = vld [vmem:[#allocation43_spill] sm:$0xff] }
 0x1e8   : > { %v1832_v11 = vmul.f32 0.5, %v1704_v59  ;;  %v1098_v14 = vmul.f32 %v970_v32, %v4670_v62  ;;  %v4700_v24 = vadd.f32 %v4282_v52, %v3824_v47  ;;  %3109 = vtanh.f32 %v4385_v2  ;;  %v4710_v59 = vpop.f32.mrb[56].mxu0  ;;  %v4717_v2 = vpop.f32.mrb[56].mxu1 }
 0x1e9   : > { %v3102_v51 = vpop.eup %3101  ;;  %2229 = vmatmul.mubr.f32.gmra.mrb[78].mxu1 %v1958_v42  ;;  %v4705_v16 = vadd.f32 %v4287_v15, %v3818_v44  ;;  %v1352_v53 = vadd.f32 %v1224_v26, %v4618_v22  ;;  %v1100_v43 = vmul.f32 %v972_v48, %v4674_v61  ;;  %5960 = vst [vmem:[#allocation38_spill] sm:$0xff] %v4710_v59  ;;  %v4712_v32 = vmul.f32 0.7978846, %v1349_v39  ;;  %v4735_v59 = vpop.f32.mrb[57].mxu1 }
 0x1ea   : > { %v1960_v36 = vmul.f32 %v1832_v11, %v5959_v9  ;;  %v1707_v54 = vadd.f32 1.0, %v3102_v51  ;;  %v1225_v37 = vmul.f32 0.044715, %v1097_v7  ;;  %v971_v52 = vmul.f32 %v4692_v60, %v4692_v60  ;;  %5961 = vst [vmem:[#allocation44_spill] sm:$0xff] %v4717_v2  ;;  %5965 = vst [vmem:[#allocation43_spill] sm:$0xff] %v4735_v59 }
 0x1eb   : > { %5958 = vst [vmem:[#allocation36_spill] sm:$0xff] %v4705_v16  ;;  %3111 = vtanh.f32 %v4390_v34  ;;  %v4719_v42 = vmul.f32 0.7978846, %v1350_v25  ;;  %v973_v48 = vmul.f32 %v4700_v24, %v4700_v24  ;;  %v4725_v39 = vadd.f32 %v4293_v3, %v3820_v45  ;;  %v5963_v25 = vld [vmem:[#allocation54_spill] sm:$0xff] }
 0x1ec   : > { %v3104_v15 = vpop.eup %3103  ;;  %2454 = vmatmul.mubr.f32.gmra.mrb[78].mxu0 %v1960_v36  ;;  %v1835_v26 = vmul.f32 0.5, %v1707_v54  ;;  %v1351_v7 = vadd.f32 %v1223_v63, %v4637_v30  ;;  %v1226_v51 = vmul.f32 0.044715, %v1098_v14  ;;  %v974_v34 = vmul.f32 %v4705_v16, %v4705_v16  ;;  %v4733_v54 = vpop.f32.mrb[57].mxu0 }
 0x1ed   : > { %5962 = vst [vmem:[#allocation46_spill] sm:$0xff] %v4725_v39  ;;  %v1709_v11 = vadd.f32 1.0, %v3104_v15  ;;  %v4730_v9 = vmul.f32 0.7978846, %v1352_v53  ;;  %v1228_v36 = vmul.f32 0.044715, %v1100_v43  ;;  %v1353_v3 = vadd.f32 %v1225_v37, %v4648_v19 }
 0x1ee   : > { %v1963_v2 = vmul.f32 %v1835_v26, %v5963_v25  ;;  %5964 = vst [vmem:[#allocation42_spill] sm:$0xff] %v4733_v54  ;;  %v3106_v55 = vpop.eup %3105  ;;  %v1099_v63 = vmul.f32 %v971_v52, %v4692_v60  ;;  %v976_v14 = vmul.f32 %v4725_v39, %v4725_v39  ;;  %v1101_v53 = vmul.f32 %v973_v48, %v4700_v24  ;;  %v5967_v43 = vld [vmem:[#allocation71_spill] sm:$0xff] }
 0x1ef   : > { %v1837_v0 = vmul.f32 0.5, %v1709_v11  ;;  %v1706_v15 = vadd.f32 1.0, %v3106_v55  ;;  %3113 = vtanh.f32 %v5966_v12  ;;  %v4745_v26 = vadd.f32 %v5967_v43, %v3822_v46  ;;  %v5968_v37 = vld [vmem:[#allocation55_spill] sm:$0xff] }
 0x1f0   : > { %2233 = vmatprep.mubr.f32.mxu1 %v1963_v2  ;;  %v3108_v25 = vpop.eup %3107  ;;  %v4747_v59 = vmul.f32 0.7978846, %v1351_v7  ;;  %v1354_v52 = vadd.f32 %v1226_v51, %v4670_v62  ;;  %v1102_v54 = vmul.f32 %v974_v34, %v4705_v16  ;;  %v1356_v2 = vadd.f32 %v1228_v36, %v4674_v61  ;;  %v5969_v48 = vld [vmem:[#allocation31_spill] sm:$0xff]  ;;  %v5972_v51 = vld [vmem:[#allocation52_spill] sm:$0xff] }
 0x1f1   : > { %v1965_v11 = vmul.f32 %v1837_v0, %v5968_v37  ;;  %v1834_v55 = vmul.f32 0.5, %v1706_v15  ;;  %v1708_v28 = vadd.f32 1.0, %v3108_v25  ;;  %3115 = vtanh.f32 %v5969_v48  ;;  %v5970_v0 = vld [vmem:[#allocation72_spill] sm:$0xff]  ;;  %v5975_v48 = vld [vmem:[#allocation53_spill] sm:$0xff] }
 0x1f2   : > { %v3110_v12 = vpop.eup %3109  ;;  %v1227_v22 = vmul.f32 0.044715, %v1099_v63  ;;  %v1104_v43 = vmul.f32 %v976_v14, %v4725_v39  ;;  %v975_v7 = vmul.f32 %v4745_v26, %v4745_v26  ;;  %v4759_v37 = vadd.f32 %v5970_v0, %v3824_v47  ;;  %v5973_v63 = vld [vmem:[#allocation12_spill] sm:$0xff] }
 0x1f3   : > { %2458 = vmatprep.mubr.f32.mxu0 %v1965_v11  ;;  %v1962_v34 = vmul.f32 %v1834_v55, %v5972_v51  ;;  %v1836_v62 = vmul.f32 0.5, %v1708_v28  ;;  %v1229_v36 = vmul.f32 0.044715, %v1101_v53  ;;  %v1711_v15 = vadd.f32 1.0, %v3110_v12  ;;  %v4771_v53 = vpop.f32.mrb[58].mxu0  ;;  %v4773_v55 = vpop.f32.mrb[58].mxu1 }
 0x1f4   : > { %5971 = vst [vmem:[#allocation54_spill] sm:$0xff] %v4759_v37  ;;  %v1230_v61 = vmul.f32 0.044715, %v1102_v54  ;;  %v977_v11 = vmul.f32 %v4759_v37, %v4759_v37  ;;  %3117 = vtanh.f32 %v4484_v31  ;;  %v4767_v14 = vadd.f32 %v5973_v63, %v3818_v44  ;;  %5976 = vst [vmem:[#allocation71_spill] sm:$0xff] %v4771_v53  ;;  %v5978_v51 = vld [vmem:[#allocation59_spill] sm:$0xff]  ;;  %v5989_v53 = vld [vmem:[#allocation57_spill] sm:$0xff] }
 0x1f5   : > { %v3112_v25 = vpop.eup %3111  ;;  %2234 = vmatmul.mubr.f32.gmra.mrb[80].mxu1 %v1962_v34  ;;  %v1964_v0 = vmul.f32 %v1836_v62, %v5975_v48  ;;  %v1839_v20 = vmul.f32 0.5, %v1711_v15  ;;  %v1103_v28 = vmul.f32 %v975_v7, %v4745_v26  ;;  %5977 = vst [vmem:[#allocation55_spill] sm:$0xff] %v4773_v55  ;;  %v1232_v54 = vmul.f32 0.044715, %v1104_v43  ;;  %v5979_v15 = vld [vmem:[#allocation23_spill] sm:$0xff] }
 0x1f6   : > { %5974 = vst [vmem:[#allocation47_spill] sm:$0xff] %v4767_v14  ;;  %v1713_v19 = vadd.f32 1.0, %v3112_v25  ;;  %v1105_v12 = vmul.f32 %v977_v11, %v4759_v37  ;;  %3119 = vtanh.f32 %v4490_v49  ;;  %v978_v31 = vmul.f32 %v4767_v14, %v4767_v14 }
 0x1f7   : > { %2459 = vmatmul.mubr.f32.gmra.mrb[80].mxu0 %v1964_v0  ;;  %v1967_v34 = vmul.f32 %v1839_v20, %v5978_v51  ;;  %v4782_v25 = vadd.f32 %v5979_v15, %v3820_v45  ;;  %3121 = vtanh.f32 %v4413_v18  ;;  %v4785_v7 = vmul.f32 0.7978846, %v1353_v3  ;;  %v5981_v20 = vld [vmem:[#allocation69_spill] sm:$0xff]  ;;  %v4794_v51 = vpop.f32.mrb[59].mxu0  ;;  %v4796_v18 = vpop.f32.mrb[59].mxu1 }
 0x1f8   : > { %v1841_v62 = vmul.f32 0.5, %v1713_v19  ;;  %v4787_v43 = vmul.f32 0.7978846, %v1354_v52  ;;  %v1355_v11 = vadd.f32 %v1227_v22, %v4692_v60  ;;  %3123 = vtanh.f32 %v4471_v57  ;;  %5982 = vst [vmem:[#allocation72_spill] sm:$0xff] %v4794_v51  ;;  %5983 = vst [vmem:[#allocation52_spill] sm:$0xff] %v4796_v18  ;;  %v5984_v22 = vld [vmem:[#allocation74_spill] sm:$0xff] }
 0x1f9   : > { %5980 = vst [vmem:[#allocation31_spill] sm:$0xff] %v4782_v25  ;;  %v3114_v49 = vpop.eup %3113  ;;  %v1357_v63 = vadd.f32 %v1229_v36, %v4700_v24  ;;  %2238 = vmatprep.mubr.f32.mxu1 %v1967_v34  ;;  %v1358_v48 = vadd.f32 %v1230_v61, %v4705_v16  ;;  %v1231_v0 = vmul.f32 0.044715, %v1103_v28  ;;  %v4798_v3 = vmul.f32 0.7978846, %v1356_v2 }
 0x1fa   : > { %v1969_v19 = vmul.f32 %v1841_v62, %v5981_v20  ;;  %v1710_v52 = vadd.f32 1.0, %v3114_v49  ;;  %v1233_v15 = vmul.f32 0.044715, %v1105_v12  ;;  %v4802_v57 = vadd.f32 %v5984_v22, %v3822_v46  ;;  %v5985_v12 = vld [vmem:[#allocation13_spill] sm:$0xff]  ;;  %v5986_v22 = vld [vmem:[#allocation56_spill] sm:$0xff] }
 0x1fb   : > { %v3116_v55 = vpop.eup %3115  ;;  %v1360_v36 = vadd.f32 %v1232_v54, %v4725_v39  ;;  %v1106_v34 = vmul.f32 %v978_v31, %v4767_v14  ;;  %v980_v61 = vmul.f32 %v4782_v25, %v4782_v25  ;;  %3125 = vtanh.f32 %v4505_v27 }
 0x1fc   : > { %2463 = vmatprep.mubr.f32.mxu0 %v1969_v19  ;;  %v4809_v28 = vmul.f32 0.7978846, %v1355_v11  ;;  %v1838_v2 = vmul.f32 0.5, %v1710_v52  ;;  %v1712_v62 = vadd.f32 1.0, %v3116_v55  ;;  %v4813_v49 = vadd.f32 %v5985_v12, %v3824_v47  ;;  %v4825_v52 = vpop.f32.mrb[60].mxu0  ;;  %v4827_v12 = vpop.f32.mrb[60].mxu1 }
 0x1fd   : > { %v4815_v20 = vmul.f32 0.7978846, %v1357_v63  ;;  %v4817_v19 = vmul.f32 0.7978846, %v1358_v48  ;;  %v1359_v54 = vadd.f32 %v1231_v0, %v4745_v26  ;;  %3127 = vtanh.f32 %v4518_v40  ;;  %5987 = vst [vmem:[#allocation12_spill] sm:$0xff] %v4825_v52  ;;  %5988 = vst [vmem:[#allocation53_spill] sm:$0xff] %v4827_v12 }
 0x1fe   : > { %v3118_v31 = vpop.eup %3117  ;;  %v1966_v18 = vmul.f32 %v1838_v2, %v5986_v22  ;;  %v1840_v27 = vmul.f32 0.5, %v1712_v62  ;;  %v1361_v11 = vadd.f32 %v1233_v15, %v4759_v37  ;;  %v979_v55 = vmul.f32 %v4802_v57, %v4802_v57  ;;  %v5990_v62 = vld [vmem:[#allocation45_spill] sm:$0xff]  ;;  %v4842_v52 = vpop.f32.mrb[61].mxu0 }
 0x1ff   : > { %v4829_v63 = vmul.f32 0.7978846, %v1360_v36  ;;  %v1715_v48 = vadd.f32 1.0, %v3118_v31  ;;  %v1234_v51 = vmul.f32 0.044715, %v1106_v34  ;;  %v1108_v0 = vmul.f32 %v980_v61, %v4782_v25  ;;  %5992 = vst [vmem:[#allocation23_spill] sm:$0xff] %v4842_v52 }
 0x200   : > { %v3120_v40 = vpop.eup %3119  ;;  %2239 = vmatmul.mubr.f32.gmra.mrb[82].mxu1 %v1966_v18  ;;  %v1968_v2 = vmul.f32 %v1840_v27, %v5989_v53  ;;  %v981_v15 = vmul.f32 %v4813_v49, %v4813_v49  ;;  %v4837_v22 = vadd.f32 %v5990_v62, %v3818_v44  ;;  %3129 = vtanh.f32 %v4492_v17  ;;  %v4844_v61 = vpop.f32.mrb[61].mxu1  ;;  %v5994_v62 = vld [vmem:[#allocation34_spill] sm:$0xff] }
 0x201   : > { %v3122_v12 = vpop.eup %3121  ;;  %v4840_v36 = vmul.f32 0.7978846, %v1359_v54  ;;  %v1843_v31 = vmul.f32 0.5, %v1715_v48  ;;  %v1717_v34 = vadd.f32 1.0, %v3120_v40  ;;  %5993 = vst [vmem:[#allocation69_spill] sm:$0xff] %v4844_v61  ;;  %v1107_v39 = vmul.f32 %v979_v55, %v4802_v57 }
 0x202   : > { %5991 = vst [vmem:[#allocation59_spill] sm:$0xff] %v4837_v22  ;;  %v3124_v18 = vpop.eup %3123  ;;  %2464 = vmatmul.mubr.f32.gmra.mrb[82].mxu0 %v1968_v2  ;;  %v4846_v53 = vmul.f32 0.7978846, %v1361_v11  ;;  %v1714_v27 = vadd.f32 1.0, %v3122_v12  ;;  %v4851_v16 = vadd.f32 %v5994_v62, %v3820_v45  ;;  %v1362_v48 = vadd.f32 %v1234_v51, %v4767_v14 }
 0x203   : > { %v1971_v17 = vmul.f32 %v1843_v31, %v4313_v10  ;;  %v1845_v54 = vmul.f32 0.5, %v1717_v34  ;;  %v1716_v40 = vadd.f32 1.0, %v3124_v18  ;;  %v1236_v52 = vmul.f32 0.044715, %v1108_v0  ;;  %v5996_v10 = vld [vmem:[#allocation48_spill] sm:$0xff] }
 0x204   : > { %5995 = vst [vmem:[#allocation74_spill] sm:$0xff] %v4851_v16  ;;  %v1842_v37 = vmul.f32 0.5, %v1714_v27  ;;  %v1109_v61 = vmul.f32 %v981_v15, %v4813_v49  ;;  %v982_v11 = vmul.f32 %v4837_v22, %v4837_v22  ;;  %3131 = vtanh.f32 %v4503_v33  ;;  %v5998_v27 = vld [vmem:[#allocation73_spill] sm:$0xff]  ;;  %v5999_v33 = vld [vmem:[#allocation75_spill] sm:$0xff] }
 0x205   : > { %v3126_v12 = vpop.eup %3125  ;;  %2243 = vmatprep.mubr.f32.mxu1 %v1971_v17  ;;  %v1973_v55 = vmul.f32 %v1845_v54, %v4327_v6  ;;  %v1844_v2 = vmul.f32 0.5, %v1716_v40  ;;  %v4862_v31 = vadd.f32 %v5996_v10, %v3822_v46  ;;  %v1235_v0 = vmul.f32 0.044715, %v1107_v39  ;;  %v4877_v40 = vpop.f32.mrb[62].mxu0 }
 0x206   : > { %v1970_v51 = vmul.f32 %v1842_v37, %v4304_v5  ;;  %v1719_v34 = vadd.f32 1.0, %v3126_v12  ;;  %v984_v15 = vmul.f32 %v4851_v16, %v4851_v16  ;;  %v4872_v17 = vadd.f32 %v5999_v33, %v3824_v47  ;;  %6001 = vst [vmem:[#allocation57_spill] sm:$0xff] %v4877_v40  ;;  %v4879_v12 = vpop.f32.mrb[62].mxu1 }
 0x207   : > { %5997 = vst [vmem:[#allocation13_spill] sm:$0xff] %v4862_v31  ;;  %v3128_v18 = vpop.eup %3127  ;;  %2468 = vmatprep.mubr.f32.mxu0 %v1973_v55  ;;  %v1972_v62 = vmul.f32 %v1844_v2, %v5998_v27  ;;  %v983_v6 = vmul.f32 %v4862_v31, %v4862_v31  ;;  %3133 = vtanh.f32 %v4598_v23  ;;  %v1364_v5 = vadd.f32 %v1236_v52, %v4782_v25  ;;  %v6003_v23 = vld [vmem:[#allocation32_spill] sm:$0xff] }
 0x208   : > { %6000 = vst [vmem:[#allocation56_spill] sm:$0xff] %v4872_v17  ;;  %2244 = vmatmul.mubr.f32.gmra.mrb[84].mxu1 %v1970_v51  ;;  %v1847_v39 = vmul.f32 0.5, %v1719_v34  ;;  %v1721_v37 = vadd.f32 1.0, %v3128_v18  ;;  %v1110_v54 = vmul.f32 %v982_v11, %v4837_v22  ;;  %6002 = vst [vmem:[#allocation45_spill] sm:$0xff] %v4879_v12  ;;  %v1237_v55 = vmul.f32 0.044715, %v1109_v61 }
 0x209   : > { %2469 = vmatmul.mubr.f32.gmra.mrb[84].mxu0 %v1972_v62  ;;  %v985_v2 = vmul.f32 %v4872_v17, %v4872_v17  ;;  %3135 = vtanh.f32 %v4600_v1  ;;  %v4886_v10 = vadd.f32 %v6003_v23, %v3818_v44  ;;  %v1363_v51 = vadd.f32 %v1235_v0, %v4802_v57  ;;  %v6005_v18 = vld [vmem:[#allocation76_spill] sm:$0xff] }
 0x20a   : > { %v3130_v52 = vpop.eup %3129  ;;  %v1975_v11 = vmul.f32 %v1847_v39, %v4355_v13  ;;  %v1849_v34 = vmul.f32 0.5, %v1721_v37  ;;  %v4892_v27 = vadd.f32 %v6005_v18, %v3820_v45  ;;  %v1112_v61 = vmul.f32 %v984_v15, %v4851_v16  ;;  %v6007_v13 = vld [vmem:[#allocation77_spill] sm:$0xff] }
 0x20b   : > { %6004 = vst [vmem:[#allocation34_spill] sm:$0xff] %v4886_v10  ;;  %v1718_v62 = vadd.f32 1.0, %v3130_v52  ;;  %v1111_v33 = vmul.f32 %v983_v6, %v4862_v31  ;;  %v986_v1 = vmul.f32 %v4886_v10, %v4886_v10  ;;  %v1238_v12 = vmul.f32 0.044715, %v1110_v54  ;;  %v4909_v52 = vpop.f32.mrb[63].mxu0 }
 0x20c   : > { %6006 = vst [vmem:[#allocation48_spill] sm:$0xff] %v4892_v27  ;;  %2248 = vmatprep.mubr.f32.mxu1 %v1975_v11  ;;  %v1977_v23 = vmul.f32 %v1849_v34, %v4418_v41  ;;  %3137 = vtanh.f32 %v4533_v56  ;;  %v4902_v0 = vadd.f32 %v6007_v13, %v3822_v46  ;;  %v4904_v39 = vmul.f32 0.7978846, %v1362_v48  ;;  %6009 = vst [vmem:[#allocation75_spill] sm:$0xff] %v4909_v52  ;;  %v4911_v11 = vpop.f32.mrb[63].mxu1  ;;  %v6011_v48 = vld [vmem:[#allocation78_spill] sm:$0xff] }
 0x20d   : > { %v1846_v37 = vmul.f32 0.5, %v1718_v62  ;;  %v1113_v15 = vmul.f32 %v985_v2, %v4872_v17  ;;  %v988_v6 = vmul.f32 %v4892_v27, %v4892_v27  ;;  %6010 = vst [vmem:[#allocation32_spill] sm:$0xff] %v4911_v11  ;;  %v4913_v41 = vmul.f32 0.7978846, %v1364_v5 }
 0x20e   : > { %6008 = vst [vmem:[#allocation73_spill] sm:$0xff] %v4902_v0  ;;  %v1365_v56 = vadd.f32 %v1237_v55, %v4813_v49  ;;  %2473 = vmatprep.mubr.f32.mxu0 %v1977_v23  ;;  %3139 = vtanh.f32 %v4545_v58  ;;  %v4919_v54 = vadd.f32 %v6011_v48, %v3824_v47  ;;  %v3132_v34 = vpop.eup %3131  ;;  %v1240_v2 = vmul.f32 0.044715, %v1112_v61 }
 0x20f   : > { %v1974_v18 = vmul.f32 %v1846_v37, %v4337_v21  ;;  %v1239_v62 = vmul.f32 0.044715, %v1111_v33  ;;  %v1114_v13 = vmul.f32 %v986_v1, %v4886_v10  ;;  %v4923_v52 = vmul.f32 0.7978846, %v1363_v51 }
 0x210   : > { %6012 = vst [vmem:[#allocation76_spill] sm:$0xff] %v4919_v54  ;;  %v1366_v5 = vadd.f32 %v1238_v12, %v4837_v22  ;;  %v1720_v11 = vadd.f32 1.0, %v3132_v34  ;;  %v987_v55 = vmul.f32 %v4902_v0, %v4902_v0  ;;  %v1241_v23 = vmul.f32 0.044715, %v1113_v15  ;;  %v6013_v12 = vld [vmem:[#allocation16_spill] sm:$0xff] }
 0x211   : > { %v3134_v58 = vpop.eup %3133  ;;  %2249 = vmatmul.mubr.f32.gmra.mrb[86].mxu1 %v1974_v18  ;;  %v1116_v48 = vmul.f32 %v988_v6, %v4892_v27  ;;  %v989_v61 = vmul.f32 %v4919_v54, %v4919_v54  ;;  %3141 = vtanh.f32 %v4630_v38  ;;  %v4932_v21 = vmul.f32 0.7978846, %v1365_v56  ;;  %v6015_v6 = vld [vmem:[#allocation33_spill] sm:$0xff] }
 0x212   : > { %v1848_v51 = vmul.f32 0.5, %v1720_v11  ;;  %v1723_v33 = vadd.f32 1.0, %v3134_v58  ;;  %v4936_v1 = vadd.f32 %v6013_v12, %v3818_v44  ;;  %v1368_v34 = vadd.f32 %v1240_v2, %v4851_v16  ;;  %v6016_v2 = vld [vmem:[#allocation35_spill] sm:$0xff] }
 0x213   : > { %v3136_v37 = vpop.eup %3135  ;;  %v1367_v15 = vadd.f32 %v1239_v62, %v4862_v31  ;;  %v1242_v18 = vmul.f32 0.044715, %v1114_v13  ;;  %3143 = vtanh.f32 %v4639_v8  ;;  %v1115_v56 = vmul.f32 %v987_v55, %v4902_v0  ;;  %v6021_v16 = vld [vmem:[#allocation79_spill] sm:$0xff] }
 0x214   : > { %6014 = vst [vmem:[#allocation77_spill] sm:$0xff] %v4936_v1  ;;  %v1976_v40 = vmul.f32 %v1848_v51, %v6015_v6  ;;  %v1851_v22 = vmul.f32 0.5, %v1723_v33  ;;  %v1725_v38 = vadd.f32 1.0, %v3136_v37  ;;  %v4943_v11 = vmul.f32 0.7978846, %v1366_v5  ;;  %v6017_v51 = vld [vmem:[#allocation62_spill] sm:$0xff] }
 0x215   : > { %v1369_v58 = vadd.f32 %v1241_v23, %v4872_v17  ;;  %v1244_v12 = vmul.f32 0.044715, %v1116_v48  ;;  %v1117_v25 = vmul.f32 %v989_v61, %v4919_v54  ;;  %v990_v8 = vmul.f32 %v4936_v1, %v4936_v1  ;;  %v6018_v23 = vld [vmem:[#allocation17_spill] sm:$0xff] }
 0x216   : > { %v3138_v14 = vpop.eup %3137  ;;  %2474 = vmatmul.mubr.f32.gmra.mrb[86].mxu0 %v1976_v40  ;;  %v1979_v62 = vmul.f32 %v1851_v22, %v6016_v2  ;;  %v1853_v13 = vmul.f32 0.5, %v1725_v38  ;;  %3145 = vtanh.f32 %v6017_v51  ;;  %v4951_v33 = vmul.f32 0.7978846, %v1368_v34  ;;  %v6019_v40 = vld [vmem:[#allocation37_spill] sm:$0xff]  ;;  %v6020_v38 = vld [vmem:[#allocation28_spill] sm:$0xff] }
 0x217   : > { %v4953_v55 = vmul.f32 0.7978846, %v1367_v15  ;;  %v1722_v5 = vadd.f32 1.0, %v3138_v14  ;;  %v4957_v48 = vadd.f32 %v6018_v23, %v3820_v45  ;;  %v1370_v22 = vadd.f32 %v1242_v18, %v4886_v10 }
 0x218   : > { %v3140_v61 = vpop.eup %3139  ;;  %2253 = vmatprep.mubr.f32.mxu1 %v1979_v62  ;;  %v1981_v37 = vmul.f32 %v1853_v13, %v6019_v40  ;;  %v1243_v6 = vmul.f32 0.044715, %v1115_v56  ;;  %3147 = vtanh.f32 %v6020_v38  ;;  %v4962_v2 = vmul.f32 0.7978846, %v1369_v58  ;;  %v6022_v56 = vld [vmem:[#allocation49_spill] sm:$0xff] }
 0x219   : > { %v1850_v34 = vmul.f32 0.5, %v1722_v5  ;;  %v1724_v51 = vadd.f32 1.0, %v3140_v61  ;;  %v1245_v15 = vmul.f32 0.044715, %v1117_v25  ;;  %v1372_v14 = vadd.f32 %v1244_v12, %v4892_v27  ;;  %v6023_v5 = vld [vmem:[#allocation14_spill] sm:$0xff] }
 0x21a   : > { %2478 = vmatprep.mubr.f32.mxu0 %v1981_v37  ;;  %v1118_v23 = vmul.f32 %v990_v8, %v4936_v1  ;;  %v4968_v62 = vadd.f32 %v6021_v16, %v3822_v46  ;;  %3149 = vtanh.f32 %v4694_v29  ;;  %v992_v58 = vmul.f32 %v4957_v48, %v4957_v48  ;;  %v6024_v29 = vld [vmem:[#allocation15_spill] sm:$0xff] }
 0x21b   : > { %v3142_v18 = vpop.eup %3141  ;;  %v1978_v13 = vmul.f32 %v1850_v34, %v6022_v56  ;;  %v1852_v40 = vmul.f32 0.5, %v1724_v51  ;;  %3151 = vtanh.f32 %v4712_v32  ;;  %v4975_v25 = vmul.f32 0.7978846, %v1370_v22  ;;  %v6025_v34 = vld [vmem:[#allocation39_spill] sm:$0xff]  ;;  %v6027_v32 = vld [vmem:[#allocation64_spill] sm:$0xff] }
 0x21c   : > { %v1371_v12 = vadd.f32 %v1243_v6, %v4902_v0  ;;  %v1727_v8 = vadd.f32 1.0, %v3142_v18  ;;  %v4980_v16 = vadd.f32 %v6023_v5, %v3824_v47  ;;  %v1373_v38 = vadd.f32 %v1245_v15, %v4919_v54 }
 0x21d   : > { %v3144_v61 = vpop.eup %3143  ;;  %2254 = vmatmul.mubr.f32.gmra.mrb[88].mxu1 %v1978_v13  ;;  %v1980_v37 = vmul.f32 %v1852_v40, %v6024_v29  ;;  %v4986_v51 = vadd.f32 %v6025_v34, %v3818_v44  ;;  %3153 = vtanh.f32 %v6027_v32  ;;  %v1246_v6 = vmul.f32 0.044715, %v1118_v23  ;;  %v6028_v40 = vld [vmem:[#allocation50_spill] sm:$0xff]  ;;  %v6030_v34 = vld [vmem:[#allocation25_spill] sm:$0xff] }
 0x21e   : > { %v1855_v22 = vmul.f32 0.5, %v1727_v8  ;;  %v1729_v56 = vadd.f32 1.0, %v3144_v61  ;;  %v991_v18 = vmul.f32 %v4968_v62, %v4968_v62  ;;  %v4991_v5 = vmul.f32 0.7978846, %v1372_v14 }
 0x21f   : > { %6026 = vst [vmem:[#allocation78_spill] sm:$0xff] %v4986_v51  ;;  %2479 = vmatmul.mubr.f32.gmra.mrb[88].mxu0 %v1980_v37  ;;  %v1120_v13 = vmul.f32 %v992_v58, %v4957_v48  ;;  %v4996_v15 = vadd.f32 %v6028_v40, %v3820_v45  ;;  %3155 = vtanh.f32 %v4654_v50  ;;  %v993_v23 = vmul.f32 %v4980_v16, %v4980_v16  ;;  %v6031_v40 = vld [vmem:[#allocation26_spill] sm:$0xff] }
 0x220   : > { %v3146_v29 = vpop.eup %3145  ;;  %v1983_v32 = vmul.f32 %v1855_v22, %v6030_v34  ;;  %v1857_v8 = vmul.f32 0.5, %v1729_v56  ;;  %v994_v14 = vmul.f32 %v4986_v51, %v4986_v51  ;;  %v5004_v61 = vmul.f32 0.7978846, %v1371_v12  ;;  %v6032_v12 = vld [vmem:[#allocation20_spill] sm:$0xff] }
 0x221   : > { %6029 = vst [vmem:[#allocation16_spill] sm:$0xff] %v4996_v15  ;;  %v5006_v37 = vmul.f32 0.7978846, %v1373_v38  ;;  %v1726_v58 = vadd.f32 1.0, %v3146_v29  ;;  %v1374_v50 = vadd.f32 %v1246_v6, %v4936_v1  ;;  %v1119_v22 = vmul.f32 %v991_v18, %v4968_v62  ;;  %v6034_v1 = vld [vmem:[#allocation80_spill] sm:$0xff] }
 0x222   : > { %v3148_v27 = vpop.eup %3147  ;;  %2258 = vmatprep.mubr.f32.mxu1 %v1983_v32  ;;  %v1985_v10 = vmul.f32 %v1857_v8, %v6031_v40  ;;  %3157 = vtanh.f32 %v4747_v59  ;;  %v996_v54 = vmul.f32 %v4996_v15, %v4996_v15  ;;  %v5016_v38 = vadd.f32 %v6032_v12, %v3822_v46  ;;  %v6033_v59 = vld [vmem:[#allocation84_spill] sm:$0xff] }
 0x223   : > { %v1854_v56 = vmul.f32 0.5, %v1726_v58  ;;  %v1728_v34 = vadd.f32 1.0, %v3148_v27  ;;  %v1248_v32 = vmul.f32 0.044715, %v1120_v13  ;;  %v1121_v8 = vmul.f32 %v993_v23, %v4980_v16  ;;  %v6037_v23 = vld [vmem:[#allocation85_spill] sm:$0xff] }
 0x224   : > { %v3150_v29 = vpop.eup %3149  ;;  %2483 = vmatprep.mubr.f32.mxu0 %v1985_v10  ;;  %v1122_v6 = vmul.f32 %v994_v14, %v4986_v51  ;;  %3159 = vtanh.f32 %v4785_v7  ;;  %v5024_v0 = vadd.f32 %v6034_v1, %v3824_v47  ;;  %v5026_v12 = vmul.f32 0.7978846, %v1374_v50  ;;  %v6038_v1 = vld [vmem:[#allocation21_spill] sm:$0xff] }
 0x225   : > { %v3152_v18 = vpop.eup %3151  ;;  %v1982_v58 = vmul.f32 %v1854_v56, %v6033_v59  ;;  %v1856_v27 = vmul.f32 0.5, %v1728_v34  ;;  %v1731_v40 = vadd.f32 1.0, %v3150_v29  ;;  %v1247_v17 = vmul.f32 0.044715, %v1119_v22 }
 0x226   : > { %6035 = vst [vmem:[#allocation33_spill] sm:$0xff] %v5024_v0  ;;  %6036 = vst [vmem:[#allocation35_spill] sm:$0xff] %v5026_v12  ;;  %v1733_v10 = vadd.f32 1.0, %v3152_v18  ;;  %v1124_v7 = vmul.f32 %v996_v54, %v4996_v15  ;;  %v995_v56 = vmul.f32 %v5016_v38, %v5016_v38  ;;  %v1376_v34 = vadd.f32 %v1248_v32, %v4957_v48  ;;  %v6040_v32 = vld [vmem:[#allocation18_spill] sm:$0xff] }
 0x227   : > { %v3154_v13 = vpop.eup %3153  ;;  %2259 = vmatmul.mubr.f32.gmra.mrb[90].mxu1 %v1982_v58  ;;  %v1984_v31 = vmul.f32 %v1856_v27, %v6037_v23  ;;  %v1859_v14 = vmul.f32 0.5, %v1731_v40  ;;  %v5035_v50 = vadd.f32 %v6038_v1, %v3818_v44  ;;  %v1249_v18 = vmul.f32 0.044715, %v1121_v8  ;;  %v6042_v8 = vld [vmem:[#allocation22_spill] sm:$0xff] }
 0x228   : > { %v1861_v29 = vmul.f32 0.5, %v1733_v10  ;;  %v1730_v59 = vadd.f32 1.0, %v3154_v13  ;;  %v1250_v27 = vmul.f32 0.044715, %v1122_v6  ;;  %v997_v54 = vmul.f32 %v5024_v0, %v5024_v0 }
 0x229   : > { %6039 = vst [vmem:[#allocation62_spill] sm:$0xff] %v5035_v50  ;;  %v3156_v22 = vpop.eup %3155  ;;  %2484 = vmatmul.mubr.f32.gmra.mrb[90].mxu0 %v1984_v31  ;;  %v1987_v58 = vmul.f32 %v1859_v14, %v4580_v4  ;;  %v5043_v10 = vadd.f32 %v6040_v32, %v3820_v45  ;;  %v1375_v13 = vadd.f32 %v1247_v17, %v4968_v62  ;;  %v1252_v1 = vmul.f32 0.044715, %v1124_v7  ;;  %v6043_v7 = vld [vmem:[#allocation81_spill] sm:$0xff] }
 0x22a   : > { %v1989_v40 = vmul.f32 %v1861_v29, %v4589_v35  ;;  %v1858_v23 = vmul.f32 0.5, %v1730_v59  ;;  %v1732_v12 = vadd.f32 1.0, %v3156_v22  ;;  %v1123_v31 = vmul.f32 %v995_v56, %v5016_v38 }
 0x22b   : > { %6041 = vst [vmem:[#allocation17_spill] sm:$0xff] %v5043_v10  ;;  %2263 = vmatprep.mubr.f32.mxu1 %v1987_v58  ;;  %3161 = vtanh.f32 %v4719_v42  ;;  %v998_v35 = vmul.f32 %v5035_v50, %v5035_v50  ;;  %v1125_v29 = vmul.f32 %v997_v54, %v5024_v0  ;;  %v1000_v17 = vmul.f32 %v5043_v10, %v5043_v10  ;;  %v6045_v58 = vld [vmem:[#allocation24_spill] sm:$0xff] }
 0x22c   : > { %v3158_v4 = vpop.eup %3157  ;;  %2488 = vmatprep.mubr.f32.mxu0 %v1989_v40  ;;  %v1986_v6 = vmul.f32 %v1858_v23, %v6042_v8  ;;  %v1860_v14 = vmul.f32 0.5, %v1732_v12  ;;  %3163 = vtanh.f32 %v4730_v9  ;;  %v5057_v56 = vadd.f32 %v6043_v7, %v3822_v46  ;;  %v6046_v9 = vld [vmem:[#allocation82_spill] sm:$0xff] }
 0x22d   : > { %v1735_v59 = vadd.f32 1.0, %v3158_v4  ;;  %v1377_v22 = vadd.f32 %v1249_v18, %v4980_v16  ;;  %v1378_v12 = vadd.f32 %v1250_v27, %v4986_v51  ;;  %v5064_v23 = vadd.f32 %v6046_v9, %v3824_v47 }
 0x22e   : > { %6044 = vst [vmem:[#allocation37_spill] sm:$0xff] %v5057_v56  ;;  %v3160_v42 = vpop.eup %3159  ;;  %2264 = vmatmul.mubr.f32.gmra.mrb[92].mxu1 %v1986_v6  ;;  %v1988_v40 = vmul.f32 %v1860_v14, %v6045_v58  ;;  %v1251_v54 = vmul.f32 0.044715, %v1123_v31  ;;  %3165 = vtanh.f32 %v4809_v28  ;;  %v1380_v8 = vadd.f32 %v1252_v1, %v4996_v15  ;;  %v6048_v1 = vld [vmem:[#allocation19_spill] sm:$0xff] }
 0x22f   : > { %6047 = vst [vmem:[#allocation28_spill] sm:$0xff] %v5064_v23  ;;  %v1863_v32 = vmul.f32 0.5, %v1735_v59  ;;  %v1737_v4 = vadd.f32 1.0, %v3160_v42  ;;  %v1126_v7 = vmul.f32 %v998_v35, %v5035_v50  ;;  %v999_v18 = vmul.f32 %v5057_v56, %v5057_v56 }
 0x230   : > { %2489 = vmatmul.mubr.f32.gmra.mrb[92].mxu0 %v1988_v40  ;;  %3167 = vtanh.f32 %v4815_v20  ;;  %v1253_v27 = vmul.f32 0.044715, %v1125_v29  ;;  %v1128_v31 = vmul.f32 %v1000_v17, %v5043_v10  ;;  %v5074_v59 = vmul.f32 0.7978846, %v1376_v34  ;;  %v6051_v17 = vld [vmem:[#allocation83_spill] sm:$0xff] }
 0x231   : > { %v1991_v6 = vmul.f32 %v1863_v32, %v4637_v30  ;;  %v1865_v14 = vmul.f32 0.5, %v1737_v4  ;;  %v5076_v42 = vmul.f32 0.7978846, %v1375_v13  ;;  %v1001_v28 = vmul.f32 %v5064_v23, %v5064_v23  ;;  %v6050_v30 = vld [vmem:[#allocation65_spill] sm:$0xff] }
 0x232   : > { %v5082_v35 = vadd.f32 %v6048_v1, %v3818_v44  ;;  %v5084_v58 = vmul.f32 0.7978846, %v1377_v22  ;;  %v1379_v20 = vadd.f32 %v1251_v54, %v5016_v38  ;;  %3169 = vtanh.f32 %v4787_v43 }
 0x233   : > { %2268 = vmatprep.mubr.f32.mxu1 %v1991_v6  ;;  %v1993_v29 = vmul.f32 %v1865_v14, %v6050_v30  ;;  %v1254_v34 = vmul.f32 0.044715, %v1126_v7  ;;  %v1127_v13 = vmul.f32 %v999_v18, %v5057_v56  ;;  %v5092_v40 = vadd.f32 %v6051_v17, %v3820_v45 }
 0x234   : > { %6049 = vst [vmem:[#allocation79_spill] sm:$0xff] %v5082_v35  ;;  %3171 = vtanh.f32 %v4798_v3  ;;  %v5095_v32 = vmul.f32 0.7978846, %v1378_v12  ;;  %v5097_v22 = vmul.f32 0.7978846, %v1380_v8  ;;  %v1381_v54 = vadd.f32 %v1253_v27, %v5024_v0  ;;  %v6053_v12 = vld [vmem:[#allocation86_spill] sm:$0xff] }
 0x235   : > { %6052 = vst [vmem:[#allocation49_spill] sm:$0xff] %v5092_v40  ;;  %v3162_v9 = vpop.eup %3161  ;;  %2493 = vmatprep.mubr.f32.mxu0 %v1993_v29  ;;  %v1256_v4 = vmul.f32 0.044715, %v1128_v31  ;;  %v1129_v7 = vmul.f32 %v1001_v28, %v5064_v23  ;;  %v1002_v18 = vmul.f32 %v5082_v35, %v5082_v35  ;;  %3173 = vtanh.f32 %v4840_v36  ;;  %v6055_v27 = vld [vmem:[#allocation87_spill] sm:$0xff] }
 0x236   : > { %v3164_v6 = vpop.eup %3163  ;;  %v1734_v43 = vadd.f32 1.0, %v3162_v9  ;;  %v5104_v14 = vmul.f32 0.7978846, %v1379_v20  ;;  %v5108_v8 = vadd.f32 %v6053_v12, %v3822_v46  ;;  %v5112_v1 = vadd.f32 %v6055_v27, %v3824_v47  ;;  %v6057_v12 = vld [vmem:[#allocation51_spill] sm:$0xff] }
 0x237   : > { %v1736_v3 = vadd.f32 1.0, %v3164_v6  ;;  %v1382_v31 = vadd.f32 %v1254_v34, %v5035_v50  ;;  %v1255_v28 = vmul.f32 0.044715, %v1127_v13  ;;  %v1004_v29 = vmul.f32 %v5092_v40, %v5092_v40 }
 0x238   : > { %6054 = vst [vmem:[#allocation14_spill] sm:$0xff] %v5108_v8  ;;  %6056 = vst [vmem:[#allocation15_spill] sm:$0xff] %v5112_v1  ;;  %v1862_v30 = vmul.f32 0.5, %v1734_v43  ;;  %v3166_v17 = vpop.eup %3165  ;;  %v5117_v36 = vmul.f32 0.7978846, %v1381_v54  ;;  %v1384_v20 = vadd.f32 %v1256_v4, %v5043_v10  ;;  %3175 = vtanh.f32 %v4846_v53  ;;  %v6058_v43 = vld [vmem:[#allocation61_spill] sm:$0xff] }
 0x239   : > { %v1864_v9 = vmul.f32 0.5, %v1736_v3  ;;  %v1257_v27 = vmul.f32 0.044715, %v1129_v7  ;;  %v1739_v51 = vadd.f32 1.0, %v3166_v17  ;;  %v1130_v34 = vmul.f32 %v1002_v18, %v5082_v35 }
 0x23a   : > { %v3168_v6 = vpop.eup %3167  ;;  %v1990_v15 = vmul.f32 %v1862_v30, %v6057_v12  ;;  %v1003_v0 = vmul.f32 %v5108_v8, %v5108_v8  ;;  %v1005_v54 = vmul.f32 %v5112_v1, %v5112_v1  ;;  %v5128_v4 = vmul.f32 0.7978846, %v1382_v31 }
 0x23b   : > { %v1992_v13 = vmul.f32 %v1864_v9, %v6058_v43  ;;  %v1741_v50 = vadd.f32 1.0, %v3168_v6  ;;  %v1383_v53 = vadd.f32 %v1255_v28, %v5057_v56  ;;  %v1867_v3 = vmul.f32 0.5, %v1739_v51  ;;  %v6059_v9 = vld [vmem:[#allocation88_spill] sm:$0xff] }
 0x23c   : > { %2269 = vmatmul.mubr.f32.gmra.mrb[94].mxu1 %v1990_v15  ;;  %v1132_v7 = vmul.f32 %v1004_v29, %v5092_v40  ;;  %v3170_v30 = vpop.eup %3169  ;;  %v5132_v17 = vmul.f32 0.7978846, %v1384_v20  ;;  %v5136_v6 = vadd.f32 %v6059_v9, %v3818_v44  ;;  %3177 = vtanh.f32 %v4817_v19 }
 0x23d   : > { %2494 = vmatmul.mubr.f32.gmra.mrb[94].mxu0 %v1992_v13  ;;  %v1869_v18 = vmul.f32 0.5, %v1741_v50  ;;  %v1385_v31 = vadd.f32 %v1257_v27, %v5064_v23  ;;  %v1995_v15 = vmul.f32 %v1867_v3, %v4692_v60  ;;  %v1258_v28 = vmul.f32 0.044715, %v1130_v34 }
 0x23e   : > { %6060 = vst [vmem:[#allocation39_spill] sm:$0xff] %v5136_v6  ;;  %v3172_v12 = vpop.eup %3171  ;;  %v1738_v51 = vadd.f32 1.0, %v3170_v30  ;;  %v1131_v20 = vmul.f32 %v1003_v0, %v5108_v8  ;;  %v1133_v50 = vmul.f32 %v1005_v54, %v5112_v1  ;;  %v5144_v10 = vmul.f32 0.7978846, %v1383_v53  ;;  %v6063_v54 = vld [vmem:[#allocation68_spill] sm:$0xff]  ;;  %v6064_v30 = vld [vmem:[#allocation58_spill] sm:$0xff] }
 0x23f   : > { %v1997_v29 = vmul.f32 %v1869_v18, %v4700_v24  ;;  %v1740_v43 = vadd.f32 1.0, %v3172_v12  ;;  %v3174_v13 = vpop.eup %3173  ;;  %2273 = vmatprep.mubr.f32.mxu1 %v1995_v15  ;;  %v1260_v9 = vmul.f32 0.044715, %v1132_v7  ;;  %3179 = vtanh.f32 %v4829_v63  ;;  %v6061_v24 = vld [vmem:[#allocation89_spill] sm:$0xff] }
 0x240   : > { %v1866_v19 = vmul.f32 0.5, %v1738_v51  ;;  %v1743_v60 = vadd.f32 1.0, %v3174_v13  ;;  %v1006_v34 = vmul.f32 %v5136_v6, %v5136_v6  ;;  %v5151_v3 = vadd.f32 %v6061_v24, %v3820_v45  ;;  %v6066_v18 = vld [vmem:[#allocation41_spill] sm:$0xff] }
 0x241   : > { %2498 = vmatprep.mubr.f32.mxu0 %v1997_v29  ;;  %v1868_v27 = vmul.f32 0.5, %v1740_v43  ;;  %v1386_v0 = vadd.f32 %v1258_v28, %v5082_v35  ;;  %v5157_v7 = vadd.f32 %v6064_v30, %v3822_v46  ;;  %3181 = vtanh.f32 %v4923_v52  ;;  %v6067_v28 = vld [vmem:[#allocation29_spill] sm:$0xff]  ;;  %v6071_v30 = vld [vmem:[#allocation30_spill] sm:$0xff] }
 0x242   : > { %6062 = vst [vmem:[#allocation64_spill] sm:$0xff] %v5151_v3  ;;  %v1994_v53 = vmul.f32 %v1866_v19, %v6063_v54  ;;  %v3176_v63 = vpop.eup %3175  ;;  %v1259_v15 = vmul.f32 0.044715, %v1131_v20  ;;  %v1261_v51 = vmul.f32 0.044715, %v1133_v50  ;;  %v1871_v29 = vmul.f32 0.5, %v1743_v60 }
 0x243   : > { %6065 = vst [vmem:[#allocation50_spill] sm:$0xff] %v5157_v7  ;;  %v1996_v12 = vmul.f32 %v1868_v27, %v6066_v18  ;;  %v5161_v43 = vmul.f32 0.7978846, %v1385_v31  ;;  %v1745_v13 = vadd.f32 1.0, %v3176_v63  ;;  %v5165_v24 = vadd.f32 %v6067_v28, %v3824_v47  ;;  %v6069_v50 = vld [vmem:[#allocation60_spill] sm:$0xff] }
 0x244   : > { %2274 = vmatmul.mubr.f32.gmra.mrb[96].mxu1 %v1994_v53  ;;  %3183 = vtanh.f32 %v4932_v21  ;;  %v1999_v19 = vmul.f32 %v1871_v29, %v4745_v26  ;;  %v1134_v52 = vmul.f32 %v1006_v34, %v5136_v6  ;;  %v1008_v20 = vmul.f32 %v5151_v3, %v5151_v3 }
 0x245   : > { %6068 = vst [vmem:[#allocation25_spill] sm:$0xff] %v5165_v24  ;;  %2499 = vmatmul.mubr.f32.gmra.mrb[96].mxu0 %v1996_v12  ;;  %v5174_v31 = vadd.f32 %v6069_v50, %v3818_v44  ;;  %v5176_v27 = vmul.f32 0.7978846, %v1386_v0  ;;  %v1388_v60 = vadd.f32 %v1260_v9, %v5092_v40  ;;  %v1873_v54 = vmul.f32 0.5, %v1745_v13  ;;  %v6073_v0 = vld [vmem:[#allocation54_spill] sm:$0xff]  ;;  %v6078_v40 = vld [vmem:[#allocation36_spill] sm:$0xff] }
 0x246   : > { %v1007_v21 = vmul.f32 %v5157_v7, %v5157_v7  ;;  %v3178_v53 = vpop.eup %3177  ;;  %v1387_v26 = vadd.f32 %v1259_v15, %v5108_v8  ;;  %v1389_v34 = vadd.f32 %v1261_v51, %v5112_v1  ;;  %2278 = vmatprep.mubr.f32.mxu1 %v1999_v19  ;;  %v5185_v63 = vadd.f32 %v6071_v30, %v3820_v45  ;;  %v6074_v51 = vld [vmem:[#allocation27_spill] sm:$0xff] }
 0x247   : > { %6070 = vst [vmem:[#allocation26_spill] sm:$0xff] %v5174_v31  ;;  %3185 = vtanh.f32 %v4904_v39  ;;  %v2001_v18 = vmul.f32 %v1873_v54, %v6073_v0  ;;  %v1742_v12 = vadd.f32 1.0, %v3178_v53  ;;  %v1009_v9 = vmul.f32 %v5165_v24, %v5165_v24  ;;  %v6076_v53 = vld [vmem:[#allocation63_spill] sm:$0xff] }
 0x248   : > { %6072 = vst [vmem:[#allocation20_spill] sm:$0xff] %v5185_v63  ;;  %v1010_v29 = vmul.f32 %v5174_v31, %v5174_v31  ;;  %v1262_v13 = vmul.f32 0.044715, %v1134_v52  ;;  %v1136_v15 = vmul.f32 %v1008_v20, %v5151_v3  ;;  %3187 = vtanh.f32 %v4913_v41 }
 0x249   : > { %v5197_v28 = vadd.f32 %v6074_v51, %v3822_v46  ;;  %v3180_v19 = vpop.eup %3179  ;;  %v5199_v39 = vmul.f32 0.7978846, %v1388_v60  ;;  %2503 = vmatprep.mubr.f32.mxu0 %v2001_v18  ;;  %v1870_v50 = vmul.f32 0.5, %v1742_v12  ;;  %v1135_v54 = vmul.f32 %v1007_v21, %v5157_v7 }
 0x24a   : > { %v5204_v30 = vadd.f32 %v6076_v53, %v3824_v47  ;;  %v5206_v52 = vmul.f32 0.7978846, %v1387_v26  ;;  %v5208_v20 = vmul.f32 0.7978846, %v1389_v34  ;;  %v1744_v41 = vadd.f32 1.0, %v3180_v19 }
 0x24b   : > { %6075 = vst [vmem:[#allocation84_spill] sm:$0xff] %v5197_v28  ;;  %v1012_v0 = vmul.f32 %v5185_v63, %v5185_v63  ;;  %v3182_v51 = vpop.eup %3181  ;;  %v1998_v60 = vmul.f32 %v1870_v50, %v6078_v40  ;;  %v1137_v18 = vmul.f32 %v1009_v9, %v5165_v24  ;;  %v1138_v12 = vmul.f32 %v1010_v29, %v5174_v31  ;;  %v6079_v40 = vld [vmem:[#allocation66_spill] sm:$0xff] }
 0x24c   : > { %6077 = vst [vmem:[#allocation80_spill] sm:$0xff] %v5204_v30  ;;  %v1011_v21 = vmul.f32 %v5197_v28, %v5197_v28  ;;  %v1390_v53 = vadd.f32 %v1262_v13, %v5136_v6  ;;  %v1264_v26 = vmul.f32 0.044715, %v1136_v15  ;;  %v1872_v35 = vmul.f32 0.5, %v1744_v41  ;;  %v6081_v29 = vld [vmem:[#allocation46_spill] sm:$0xff] }
 0x24d   : > { %v1747_v34 = vadd.f32 1.0, %v3182_v51  ;;  %2279 = vmatmul.mubr.f32.gmra.mrb[98].mxu1 %v1998_v60  ;;  %v1263_v19 = vmul.f32 0.044715, %v1135_v54  ;;  %v1013_v8 = vmul.f32 %v5204_v30, %v5204_v30  ;;  %3189 = vtanh.f32 %v4953_v55 }
 0x24e   : > { %v3184_v1 = vpop.eup %3183  ;;  %v5223_v9 = vadd.f32 %v6079_v40, %v3818_v44  ;;  %v2000_v50 = vmul.f32 %v1872_v35, %v6081_v29  ;;  %v1140_v13 = vmul.f32 %v1012_v0, %v5185_v63  ;;  %v1265_v15 = vmul.f32 0.044715, %v1137_v18  ;;  %v6082_v35 = vld [vmem:[#allocation40_spill] sm:$0xff] }
 0x24f   : > { %v1875_v23 = vmul.f32 0.5, %v1747_v34  ;;  %v1749_v56 = vadd.f32 1.0, %v3184_v1  ;;  %v1266_v41 = vmul.f32 0.044715, %v1138_v12  ;;  %v1139_v51 = vmul.f32 %v1011_v21, %v5197_v28 }
 0x250   : > { %6080 = vst [vmem:[#allocation85_spill] sm:$0xff] %v5223_v9  ;;  %3191 = vtanh.f32 %v4962_v2  ;;  %2504 = vmatmul.mubr.f32.gmra.mrb[98].mxu0 %v2000_v50  ;;  %v1014_v40 = vmul.f32 %v5223_v9, %v5223_v9  ;;  %v5234_v34 = vadd.f32 %v6082_v35, %v3820_v45  ;;  %v1392_v1 = vadd.f32 %v1264_v26, %v5151_v3  ;;  %v6085_v35 = vld [vmem:[#allocation67_spill] sm:$0xff] }
 0x251   : > { %v3186_v54 = vpop.eup %3185  ;;  %v2003_v55 = vmul.f32 %v1875_v23, %v4802_v57  ;;  %v1877_v60 = vmul.f32 0.5, %v1749_v56  ;;  %v1141_v18 = vmul.f32 %v1013_v8, %v5204_v30  ;;  %3193 = vtanh.f32 %v4943_v11 }
 0x252   : > { %6083 = vst [vmem:[#allocation21_spill] sm:$0xff] %v5234_v34  ;;  %v1746_v0 = vadd.f32 1.0, %v3186_v54  ;;  %v3188_v2 = vpop.eup %3187  ;;  %v1268_v57 = vmul.f32 0.044715, %v1140_v13  ;;  %v1142_v56 = vmul.f32 %v1014_v40, %v5223_v9  ;;  %3195 = vtanh.f32 %v4951_v33  ;;  %v6084_v13 = vld [vmem:[#allocation47_spill] sm:$0xff] }
 0x253   : > { %2283 = vmatprep.mubr.f32.mxu1 %v2003_v55  ;;  %v2005_v12 = vmul.f32 %v1877_v60, %v4813_v49  ;;  %v5242_v23 = vmul.f32 0.7978846, %v1390_v53  ;;  %v1748_v29 = vadd.f32 1.0, %v3188_v2  ;;  %v1016_v26 = vmul.f32 %v5234_v34, %v5234_v34  ;;  %v6087_v2 = vld [vmem:[#allocation70_spill] sm:$0xff] }
 0x254   : > { %v1874_v21 = vmul.f32 0.5, %v1746_v0  ;;  %v1391_v8 = vadd.f32 %v1263_v19, %v5157_v7  ;;  %v1393_v11 = vadd.f32 %v1265_v15, %v5165_v24  ;;  %v1394_v50 = vadd.f32 %v1266_v41, %v5174_v31  ;;  %v6086_v0 = vld [vmem:[#allocation31_spill] sm:$0xff]  ;;  %v6103_v24 = vld [vmem:[#allocation34_spill] sm:$0xff] }
 0x255   : > { %2508 = vmatprep.mubr.f32.mxu0 %v2005_v12  ;;  %v1267_v49 = vmul.f32 0.044715, %v1139_v51  ;;  %v1876_v55 = vmul.f32 0.5, %v1748_v29  ;;  %v1269_v60 = vmul.f32 0.044715, %v1141_v18  ;;  %3197 = vtanh.f32 %v5004_v61 }
 0x256   : > { %v2002_v54 = vmul.f32 %v1874_v21, %v6084_v13  ;;  %v5251_v33 = vmul.f32 0.7978846, %v1392_v1  ;;  %v1396_v53 = vadd.f32 %v1268_v57, %v5185_v63  ;;  %v1270_v40 = vmul.f32 0.044715, %v1142_v56  ;;  %v6088_v57 = vld [vmem:[#allocation38_spill] sm:$0xff] }
 0x257   : > { %v5256_v19 = vadd.f32 %v6085_v35, %v3822_v46  ;;  %v3190_v15 = vpop.eup %3189  ;;  %v2004_v41 = vmul.f32 %v1876_v55, %v6086_v0  ;;  %v1144_v51 = vmul.f32 %v1016_v26, %v5234_v34  ;;  %v5262_v18 = vadd.f32 %v6087_v2, %v3824_v47 }
 0x258   : > { %2284 = vmatmul.mubr.f32.gmra.mrb[100].mxu1 %v2002_v54  ;;  %3199 = vtanh.f32 %v5006_v37  ;;  %v5265_v61 = vmul.f32 0.7978846, %v1391_v8  ;;  %v5267_v1 = vmul.f32 0.7978846, %v1393_v11  ;;  %v1751_v12 = vadd.f32 1.0, %v3190_v15 }
 0x259   : > { %v5271_v56 = vadd.f32 %v6088_v57, %v3818_v44  ;;  %v5273_v29 = vmul.f32 0.7978846, %v1394_v50  ;;  %2509 = vmatmul.mubr.f32.gmra.mrb[100].mxu0 %v2004_v41  ;;  %v1395_v26 = vadd.f32 %v1267_v49, %v5197_v28  ;;  %v1397_v13 = vadd.f32 %v1269_v60, %v5204_v30  ;;  %v6089_v60 = vld [vmem:[#allocation13_spill] sm:$0xff] }
 0x25a   : > { %v3192_v21 = vpop.eup %3191  ;;  %3201 = vtanh.f32 %v4975_v25  ;;  %v5278_v37 = vmul.f32 0.7978846, %v1396_v53  ;;  %v1879_v8 = vmul.f32 0.5, %v1751_v12  ;;  %v1015_v54 = vmul.f32 %v5256_v19, %v5256_v19 }
 0x25b   : > { %v1753_v11 = vadd.f32 1.0, %v3192_v21  ;;  %v3194_v55 = vpop.eup %3193  ;;  %v1398_v35 = vadd.f32 %v1270_v40, %v5223_v9  ;;  %v1272_v15 = vmul.f32 0.044715, %v1144_v51  ;;  %v1017_v50 = vmul.f32 %v5262_v18, %v5262_v18  ;;  %v6090_v40 = vld [vmem:[#allocation56_spill] sm:$0xff] }
 0x25c   : > { %3203 = vtanh.f32 %v4991_v5  ;;  %v3196_v49 = vpop.eup %3195  ;;  %v2007_v0 = vmul.f32 %v1879_v8, %v6089_v60  ;;  %v1750_v53 = vadd.f32 1.0, %v3194_v55  ;;  %v1018_v41 = vmul.f32 %v5271_v56, %v5271_v56  ;;  %v6091_v5 = vld [vmem:[#allocation44_spill] sm:$0xff] }
 0x25d   : > { %v1881_v25 = vmul.f32 0.5, %v1753_v11  ;;  %v5289_v2 = vmul.f32 0.7978846, %v1395_v26  ;;  %v5291_v12 = vmul.f32 0.7978846, %v1397_v13  ;;  %v1752_v57 = vadd.f32 1.0, %v3196_v49 }
 0x25e   : > { %2288 = vmatprep.mubr.f32.mxu1 %v2007_v0  ;;  %v1878_v21 = vmul.f32 0.5, %v1750_v53  ;;  %v1143_v9 = vmul.f32 %v1015_v54, %v5256_v19  ;;  %v5297_v63 = vadd.f32 %v6091_v5, %v3820_v45  ;;  %v5299_v11 = vmul.f32 0.7978846, %v1398_v35  ;;  %v6092_v13 = vld [vmem:[#allocation42_spill] sm:$0xff]  ;;  %v6093_v0 = vld [vmem:[#allocation59_spill] sm:$0xff] }
 0x25f   : > { %v2009_v51 = vmul.f32 %v1881_v25, %v6090_v40  ;;  %v3198_v8 = vpop.eup %3197  ;;  %v1880_v55 = vmul.f32 0.5, %v1752_v57  ;;  %v1145_v26 = vmul.f32 %v1017_v50, %v5262_v18  ;;  %v5304_v60 = vadd.f32 %v6092_v13, %v3822_v46  ;;  %v6094_v5 = vld [vmem:[#allocation74_spill] sm:$0xff]  ;;  %v6095_v35 = vld [vmem:[#allocation43_spill] sm:$0xff] }
 0x260   : > { %v1400_v49 = vadd.f32 %v1272_v15, %v5234_v34  ;;  %v2006_v25 = vmul.f32 %v1878_v21, %v6093_v0  ;;  %v1755_v54 = vadd.f32 1.0, %v3198_v8  ;;  %v1146_v53 = vmul.f32 %v1018_v41, %v5271_v56  ;;  %v6096_v50 = vld [vmem:[#allocation71_spill] sm:$0xff] }
 0x261   : > { %2513 = vmatprep.mubr.f32.mxu0 %v2009_v51  ;;  %v2008_v31 = vmul.f32 %v1880_v55, %v6094_v5  ;;  %v5312_v57 = vadd.f32 %v6095_v35, %v3824_v47  ;;  %3205 = vtanh.f32 %v5076_v42  ;;  %v5317_v13 = vadd.f32 %v6096_v50, %v3818_v44  ;;  %v6097_v42 = vld [vmem:[#allocation55_spill] sm:$0xff]  ;;  %v6099_v35 = vld [vmem:[#allocation73_spill] sm:$0xff] }
 0x262   : > { %v3200_v40 = vpop.eup %3199  ;;  %2289 = vmatmul.mubr.f32.gmra.mrb[102].mxu1 %v2006_v25  ;;  %v1271_v15 = vmul.f32 0.044715, %v1143_v9  ;;  %v1883_v51 = vmul.f32 0.5, %v1755_v54  ;;  %v1020_v41 = vmul.f32 %v5297_v63, %v5297_v63  ;;  %v1273_v55 = vmul.f32 0.044715, %v1145_v26 }
 0x263   : > { %v1757_v21 = vadd.f32 1.0, %v3200_v40  ;;  %2514 = vmatmul.mubr.f32.gmra.mrb[102].mxu0 %v2008_v31  ;;  %v1019_v0 = vmul.f32 %v5304_v60, %v5304_v60  ;;  %3207 = vtanh.f32 %v5084_v58  ;;  %v5326_v5 = vadd.f32 %v6097_v42, %v3820_v45  ;;  %v6100_v40 = vld [vmem:[#allocation72_spill] sm:$0xff]  ;;  %v6101_v42 = vld [vmem:[#allocation35_spill] sm:$0xff] }
 0x264   : > { %v3202_v8 = vpop.eup %3201  ;;  %v2011_v25 = vmul.f32 %v1883_v51, %v6099_v35  ;;  %v5331_v50 = vadd.f32 %v6100_v40, %v3822_v46  ;;  %v1021_v31 = vmul.f32 %v5312_v57, %v5312_v57  ;;  %v1022_v26 = vmul.f32 %v5317_v13, %v5317_v13  ;;  %v6102_v51 = vld [vmem:[#allocation76_spill] sm:$0xff] }
 0x265   : > { %6098 = vst [vmem:[#allocation18_spill] sm:$0xff] %v5326_v5  ;;  %v1885_v9 = vmul.f32 0.5, %v1757_v21  ;;  %v1754_v54 = vadd.f32 1.0, %v3202_v8  ;;  %v1024_v58 = vmul.f32 %v5326_v5, %v5326_v5  ;;  %3209 = vtanh.f32 %v6101_v42 }
 0x266   : > { %v3204_v34 = vpop.eup %3203  ;;  %2293 = vmatprep.mubr.f32.mxu1 %v2011_v25  ;;  %v1148_v8 = vmul.f32 %v1020_v41, %v5297_v63  ;;  %v1399_v30 = vadd.f32 %v1271_v15, %v5256_v19  ;;  %v1274_v28 = vmul.f32 0.044715, %v1146_v53  ;;  %v1147_v3 = vmul.f32 %v1019_v0, %v5304_v60  ;;  %v6104_v53 = vld [vmem:[#allocation52_spill] sm:$0xff] }
 0x267   : > { %v2013_v21 = vmul.f32 %v1885_v9, %v6102_v51  ;;  %v1882_v35 = vmul.f32 0.5, %v1754_v54  ;;  %v1756_v40 = vadd.f32 1.0, %v3204_v34  ;;  %3211 = vtanh.f32 %v5074_v59  ;;  %v6105_v9 = vld [vmem:[#allocation48_spill] sm:$0xff] }
 0x268   : > { %v1401_v6 = vadd.f32 %v1273_v55, %v5262_v18  ;;  %v1023_v25 = vmul.f32 %v5331_v50, %v5331_v50  ;;  %v1149_v41 = vmul.f32 %v1021_v31, %v5312_v57  ;;  %v1150_v34 = vmul.f32 %v1022_v26, %v5317_v13 }
 0x269   : > { %2518 = vmatprep.mubr.f32.mxu0 %v2013_v21  ;;  %v2010_v7 = vmul.f32 %v1882_v35, %v6103_v24  ;;  %v1884_v42 = vmul.f32 0.5, %v1756_v40  ;;  %v1152_v15 = vmul.f32 %v1024_v58, %v5326_v5  ;;  %v5354_v0 = vadd.f32 %v6104_v53, %v3824_v47 }
 0x26a   : > { %v5356_v59 = vmul.f32 0.7978846, %v1400_v49  ;;  %v1276_v55 = vmul.f32 0.044715, %v1148_v8  ;;  %3213 = vtanh.f32 %v5104_v14  ;;  %v1402_v51 = vadd.f32 %v1274_v28, %v5271_v56 }
 0x26b   : > { %2294 = vmatmul.mubr.f32.gmra.mrb[104].mxu1 %v2010_v7  ;;  %v2012_v24 = vmul.f32 %v1884_v42, %v6105_v9  ;;  %v3206_v54 = vpop.eup %3205  ;;  %v1275_v31 = vmul.f32 0.044715, %v1147_v3  ;;  %v1151_v26 = vmul.f32 %v1023_v25, %v5331_v50  ;;  %v1025_v58 = vmul.f32 %v5354_v0, %v5354_v0  ;;  %v6106_v25 = vld [vmem:[#allocation12_spill] sm:$0xff] }
 0x26c   : > { %v5364_v21 = vmul.f32 0.7978846, %v1399_v30  ;;  %v5366_v35 = vmul.f32 0.7978846, %v1401_v6  ;;  %v1759_v49 = vadd.f32 1.0, %v3206_v54  ;;  %3215 = vtanh.f32 %v5117_v36 }
 0x26d   : > { %2519 = vmatmul.mubr.f32.gmra.mrb[104].mxu0 %v2012_v24  ;;  %v3208_v7 = vpop.eup %3207  ;;  %v1277_v8 = vmul.f32 0.044715, %v1149_v41  ;;  %v1278_v14 = vmul.f32 0.044715, %v1150_v34  ;;  %v1280_v40 = vmul.f32 0.044715, %v1152_v15  ;;  %3217 = vtanh.f32 %v5095_v32 }
 0x26e   : > { %v1404_v3 = vadd.f32 %v1276_v55, %v5297_v63  ;;  %v1887_v28 = vmul.f32 0.5, %v1759_v49  ;;  %v1761_v42 = vadd.f32 1.0, %v3208_v7  ;;  %v5373_v30 = vadd.f32 %v6106_v25, %v3818_v44  ;;  %v6107_v15 = vld [vmem:[#allocation53_spill] sm:$0xff] }
 0x26f   : > { %v3210_v6 = vpop.eup %3209  ;;  %v1403_v53 = vadd.f32 %v1275_v31, %v5304_v60  ;;  %v1279_v9 = vmul.f32 0.044715, %v1151_v26  ;;  %v1153_v36 = vmul.f32 %v1025_v58, %v5354_v0  ;;  %3219 = vtanh.f32 %v5097_v22 }
 0x270   : > { %v2015_v41 = vmul.f32 %v1887_v28, %v4968_v62  ;;  %v1889_v34 = vmul.f32 0.5, %v1761_v42  ;;  %v1758_v32 = vadd.f32 1.0, %v3210_v6  ;;  %v5381_v55 = vadd.f32 %v6107_v15, %v3820_v45 }
 0x271   : > { %v3212_v24 = vpop.eup %3211  ;;  %v5383_v54 = vmul.f32 0.7978846, %v1402_v51  ;;  %v1405_v49 = vadd.f32 %v1277_v8, %v5312_v57  ;;  %v1406_v31 = vadd.f32 %v1278_v14, %v5317_v13  ;;  %v1408_v26 = vadd.f32 %v1280_v40, %v5326_v5  ;;  %v6108_v14 = vld [vmem:[#allocation77_spill] sm:$0xff] }
 0x272   : > { %2298 = vmatprep.mubr.f32.mxu1 %v2015_v41  ;;  %v2017_v22 = vmul.f32 %v1889_v34, %v4980_v16  ;;  %v1886_v58 = vmul.f32 0.5, %v1758_v32  ;;  %v1760_v62 = vadd.f32 1.0, %v3212_v24  ;;  %v1026_v7 = vmul.f32 %v5373_v30, %v5373_v30 }
 0x273   : > { %v5391_v28 = vmul.f32 0.7978846, %v1404_v3  ;;  %v5393_v42 = vmul.f32 0.7978846, %v1403_v53  ;;  %v1407_v51 = vadd.f32 %v1279_v9, %v5331_v50  ;;  %v1281_v25 = vmul.f32 0.044715, %v1153_v36 }
 0x274   : > { %v3214_v8 = vpop.eup %3213  ;;  %2523 = vmatprep.mubr.f32.mxu0 %v2017_v22  ;;  %v2014_v6 = vmul.f32 %v1886_v58, %v6108_v14  ;;  %v1888_v40 = vmul.f32 0.5, %v1760_v62  ;;  %v1028_v16 = vmul.f32 %v5381_v55, %v5381_v55  ;;  %3221 = vtanh.f32 %v5144_v10  ;;  %v6109_v53 = vld [vmem:[#allocation23_spill] sm:$0xff]  ;;  %v6111_v62 = vld [vmem:[#allocation57_spill] sm:$0xff] }
 0x275   : > { %v5400_v41 = vmul.f32 0.7978846, %v1405_v49  ;;  %v5402_v34 = vmul.f32 0.7978846, %v1406_v31  ;;  %v1763_v3 = vadd.f32 1.0, %v3214_v8  ;;  %v5406_v32 = vadd.f32 %v6109_v53, %v3822_v46  ;;  %v6110_v31 = vld [vmem:[#allocation69_spill] sm:$0xff] }
 0x276   : > { %v3216_v9 = vpop.eup %3215  ;;  %v5408_v36 = vmul.f32 0.7978846, %v1408_v26  ;;  %2299 = vmatmul.mubr.f32.gmra.mrb[106].mxu1 %v2014_v6  ;;  %v2016_v15 = vmul.f32 %v1888_v40, %v4957_v48  ;;  %v1154_v24 = vmul.f32 %v1026_v7, %v5373_v30  ;;  %3223 = vtanh.f32 %v5161_v43 }
 0x277   : > { %v3218_v10 = vpop.eup %3217  ;;  %v1891_v49 = vmul.f32 0.5, %v1763_v3  ;;  %v1765_v22 = vadd.f32 1.0, %v3216_v9  ;;  %v5415_v58 = vadd.f32 %v6110_v31, %v3824_v47  ;;  %v5419_v8 = vadd.f32 %v6111_v62, %v3818_v44 }
 0x278   : > { %2524 = vmatmul.mubr.f32.gmra.mrb[106].mxu0 %v2016_v15  ;;  %v5421_v26 = vmul.f32 0.7978846, %v1407_v51  ;;  %v1409_v48 = vadd.f32 %v1281_v25, %v5354_v0  ;;  %v1156_v7 = vmul.f32 %v1028_v16, %v5381_v55  ;;  %v1762_v14 = vadd.f32 1.0, %v3218_v10  ;;  %v6112_v25 = vld [vmem:[#allocation33_spill] sm:$0xff] }
 0x279   : > { %v3220_v43 = vpop.eup %3219  ;;  %v2019_v6 = vmul.f32 %v1891_v49, %v5016_v38  ;;  %v1893_v40 = vmul.f32 0.5, %v1765_v22  ;;  %v1027_v3 = vmul.f32 %v5406_v32, %v5406_v32  ;;  %3225 = vtanh.f32 %v5128_v4  ;;  %v5438_v4 = vld [vmem:[%s5683_s4] ss:$0 sm:$0xff]  ;;  %v6113_v49 = vld [vmem:[#allocation78_spill] sm:$0xff] }
 0x27a   : > { %v1282_v44 = vmul.f32 0.044715, %v1154_v24  ;;  %v1890_v9 = vmul.f32 0.5, %v1762_v14  ;;  %v1764_v15 = vadd.f32 1.0, %v3220_v43  ;;  %v1029_v16 = vmul.f32 %v5415_v58, %v5415_v58  ;;  %v6114_v43 = vld [vmem:[#allocation45_spill] sm:$0xff] }
 0x27b   : > { %2303 = vmatprep.mubr.f32.mxu1 %v2019_v6  ;;  %v2021_v62 = vmul.f32 %v1893_v40, %v6112_v25  ;;  %v1030_v38 = vmul.f32 %v5419_v8, %v5419_v8  ;;  %3227 = vtanh.f32 %v5132_v17  ;;  %v5440_v10 = vmul.f32 0.7978846, %v1409_v48  ;;  %v6115_v17 = vld [vmem:[#allocation75_spill] sm:$0xff]  ;;  %v6116_v48 = vld [vmem:[#allocation16_spill] sm:$0xff] }
 0x27c   : > { %v2195_v53 = vpop.f32.mrb[64].mxu1  ;;  %v2420_v51 = vpop.f32.mrb[64].mxu0  ;;  %v2018_v22 = vmul.f32 %v1890_v9, %v6113_v49  ;;  %v1892_v14 = vmul.f32 0.5, %v1764_v15  ;;  %v5445_v6 = vadd.f32 %v6114_v43, %v3820_v45  ;;  %v1284_v40 = vmul.f32 0.044715, %v1156_v7  ;;  %v6117_v9 = vld [vmem:[#allocation32_spill] sm:$0xff] }
 0x27d   : > { %v2197_v31 = vpop.f32.mrb[65].mxu1  ;;  %v2422_v24 = vpop.f32.mrb[65].mxu0  ;;  %2528 = vmatprep.mubr.f32.mxu0 %v2021_v62  ;;  %v5450_v25 = vadd.f32 %v6115_v17, %v3822_v46  ;;  %3229 = vtanh.f32 %v5206_v52  ;;  %v5456_v15 = vadd.f32 %v6117_v9, %v3824_v47  ;;  %v2196_v45 = vadd.f32 %v5438_v4, %v2195_v53 }
 0x27e   : > { %v1155_v31 = vmul.f32 %v1027_v3, %v5406_v32  ;;  %v3222_v24 = vpop.eup %3221  ;;  %2304 = vmatmul.mubr.f32.gmra.mrb[108].mxu1 %v2018_v22  ;;  %v2020_v5 = vmul.f32 %v1892_v14, %v6116_v48  ;;  %3231 = vtanh.f32 %v5208_v20  ;;  %v1410_v3 = vadd.f32 %v1282_v44, %v5373_v30  ;;  %v6118_v48 = vld [vmem:[#allocation37_spill] sm:$0xff] }
 0x27f   : > { %v1157_v46 = vmul.f32 %v1029_v16, %v5415_v58  ;;  %v1767_v62 = vadd.f32 1.0, %v3222_v24  ;;  %v1158_v52 = vmul.f32 %v1030_v38, %v5419_v8  ;;  %v1032_v47 = vmul.f32 %v5445_v6, %v5445_v6 }
 0x280   : > { %v2200_v7 = vpop.f32.mrb[66].mxu1  ;;  %v3224_v22 = vpop.eup %3223  ;;  %2529 = vmatmul.mubr.f32.gmra.mrb[108].mxu0 %v2020_v5  ;;  %3233 = vtanh.f32 %v5176_v27  ;;  %v2421_v20 = vadd.f32 %v2420_v51, %v2196_v45  ;;  %v1283_v43 = vmul.f32 0.044715, %v1155_v31  ;;  %v1031_v16 = vmul.f32 %v5450_v25, %v5450_v25 }
 0x281   : > { %v2202_v49 = vpop.f32.mrb[67].mxu1  ;;  %v2201_v53 = vadd.f32 %v5438_v4, %v2200_v7  ;;  %v2425_v14 = vpop.f32.mrb[66].mxu0  ;;  %v1895_v44 = vmul.f32 0.5, %v1767_v62  ;;  %v1769_v17 = vadd.f32 1.0, %v3224_v22  ;;  %v1412_v24 = vadd.f32 %v1284_v40, %v5381_v55 }
 0x282   : > { %v2427_v38 = vpop.f32.mrb[67].mxu0  ;;  %v1033_v5 = vmul.f32 %v5456_v15, %v5456_v15  ;;  %3235 = vtanh.f32 %v5199_v39  ;;  %2579 = vst [vmem:[%s5475_s10] sm:$0xff] %v2421_v20  ;;  %v1285_v31 = vmul.f32 0.044715, %v1157_v46  ;;  %v1286_v7 = vmul.f32 0.044715, %v1158_v52  ;;  %v6119_v20 = vld [vmem:[#allocation28_spill] sm:$0xff] }
 0x283   : > { %v2426_v27 = vadd.f32 %v2425_v14, %v2201_v53  ;;  %v3226_v51 = vpop.eup %3225  ;;  %v2023_v9 = vmul.f32 %v1895_v44, %v6118_v48  ;;  %v1897_v45 = vmul.f32 0.5, %v1769_v17  ;;  %v5479_v62 = vmul.f32 0.7978846, %v1410_v3  ;;  %v6120_v38 = vld [vmem:[#allocation62_spill] sm:$0xff] }
 0x284   : > { %v1160_v40 = vmul.f32 %v1032_v47, %v5445_v6  ;;  %v1766_v49 = vadd.f32 1.0, %v3226_v51  ;;  %3237 = vtanh.f32 %v5265_v61  ;;  %v1411_v22 = vadd.f32 %v1283_v43, %v5406_v32 }
 0x285   : > { %2580 = vst [vmem:[%s5475_s10 + $0x8] sm:$0xff] %v2426_v27  ;;  %v3228_v39 = vpop.eup %3227  ;;  %2308 = vmatprep.mubr.f32.mxu1 %v2023_v9  ;;  %v2025_v53 = vmul.f32 %v1897_v45, %v6119_v20  ;;  %v1159_v46 = vmul.f32 %v1031_v16, %v5450_v25  ;;  %3239 = vtanh.f32 %v5267_v1  ;;  %v1161_v3 = vmul.f32 %v1033_v5, %v5456_v15 }
 0x286   : > { %v1894_v14 = vmul.f32 0.5, %v1766_v49  ;;  %v1768_v52 = vadd.f32 1.0, %v3228_v39  ;;  %3241 = vtanh.f32 %v5242_v23  ;;  %v5490_v44 = vmul.f32 0.7978846, %v1412_v24 }
 0x287   : > { %v3230_v47 = vpop.eup %3229  ;;  %v1413_v61 = vadd.f32 %v1285_v31, %v5415_v58  ;;  %2533 = vmatprep.mubr.f32.mxu0 %v2025_v53  ;;  %v1414_v43 = vadd.f32 %v1286_v7, %v5419_v8  ;;  %3243 = vtanh.f32 %v5251_v33  ;;  %v1288_v16 = vmul.f32 0.044715, %v1160_v40  ;;  %v6121_v31 = vld [vmem:[#allocation17_spill] sm:$0xff] }
 0x288   : > { %v3232_v17 = vpop.eup %3231  ;;  %v2022_v1 = vmul.f32 %v1894_v14, %v6120_v38  ;;  %v1896_v27 = vmul.f32 0.5, %v1768_v52  ;;  %v1771_v51 = vadd.f32 1.0, %v3230_v47  ;;  %v5496_v48 = vmul.f32 0.7978846, %v1411_v22  ;;  %v6123_v14 = vld [vmem:[#allocation15_spill] sm:$0xff] }
 0x289   : > { %v1287_v5 = vmul.f32 0.044715, %v1159_v46  ;;  %v1773_v23 = vadd.f32 1.0, %v3232_v17  ;;  %3245 = vtanh.f32 %v5289_v2  ;;  %v1289_v45 = vmul.f32 0.044715, %v1161_v3  ;;  %v6122_v2 = vld [vmem:[#allocation14_spill] sm:$0xff] }
 0x28a   : > { %v3234_v24 = vpop.eup %3233  ;;  %2309 = vmatmul.mubr.f32.gmra.mrb[110].mxu1 %v2022_v1  ;;  %v2024_v9 = vmul.f32 %v1896_v27, %v6121_v31  ;;  %v1899_v7 = vmul.f32 0.5, %v1771_v51  ;;  %3247 = vtanh.f32 %v5291_v12  ;;  %v5501_v33 = vmul.f32 0.7978846, %v1413_v61  ;;  %v6124_v1 = vld [vmem:[#allocation79_spill] sm:$0xff] }
 0x28b   : > { %v1901_v40 = vmul.f32 0.5, %v1773_v23  ;;  %v1770_v49 = vadd.f32 1.0, %v3234_v24  ;;  %3249 = vtanh.f32 %v5273_v29  ;;  %v5504_v22 = vmul.f32 0.7978846, %v1414_v43 }
 0x28c   : > { %v3236_v39 = vpop.eup %3235  ;;  %v1416_v20 = vadd.f32 %v1288_v16, %v5445_v6  ;;  %2534 = vmatmul.mubr.f32.gmra.mrb[110].mxu0 %v2024_v9  ;;  %v2027_v53 = vmul.f32 %v1899_v7, %v6122_v2  ;;  %3251 = vtanh.f32 %v5278_v37  ;;  %v1415_v43 = vadd.f32 %v1287_v5, %v5450_v25  ;;  %v6125_v9 = vld [vmem:[#allocation49_spill] sm:$0xff] }
 0x28d   : > { %v2205_v46 = vpop.f32.mrb[68].mxu1  ;;  %v2029_v52 = vmul.f32 %v1901_v40, %v6123_v14  ;;  %v1898_v12 = vmul.f32 0.5, %v1770_v49  ;;  %v1772_v3 = vadd.f32 1.0, %v3236_v39  ;;  %3253 = vtanh.f32 %v5364_v21 }
 0x28e   : > { %v2207_v61 = vpop.f32.mrb[69].mxu1  ;;  %v3238_v29 = vpop.eup %3237  ;;  %v1417_v17 = vadd.f32 %v1289_v45, %v5456_v15  ;;  %2313 = vmatprep.mubr.f32.mxu1 %v2027_v53  ;;  %3255 = vtanh.f32 %v5366_v35  ;;  %v2206_v16 = vadd.f32 %v5438_v4, %v2205_v46  ;;  %v5517_v24 = vmul.f32 0.7978846, %v1416_v20 }
 0x28f   : > { %v2430_v47 = vpop.f32.mrb[68].mxu0  ;;  %v3240_v38 = vpop.eup %3239  ;;  %2538 = vmatprep.mubr.f32.mxu0 %v2029_v52  ;;  %v2026_v27 = vmul.f32 %v1898_v12, %v6124_v1  ;;  %v1900_v51 = vmul.f32 0.5, %v1772_v3  ;;  %v1775_v23 = vadd.f32 1.0, %v3238_v29  ;;  %3257 = vtanh.f32 %v5299_v11  ;;  %v6127_v12 = vld [vmem:[#allocation25_spill] sm:$0xff]  ;;  %v6128_v29 = vld [vmem:[#allocation39_spill] sm:$0xff] }
 0x290   : > { %v2432_v37 = vpop.f32.mrb[69].mxu0  ;;  %v3242_v21 = vpop.eup %3241  ;;  %v1777_v5 = vadd.f32 1.0, %v3240_v38  ;;  %3259 = vtanh.f32 %v5356_v59  ;;  %v2431_v31 = vadd.f32 %v2430_v47, %v2206_v16  ;;  %v5522_v49 = vmul.f32 0.7978846, %v1415_v43  ;;  %v6126_v59 = vld [vmem:[#allocation50_spill] sm:$0xff]  ;;  %v6129_v38 = vld [vmem:[#allocation64_spill] sm:$0xff] }
 0x291   : > { %v3244_v35 = vpop.eup %3243  ;;  %2314 = vmatmul.mubr.f32.gmra.mrb[112].mxu1 %v2026_v27  ;;  %v2028_v45 = vmul.f32 %v1900_v51, %v6125_v9  ;;  %v1903_v7 = vmul.f32 0.5, %v1775_v23  ;;  %v1774_v40 = vadd.f32 1.0, %v3242_v21  ;;  %3261 = vtanh.f32 %v5393_v42 }
 0x292   : > { %v1905_v39 = vmul.f32 0.5, %v1777_v5  ;;  %v1776_v11 = vadd.f32 1.0, %v3244_v35  ;;  %3263 = vtanh.f32 %v5400_v41  ;;  %2581 = vst [vmem:[%s5475_s10 + $0x10] sm:$0xff] %v2431_v31  ;;  %v5526_v2 = vmul.f32 0.7978846, %v1417_v17  ;;  %v6130_v35 = vld [vmem:[#allocation84_spill] sm:$0xff] }
 0x293   : > { %v3246_v20 = vpop.eup %3245  ;;  %2539 = vmatmul.mubr.f32.gmra.mrb[112].mxu0 %v2028_v45  ;;  %v2031_v53 = vmul.f32 %v1903_v7, %v6126_v59  ;;  %v1902_v46 = vmul.f32 0.5, %v1774_v40  ;;  %3265 = vtanh.f32 %v5383_v54 }
 0x294   : > { %v3248_v52 = vpop.eup %3247  ;;  %v2033_v42 = vmul.f32 %v1905_v39, %v6127_v12  ;;  %v1904_v3 = vmul.f32 0.5, %v1776_v11  ;;  %v1779_v47 = vadd.f32 1.0, %v3246_v20  ;;  %3267 = vtanh.f32 %v5391_v28  ;;  %v6131_v39 = vld [vmem:[#allocation80_spill] sm:$0xff] }
 0x295   : > { %v2210_v14 = vpop.f32.mrb[70].mxu1  ;;  %v3250_v41 = vpop.eup %3249  ;;  %2318 = vmatprep.mubr.f32.mxu1 %v2031_v53  ;;  %v2030_v43 = vmul.f32 %v1902_v46, %v6128_v29  ;;  %v1781_v17 = vadd.f32 1.0, %v3248_v52  ;;  %3269 = vtanh.f32 %v5421_v26  ;;  %v6133_v12 = vld [vmem:[#allocation20_spill] sm:$0xff] }
 0x296   : > { %v2212_v61 = vpop.f32.mrb[71].mxu1  ;;  %v2211_v16 = vadd.f32 %v5438_v4, %v2210_v14  ;;  %v3252_v54 = vpop.eup %3251  ;;  %2543 = vmatprep.mubr.f32.mxu0 %v2033_v42  ;;  %v2032_v1 = vmul.f32 %v1904_v3, %v6129_v38  ;;  %v1907_v27 = vmul.f32 0.5, %v1779_v47  ;;  %v1778_v51 = vadd.f32 1.0, %v3250_v41 }
 0x297   : > { %3271 = vtanh.f32 %v5440_v10  ;;  %v3254_v23 = vpop.eup %3253  ;;  %2319 = vmatmul.mubr.f32.gmra.mrb[114].mxu1 %v2030_v43  ;;  %v1909_v21 = vmul.f32 0.5, %v1781_v17  ;;  %v1780_v5 = vadd.f32 1.0, %v3252_v54 }
 0x298   : > { %v2435_v37 = vpop.f32.mrb[70].mxu0  ;;  %3273 = vtanh.f32 %v5402_v34  ;;  %v3256_v31 = vpop.eup %3255  ;;  %2544 = vmatmul.mubr.f32.gmra.mrb[114].mxu0 %v2032_v1  ;;  %v2035_v9 = vmul.f32 %v1907_v27, %v6130_v35  ;;  %v1906_v45 = vmul.f32 0.5, %v1778_v51  ;;  %v1783_v7 = vadd.f32 1.0, %v3254_v23  ;;  %v6132_v34 = vld [vmem:[#allocation26_spill] sm:$0xff]  ;;  %v6135_v1 = vld [vmem:[#allocation21_spill] sm:$0xff] }
 0x299   : > { %v2437_v28 = vpop.f32.mrb[71].mxu0  ;;  %v2436_v26 = vadd.f32 %v2435_v37, %v2211_v16  ;;  %3275 = vtanh.f32 %v5408_v36  ;;  %v3258_v40 = vpop.eup %3257  ;;  %v2037_v10 = vmul.f32 %v1909_v21, %v6131_v39  ;;  %v1908_v11 = vmul.f32 0.5, %v1780_v5  ;;  %v6134_v37 = vld [vmem:[#allocation85_spill] sm:$0xff] }
 0x29a   : > { %v1785_v20 = vadd.f32 1.0, %v3256_v31  ;;  %3277 = vtanh.f32 %v5496_v48  ;;  %v3260_v59 = vpop.eup %3259  ;;  %2323 = vmatprep.mubr.f32.mxu1 %v2035_v9  ;;  %v2034_v53 = vmul.f32 %v1906_v45, %v6132_v34  ;;  %v1911_v46 = vmul.f32 0.5, %v1783_v7 }
 0x29b   : > { %2582 = vst [vmem:[%s5475_s10 + $0x18] sm:$0xff] %v2436_v26  ;;  %v1782_v14 = vadd.f32 1.0, %v3258_v40  ;;  %3279 = vtanh.f32 %v5501_v33  ;;  %v3262_v52 = vpop.eup %3261  ;;  %2548 = vmatprep.mubr.f32.mxu0 %v2037_v10  ;;  %v2036_v36 = vmul.f32 %v1908_v11, %v6133_v12  ;;  %v1784_v3 = vadd.f32 1.0, %v3260_v59 }
 0x29c   : > { %v1913_v42 = vmul.f32 0.5, %v1785_v20  ;;  %3281 = vtanh.f32 %v5479_v62  ;;  %v3264_v47 = vpop.eup %3263  ;;  %2324 = vmatmul.mubr.f32.gmra.mrb[116].mxu1 %v2034_v53  ;;  %v2039_v48 = vmul.f32 %v1911_v46, %v5256_v19  ;;  %v1787_v41 = vadd.f32 1.0, %v3262_v52 }
 0x29d   : > { %v1910_v61 = vmul.f32 0.5, %v1782_v14  ;;  %3283 = vtanh.f32 %v5490_v44  ;;  %v3266_v29 = vpop.eup %3265  ;;  %2549 = vmatmul.mubr.f32.gmra.mrb[116].mxu0 %v2036_v36  ;;  %v1912_v43 = vmul.f32 0.5, %v1784_v3  ;;  %v1789_v17 = vadd.f32 1.0, %v3264_v47 }
 0x29e   : > { %v2041_v33 = vmul.f32 %v1913_v42, %v5262_v18  ;;  %3285 = vtanh.f32 %v5522_v49  ;;  %v3268_v16 = vpop.eup %3267  ;;  %2328 = vmatprep.mubr.f32.mxu1 %v2039_v48  ;;  %v1915_v54 = vmul.f32 0.5, %v1787_v41  ;;  %v1786_v38 = vadd.f32 1.0, %v3266_v29  ;;  %v6136_v48 = vld [vmem:[#allocation18_spill] sm:$0xff] }
 0x29f   : > { %v2038_v62 = vmul.f32 %v1910_v61, %v6134_v37  ;;  %3287 = vtanh.f32 %v5526_v2  ;;  %v3270_v19 = vpop.eup %3269  ;;  %v2040_v44 = vmul.f32 %v1912_v43, %v6135_v1  ;;  %v1917_v27 = vmul.f32 0.5, %v1789_v17 }
 0x2a0   : > { %2553 = vmatprep.mubr.f32.mxu0 %v2041_v33  ;;  %v1788_v51 = vadd.f32 1.0, %v3268_v16  ;;  %3289 = vtanh.f32 %v5504_v22  ;;  %v2043_v49 = vmul.f32 %v1915_v54, %v5304_v60  ;;  %v1914_v23 = vmul.f32 0.5, %v1786_v38 }
 0x2a1   : > { %v3272_v28 = vpop.eup %3271  ;;  %2329 = vmatmul.mubr.f32.gmra.mrb[118].mxu1 %v2038_v62  ;;  %v1791_v21 = vadd.f32 1.0, %v3270_v19  ;;  %3291 = vtanh.f32 %v5517_v24  ;;  %2554 = vmatmul.mubr.f32.gmra.mrb[118].mxu0 %v2040_v44  ;;  %v2045_v2 = vmul.f32 %v1917_v27, %v5312_v57 }
 0x2a2   : > { %v2215_v18 = vpop.f32.mrb[72].mxu1  ;;  %v3274_v26 = vpop.eup %3273  ;;  %v1916_v31 = vmul.f32 0.5, %v1788_v51  ;;  %v1793_v35 = vadd.f32 1.0, %v3272_v28  ;;  %2333 = vmatprep.mubr.f32.mxu1 %v2043_v49  ;;  %v2042_v7 = vmul.f32 %v1914_v23, %v5271_v56 }
 0x2a3   : > { %v2217_v5 = vpop.f32.mrb[73].mxu1  ;;  %v2216_v9 = vadd.f32 %v5438_v4, %v2215_v18  ;;  %v2440_v45 = vpop.f32.mrb[72].mxu0  ;;  %v1919_v40 = vmul.f32 0.5, %v1791_v21  ;;  %v1790_v60 = vadd.f32 1.0, %v3274_v26  ;;  %2558 = vmatprep.mubr.f32.mxu0 %v2045_v2 }
 0x2a4   : > { %v3276_v22 = vpop.eup %3275  ;;  %v2442_v39 = vpop.f32.mrb[73].mxu0  ;;  %v2044_v24 = vmul.f32 %v1916_v31, %v5297_v63  ;;  %v1921_v11 = vmul.f32 0.5, %v1793_v35 }
 0x2a5   : > { %v3278_v10 = vpop.eup %3277  ;;  %v1792_v20 = vadd.f32 1.0, %v3276_v22  ;;  %v2441_v57 = vadd.f32 %v2440_v45, %v2216_v9  ;;  %2334 = vmatmul.mubr.f32.gmra.mrb[120].mxu1 %v2042_v7  ;;  %v2047_v34 = vmul.f32 %v1919_v40, %v5331_v50  ;;  %v1918_v53 = vmul.f32 0.5, %v1790_v60 }
 0x2a6   : > { %v3280_v59 = vpop.eup %3279  ;;  %v1795_v46 = vadd.f32 1.0, %v3278_v10  ;;  %2559 = vmatmul.mubr.f32.gmra.mrb[120].mxu0 %v2044_v24  ;;  %v2049_v56 = vmul.f32 %v1921_v11, %v5354_v0 }
 0x2a7   : > { %v3282_v14 = vpop.eup %3281  ;;  %v1920_v52 = vmul.f32 0.5, %v1792_v20  ;;  %v1797_v12 = vadd.f32 1.0, %v3280_v59  ;;  %2583 = vst [vmem:[%s5475_s10 + $0x20] sm:$0xff] %v2441_v57  ;;  %2338 = vmatprep.mubr.f32.mxu1 %v2047_v34  ;;  %v2046_v63 = vmul.f32 %v1918_v53, %v5317_v13 }
 0x2a8   : > { %v3284_v36 = vpop.eup %3283  ;;  %v1923_v42 = vmul.f32 0.5, %v1795_v46  ;;  %v1794_v3 = vadd.f32 1.0, %v3282_v14  ;;  %2563 = vmatprep.mubr.f32.mxu0 %v2049_v56 }
 0x2a9   : > { %v3286_v47 = vpop.eup %3285  ;;  %v2048_v61 = vmul.f32 %v1920_v52, %v6136_v48  ;;  %v1925_v50 = vmul.f32 0.5, %v1797_v12  ;;  %v1796_v41 = vadd.f32 1.0, %v3284_v36  ;;  %v2220_v29 = vpop.f32.mrb[74].mxu1  ;;  %2339 = vmatmul.mubr.f32.gmra.mrb[122].mxu1 %v2046_v63 }
 0x2aa   : > { %v3288_v33 = vpop.eup %3287  ;;  %v2051_v0 = vmul.f32 %v1923_v42, %v5406_v32  ;;  %v1922_v43 = vmul.f32 0.5, %v1794_v3  ;;  %v1799_v17 = vadd.f32 1.0, %v3286_v47  ;;  %v2221_v16 = vadd.f32 %v5438_v4, %v2220_v29  ;;  %v2222_v37 = vpop.f32.mrb[75].mxu1 }
 0x2ab   : > { %v3290_v62 = vpop.eup %3289  ;;  %2564 = vmatmul.mubr.f32.gmra.mrb[122].mxu0 %v2048_v61  ;;  %v2053_v13 = vmul.f32 %v1925_v50, %v5415_v58  ;;  %v1924_v54 = vmul.f32 0.5, %v1796_v41  ;;  %v1801_v38 = vadd.f32 1.0, %v3288_v33  ;;  %v2445_v19 = vpop.f32.mrb[74].mxu0 }
 0x2ac   : > { %v3292_v1 = vpop.eup %3291  ;;  %2343 = vmatprep.mubr.f32.mxu1 %v2051_v0  ;;  %v2050_v44 = vmul.f32 %v1922_v43, %v5373_v30  ;;  %v1927_v27 = vmul.f32 0.5, %v1799_v17  ;;  %v1798_v51 = vadd.f32 1.0, %v3290_v62  ;;  %v2446_v32 = vadd.f32 %v2445_v19, %v2221_v16  ;;  %v2447_v18 = vpop.f32.mrb[75].mxu0 }
 0x2ad   : > { %2568 = vmatprep.mubr.f32.mxu0 %v2053_v13  ;;  %v2052_v28 = vmul.f32 %v1924_v54, %v5381_v55  ;;  %v1929_v49 = vmul.f32 0.5, %v1801_v38  ;;  %v1800_v23 = vadd.f32 1.0, %v3292_v1 }
 0x2ae   : > { %2344 = vmatmul.mubr.f32.gmra.mrb[124].mxu1 %v2050_v44  ;;  %v2055_v58 = vmul.f32 %v1927_v27, %v5450_v25  ;;  %v1926_v21 = vmul.f32 0.5, %v1798_v51  ;;  %2584 = vst [vmem:[%s5475_s10 + $0x28] sm:$0xff] %v2446_v32 }
 0x2af   : > { %2569 = vmatmul.mubr.f32.gmra.mrb[124].mxu0 %v2052_v28  ;;  %v2057_v5 = vmul.f32 %v1929_v49, %v5456_v15  ;;  %v1928_v26 = vmul.f32 0.5, %v1800_v23 }
 0x2b0   : > { %2348 = vmatprep.mubr.f32.mxu1 %v2055_v58  ;;  %v2054_v30 = vmul.f32 %v1926_v21, %v5419_v8 }
 0x2b1   : > { %2573 = vmatprep.mubr.f32.mxu0 %v2057_v5  ;;  %v2056_v2 = vmul.f32 %v1928_v26, %v5445_v6 }
 0x2b2   : > { %2349 = vmatmul.mubr.f32.gmra.mrb[126].mxu1 %v2054_v30 }
 0x2b3   : > { %2574 = vmatmul.mubr.f32.gmra.mrb[126].mxu0 %v2056_v2 }
 0x2b5   : > { %v2225_v55 = vpop.f32.mrb[76].mxu1 }
 0x2b6   : > { %v2226_v31 = vadd.f32 %v5438_v4, %v2225_v55  ;;  %v2227_v25 = vpop.f32.mrb[77].mxu1  ;;  %v2450_v35 = vpop.f32.mrb[76].mxu0 }
 0x2b7   : > { %v2452_v45 = vpop.f32.mrb[77].mxu0 }
 0x2b8   : > { %v2451_v9 = vadd.f32 %v2450_v35, %v2226_v31 }
 0x2ba   : > { %2585 = vst [vmem:[%s5475_s10 + $0x30] sm:$0xff] %v2451_v9 }
 0x2bc   : > { %v2230_v15 = vpop.f32.mrb[78].mxu1 }
 0x2bd   : > { %v2231_v22 = vadd.f32 %v5438_v4, %v2230_v15  ;;  %v2232_v7 = vpop.f32.mrb[79].mxu1 }
 0x2bf   : > { %v2455_v8 = vpop.f32.mrb[78].mxu0 }
 0x2c0   : > { %v2456_v40 = vadd.f32 %v2455_v8, %v2231_v22  ;;  %v2457_v6 = vpop.f32.mrb[79].mxu0 }
 0x2c2   : > { %2586 = vst [vmem:[%s5475_s10 + $0x38] sm:$0xff] %v2456_v40 }
 0x2c8   : > { %v2235_v60 = vpop.f32.mrb[80].mxu1 }
 0x2c9   : > { %v2236_v39 = vadd.f32 %v5438_v4, %v2235_v60  ;;  %v2237_v10 = vpop.f32.mrb[81].mxu1 }
 0x2ca   : > { %v2460_v24 = vpop.f32.mrb[80].mxu0 }
 0x2cb   : > { %v2461_v11 = vadd.f32 %v2460_v24, %v2236_v39  ;;  %v2462_v20 = vpop.f32.mrb[81].mxu0 }
 0x2cd   : > { %2587 = vst [vmem:[%s5475_s10 + $0x40] sm:$0xff] %v2461_v11 }
 0x2d3   : > { %v2240_v57 = vpop.f32.mrb[82].mxu1 }
 0x2d4   : > { %v2241_v59 = vadd.f32 %v5438_v4, %v2240_v57  ;;  %v2242_v34 = vpop.f32.mrb[83].mxu1 }
 0x2d5   : > { %v2465_v53 = vpop.f32.mrb[82].mxu0 }
 0x2d6   : > { %v2466_v46 = vadd.f32 %v2465_v53, %v2241_v59  ;;  %v2467_v14 = vpop.f32.mrb[83].mxu0 }
 0x2d8   : > { %2588 = vst [vmem:[%s5475_s10 + $0x48] sm:$0xff] %v2466_v46 }
 0x2db   : > { %v2245_v56 = vpop.f32.mrb[84].mxu1 }
 0x2dc   : > { %v2246_v52 = vadd.f32 %v5438_v4, %v2245_v56  ;;  %v2470_v12 = vpop.f32.mrb[84].mxu0  ;;  %v2247_v36 = vpop.f32.mrb[85].mxu1 }
 0x2dd   : > { %v2472_v63 = vpop.f32.mrb[85].mxu0 }
 0x2de   : > { %v2471_v42 = vadd.f32 %v2470_v12, %v2246_v52 }
 0x2e0   : > { %2589 = vst [vmem:[%s5475_s10 + $0x50] sm:$0xff] %v2471_v42 }
 0x2e4   : > { %v2250_v3 = vpop.f32.mrb[86].mxu1 }
 0x2e5   : > { %v2252_v47 = vpop.f32.mrb[87].mxu1  ;;  %v2251_v48 = vadd.f32 %v5438_v4, %v2250_v3 }
 0x2e9   : > { %v2475_v61 = vpop.f32.mrb[86].mxu0 }
 0x2ea   : > { %v2476_v50 = vadd.f32 %v2475_v61, %v2251_v48  ;;  %v2477_v41 = vpop.f32.mrb[87].mxu0 }
 0x2ec   : > { %2590 = vst [vmem:[%s5475_s10 + $0x58] sm:$0xff] %v2476_v50 }
 0x2f0   : > { %v2255_v29 = vpop.f32.mrb[88].mxu1 }
 0x2f1   : > { %v2256_v33 = vadd.f32 %v5438_v4, %v2255_v29  ;;  %v2257_v0 = vpop.f32.mrb[89].mxu1 }
 0x2f2   : > { %v2480_v43 = vpop.f32.mrb[88].mxu0 }
 0x2f3   : > { %v2481_v17 = vadd.f32 %v2480_v43, %v2256_v33  ;;  %v2482_v16 = vpop.f32.mrb[89].mxu0 }
 0x2f5   : > { %2591 = vst [vmem:[%s5475_s10 + $0x60] sm:$0xff] %v2481_v17 }
 0x2fa   : > { %v2260_v37 = vpop.f32.mrb[90].mxu1 }
 0x2fb   : > { %v2261_v62 = vadd.f32 %v5438_v4, %v2260_v37  ;;  %v2262_v13 = vpop.f32.mrb[91].mxu1 }
 0x2fc   : > { %v2485_v54 = vpop.f32.mrb[90].mxu0 }
 0x2fd   : > { %v2486_v38 = vadd.f32 %v2485_v54, %v2261_v62  ;;  %v2487_v19 = vpop.f32.mrb[91].mxu0 }
 0x2ff   : > { %2592 = vst [vmem:[%s5475_s10 + $0x68] sm:$0xff] %v2486_v38 }
 0x301   : > { %v2265_v1 = vpop.f32.mrb[92].mxu1 }
 0x302   : > { %v2266_v44 = vadd.f32 %v5438_v4, %v2265_v1  ;;  %v2267_v27 = vpop.f32.mrb[93].mxu1 }
 0x303   : > { %v2490_v51 = vpop.f32.mrb[92].mxu0 }
 0x304   : > { %v2491_v32 = vadd.f32 %v2490_v51, %v2266_v44  ;;  %v2492_v18 = vpop.f32.mrb[93].mxu0 }
 0x306   : > { %2593 = vst [vmem:[%s5475_s10 + $0x70] sm:$0xff] %v2491_v32 }
 0x30f   : > { %v2270_v28 = vpop.f32.mrb[94].mxu1 }
 0x310   : > { %v2271_v49 = vadd.f32 %v5438_v4, %v2270_v28  ;;  %v2495_v23 = vpop.f32.mrb[94].mxu0  ;;  %v2272_v58 = vpop.f32.mrb[95].mxu1 }
 0x311   : > { %v2497_v21 = vpop.f32.mrb[95].mxu0 }
 0x312   : > { %v2496_v5 = vadd.f32 %v2495_v23, %v2271_v49 }
 0x314   : > { %2594 = vst [vmem:[%s5475_s10 + $0x78] sm:$0xff] %v2496_v5 }
 0x317   : > { %v2275_v26 = vpop.f32.mrb[96].mxu1 }
 0x318   : > { %v2276_v30 = vadd.f32 %v5438_v4, %v2275_v26  ;;  %v2500_v2 = vpop.f32.mrb[96].mxu0  ;;  %v2277_v55 = vpop.f32.mrb[97].mxu1 }
 0x319   : > { %v2502_v31 = vpop.f32.mrb[97].mxu0 }
 0x31a   : > { %v2501_v25 = vadd.f32 %v2500_v2, %v2276_v30 }
 0x31c   : > { %2595 = vst [vmem:[%s5475_s10 + $0x80] sm:$0xff] %v2501_v25 }
 0x320   : > { %v2280_v35 = vpop.f32.mrb[98].mxu1 }
 0x321   : > { %v2281_v9 = vadd.f32 %v5438_v4, %v2280_v35  ;;  %v2282_v45 = vpop.f32.mrb[99].mxu1 }
 0x323   : > { %v2505_v15 = vpop.f32.mrb[98].mxu0 }
 0x324   : > { %v2506_v22 = vadd.f32 %v2505_v15, %v2281_v9  ;;  %v2507_v7 = vpop.f32.mrb[99].mxu0 }
 0x326   : > { %2596 = vst [vmem:[%s5475_s10 + $0x88] sm:$0xff] %v2506_v22 }
 0x32b   : > { %v2285_v8 = vpop.f32.mrb[100].mxu1 }
 0x32c   : > { %v2286_v40 = vadd.f32 %v5438_v4, %v2285_v8  ;;  %v2287_v6 = vpop.f32.mrb[101].mxu1  ;;  %v2510_v60 = vpop.f32.mrb[100].mxu0 }
 0x32d   : > { %v2512_v10 = vpop.f32.mrb[101].mxu0 }
 0x32e   : > { %v2511_v39 = vadd.f32 %v2510_v60, %v2286_v40 }
 0x330   : > { %2597 = vst [vmem:[%s5475_s10 + $0x90] sm:$0xff] %v2511_v39 }
 0x335   : > { %v2290_v24 = vpop.f32.mrb[102].mxu1 }
 0x336   : > { %v2291_v11 = vadd.f32 %v5438_v4, %v2290_v24  ;;  %v2515_v20 = vpop.f32.mrb[102].mxu0  ;;  %v2292_v57 = vpop.f32.mrb[103].mxu1 }
 0x337   : > { %v2517_v59 = vpop.f32.mrb[103].mxu0 }
 0x338   : > { %v2516_v34 = vadd.f32 %v2515_v20, %v2291_v11 }
 0x33a   : > { %2598 = vst [vmem:[%s5475_s10 + $0x98] sm:$0xff] %v2516_v34 }
 0x33e   : > { %v2295_v53 = vpop.f32.mrb[104].mxu1 }
 0x33f   : > { %v2296_v46 = vadd.f32 %v5438_v4, %v2295_v53  ;;  %v2297_v14 = vpop.f32.mrb[105].mxu1 }
 0x340   : > { %v2520_v56 = vpop.f32.mrb[104].mxu0 }
 0x341   : > { %v2521_v52 = vadd.f32 %v2520_v56, %v2296_v46  ;;  %v2522_v12 = vpop.f32.mrb[105].mxu0 }
 0x343   : > { %2599 = vst [vmem:[%s5475_s10 + $0xa0] sm:$0xff] %v2521_v52 }
 0x349   : > { %v2300_v36 = vpop.f32.mrb[106].mxu1 }
 0x34a   : > { %v2301_v63 = vadd.f32 %v5438_v4, %v2300_v36  ;;  %v2302_v42 = vpop.f32.mrb[107].mxu1 }
 0x34b   : > { %v2525_v3 = vpop.f32.mrb[106].mxu0 }
 0x34c   : > { %v2526_v47 = vadd.f32 %v2525_v3, %v2301_v63  ;;  %v2527_v48 = vpop.f32.mrb[107].mxu0 }
 0x34e   : > { %2600 = vst [vmem:[%s5475_s10 + $0xa8] sm:$0xff] %v2526_v47 }
 0x351   : > { %v2305_v61 = vpop.f32.mrb[108].mxu1 }
 0x352   : > { %v2306_v50 = vadd.f32 %v5438_v4, %v2305_v61  ;;  %v2307_v41 = vpop.f32.mrb[109].mxu1 }
 0x353   : > { %v2530_v29 = vpop.f32.mrb[108].mxu0 }
 0x354   : > { %v2531_v33 = vadd.f32 %v2530_v29, %v2306_v50  ;;  %v2532_v0 = vpop.f32.mrb[109].mxu0 }
 0x356   : > { %2601 = vst [vmem:[%s5475_s10 + $0xb0] sm:$0xff] %v2531_v33 }
 0x35d   : > { %v2310_v43 = vpop.f32.mrb[110].mxu1 }
 0x35e   : > { %v2311_v17 = vadd.f32 %v5438_v4, %v2310_v43  ;;  %v2312_v16 = vpop.f32.mrb[111].mxu1 }
 0x35f   : > { %v2535_v37 = vpop.f32.mrb[110].mxu0 }
 0x360   : > { %v2536_v62 = vadd.f32 %v2535_v37, %v2311_v17  ;;  %v2537_v13 = vpop.f32.mrb[111].mxu0 }
 0x362   : > { %2602 = vst [vmem:[%s5475_s10 + $0xb8] sm:$0xff] %v2536_v62 }
 0x364   : > { %v2315_v54 = vpop.f32.mrb[112].mxu1 }
 0x365   : > { %v2316_v38 = vadd.f32 %v5438_v4, %v2315_v54  ;;  %v2317_v19 = vpop.f32.mrb[113].mxu1 }
 0x366   : > { %v2540_v1 = vpop.f32.mrb[112].mxu0 }
 0x367   : > { %v2541_v44 = vadd.f32 %v2540_v1, %v2316_v38  ;;  %v2542_v27 = vpop.f32.mrb[113].mxu0 }
 0x369   : > { %2603 = vst [vmem:[%s5475_s10 + $0xc0] sm:$0xff] %v2541_v44 }
 0x36a   : > { %v2320_v51 = vpop.f32.mrb[114].mxu1 }
 0x36b   : > { %v2321_v32 = vadd.f32 %v5438_v4, %v2320_v51  ;;  %v2545_v18 = vpop.f32.mrb[114].mxu0  ;;  %v2322_v28 = vpop.f32.mrb[115].mxu1 }
 0x36c   : > { %v2547_v49 = vpop.f32.mrb[115].mxu0 }
 0x36d   : > { %v2546_v23 = vadd.f32 %v2545_v18, %v2321_v32 }
 0x36f   : > { %2604 = vst [vmem:[%s5475_s10 + $0xc8] sm:$0xff] %v2546_v23  ;;  %v2325_v58 = vpop.f32.mrb[116].mxu1 }
 0x370   : > { %v2326_v21 = vadd.f32 %v5438_v4, %v2325_v58  ;;  %v2550_v5 = vpop.f32.mrb[116].mxu0  ;;  %v2327_v26 = vpop.f32.mrb[117].mxu1 }
 0x371   : > { %v2552_v30 = vpop.f32.mrb[117].mxu0 }
 0x372   : > { %v2551_v2 = vadd.f32 %v2550_v5, %v2326_v21 }
 0x374   : > { %v2330_v55 = vpop.f32.mrb[118].mxu1  ;;  %2605 = vst [vmem:[%s5475_s10 + $0xd0] sm:$0xff] %v2551_v2  ;;  %v2555_v25 = vpop.f32.mrb[118].mxu0 }
 0x375   : > { %v2331_v31 = vadd.f32 %v5438_v4, %v2330_v55  ;;  %v2332_v35 = vpop.f32.mrb[119].mxu1  ;;  %v2557_v9 = vpop.f32.mrb[119].mxu0 }
 0x377   : > { %v2556_v45 = vadd.f32 %v2555_v25, %v2331_v31 }
 0x378   : > { %v2335_v15 = vpop.f32.mrb[120].mxu1 }
 0x379   : > { %2606 = vst [vmem:[%s5475_s10 + $0xd8] sm:$0xff] %v2556_v45  ;;  %v2336_v22 = vadd.f32 %v5438_v4, %v2335_v15  ;;  %v2560_v7 = vpop.f32.mrb[120].mxu0  ;;  %v2337_v8 = vpop.f32.mrb[121].mxu1 }
 0x37a   : > { %v2562_v40 = vpop.f32.mrb[121].mxu0 }
 0x37b   : > { %v2561_v6 = vadd.f32 %v2560_v7, %v2336_v22 }
 0x37c   : > { %v2340_v60 = vpop.f32.mrb[122].mxu1 }
 0x37d   : > { %2607 = vst [vmem:[%s5475_s10 + $0xe0] sm:$0xff] %v2561_v6  ;;  %v2341_v39 = vadd.f32 %v5438_v4, %v2340_v60  ;;  %v2342_v24 = vpop.f32.mrb[123].mxu1 }
 0x37e   : > { %v2565_v10 = vpop.f32.mrb[122].mxu0 }
 0x37f   : > { %v2567_v11 = vpop.f32.mrb[123].mxu0  ;;  %v2566_v20 = vadd.f32 %v2565_v10, %v2341_v39 }
 0x381   : > { %v2345_v57 = vpop.f32.mrb[124].mxu1  ;;  %2608 = vst [vmem:[%s5475_s10 + $0xe8] sm:$0xff] %v2566_v20 }
 0x382   : > { %v2346_v59 = vadd.f32 %v5438_v4, %v2345_v57  ;;  %v2570_v34 = vpop.f32.mrb[124].mxu0  ;;  %v2347_v53 = vpop.f32.mrb[125].mxu1 }
 0x383   : > { %v2572_v46 = vpop.f32.mrb[125].mxu0 }
 0x384   : > { %v2571_v14 = vadd.f32 %v2570_v34, %v2346_v59 }
 0x385   : > { %v2350_v56 = vpop.f32.mrb[126].mxu1 }
 0x386   : > { %2609 = vst [vmem:[%s5475_s10 + $0xf0] sm:$0xff] %v2571_v14  ;;  %v2351_v52 = vadd.f32 %v5438_v4, %v2350_v56  ;;  %v2575_v12 = vpop.f32.mrb[126].mxu0  ;;  %v2352_v36 = vpop.f32.mrb[127].mxu1 }
 0x387   : > { %v2577_v63 = vpop.f32.mrb[127].mxu0 }
 0x388   : > { %v2576_v42 = vadd.f32 %v2575_v12, %v2351_v52 }
 0x38a   : > { %2610 = vst [vmem:[%s5475_s10 + $0xf8] sm:$0xff] %v2576_v42 }
 0x38b   : > { %3392 = shalt.err (!%p3389_p2)
}
 0x38c   : > { %s3393_s14 = scalar_lea.hbm %s5632_s11, 4096  ;;  %s3397_s12 = scalar_lea.hbm %s5684_s5, 8192 }
 0x38d   : > { %p3394_p13 = scmp.ne.s32.totalorder %s5632_s11, %s3393_s14  ;;  %p3398_p4 = scmp.lt.u32.totalorder %s5632_s11, %s5684_s5 }
 0x38e   : > { %p3399_p7 = scmp.lt.u32.totalorder %s3397_s12, %s3393_s14  ;;  %p3401_p11 = scmp.lt.u32.totalorder %s3393_s14, %s5632_s11 }
 0x38f   : > { %p3395_p6 = pnand %p3394_p13, %p6137_p0 }
 0x390   : > { %p3400_p8 = por %p3399_p7, %p3398_p4 }
 0x391   : > { %p3396_p10 = pneg %p3395_p6 }
 0x392   : > { %p3402_p1 = por %p3401_p11, %p3400_p8 }
 0x394   : > { %p3403_p3 = pnand %p3402_p1, %p3396_p10 }
 0x396   : > { %3406 = shalt.err (!%p3403_p3)
}
 0x397   : > { %s3461_s28 = smov 128   ;;  %s3462_s9 = smov 8  }
 0x398   : > { %2972 = dma.vmem_to_hbm [thread:$0]  (%p6137_p0), %s5634_s15, 4096, %s5632_s11, %s2612_s22, %s3461_s28, %s3461_s28, %s3462_s9  }
 0x399 PF: > { %s2640_s30 = sand.u32 1, %s3437_s18   ;;  %p6138_p5 = scmp.ne.s32.totalorder %s5776_s25, 0 }
 0x39a   : > { %p6139_p9 = scmp.ge.s32.totalorder %s3449_s21, 2  ;;  %s2641_s23 = scalar_lea.sflag [#allocation4], %s2640_s30 }
 0x39c   : > { %p2986_p12 = pnand %p6139_p9, %p6138_p5 }
 0x39e   : > { %3432 = dma.done.wait (!%p2986_p12), %s2641_s23, 4096  }
 0x39f   : > { %3434 = vsyncadd (!%p2986_p12), %s2641_s23, 4294963200  ;;  %p19_p2 = scmp.ge.s32.totalorder %s3606_s16, 4   ;;  %s6140_s18 = smov %s3441_s19 }
 0x3a0   : > { %s6141_s19 = smov %s3445_s20  ;;  %s6142_s20 = smov %s3615_s27 }
 0x3a1   : > { %s6143_s21 = smov %s3606_s16  ;;  %21 = sbr.rel (!%p19_p2) target bundleno = 6 (0x6), region = 93 }
 0x3a8   :  { %2646 = vsyncpa [#allocation3], 1 }
 0x3a9   :  { %2648 = vsyncpa [#allocation3 + $0x1], 1 }
 0x3aa   :  { %2649 = vsyncpa [#allocation6], 1 }
 0x3ab   :  { %2650 = vsyncpa [#allocation4], 1 }
 0x3ac   :  { %2652 = vsyncpa [#allocation4 + $0x1], 1 }

</bundles_post_ra>
